<compile_context>
chip_gen: v7x
topology: tpu7x:2x2x1
jax: 0.10.0
libtpu: 0.0.40
codegen_flags: <defaults>
</compile_context>

<pallas_src>
import functools

import jax
import jax.numpy as jnp
from jax.experimental import pallas as pl
from jax.experimental.pallas import tpu as pltpu


# ----------------------------------------------------------------------------
# Fused Pallas kernel: backbone + FPN + head, everything in VMEM.
# ----------------------------------------------------------------------------
def _siamtpn_fused_kernel(
    train_cols_ref, test_cols_ref,
    w_bb_ref, b_bb_ref, w_fpn_ref, b_fpn_ref,
    wq_ref, bq_ref, wk_ref, bk_ref, wv_ref, bv_ref,
    wo_ref, bo_ref, w_out_ref, b_out_ref,
    out_ref,
    *, batch, lq, lk, scale):
  f32 = jnp.float32
  bf16 = jnp.bfloat16

  def linear(x_bf16, w_ref, b_ref, relu=False):
    # bf16 operands on the MXU, f32 accumulation, f32 bias / activation.
    y = jnp.dot(x_bf16, w_ref[...], preferred_element_type=f32) + b_ref[...]
    if relu:
      y = jnp.maximum(y, 0.0)
    return y

  # backbone (3x3 conv expressed as an im2col GEMM) + FPN 1x1 projection
  t = linear(train_cols_ref[...], w_bb_ref, b_bb_ref, relu=True)   # (B*Lk, feat)
  t = linear(t.astype(bf16), w_fpn_ref, b_fpn_ref, relu=True)      # (B*Lk, D)
  s = linear(test_cols_ref[...], w_bb_ref, b_bb_ref, relu=True)    # (B*Lq, feat)
  s = linear(s.astype(bf16), w_fpn_ref, b_fpn_ref, relu=True)      # (B*Lq, D)

  # head: q from search tokens, k/v from template tokens
  q = linear(s.astype(bf16), wq_ref, bq_ref).astype(bf16)          # (B*Lq, D)
  k = linear(t.astype(bf16), wk_ref, bk_ref).astype(bf16)          # (B*Lk, D)
  v = linear(t.astype(bf16), wv_ref, bv_ref).astype(bf16)          # (B*Lk, D)

  # per-batch-element cross attention + output / cls / reg projections.
  # batch is tiny (static python loop); all slices are static sublane slices.
  for b in range(batch):
    qb = q[b * lq:(b + 1) * lq, :]                                  # (Lq, D)
    kb = k[b * lk:(b + 1) * lk, :]                                  # (Lk, D)
    vb = v[b * lk:(b + 1) * lk, :]                                  # (Lk, D)

    scores = jnp.dot(qb, kb.T, preferred_element_type=f32) * scale  # (Lq, Lk)
    scores = scores - jnp.max(scores, axis=-1, keepdims=True)
    p = jnp.exp(scores)
    denom = jnp.sum(p, axis=-1, keepdims=True)
    p = p * pl.reciprocal(denom, approx=True)                       # EUP recip

    attn = jnp.dot(p.astype(bf16), vb, preferred_element_type=f32)  # (Lq, D)
    fused = linear(attn.astype(bf16), wo_ref, bo_ref, relu=True)    # (Lq, D)
    # lane-dense (Lq, 128) store: col 0 = cls, cols 1..4 = reg, rest zero.
    out_ref[b * lq:(b + 1) * lq, :] = linear(
        fused.astype(bf16), w_out_ref, b_out_ref)


# ----------------------------------------------------------------------------
# Plain-JAX glue: im2col for the 3x3 'same' conv (channels-last).
# ----------------------------------------------------------------------------
# TODO(synk): the 3x3 neighbourhood gather stays in XLA; folding it into the
# kernel needs in-kernel rank-4 reshapes that Mosaic does not lower cleanly.
def _im2col_3x3_same(x_nhwc):
  """(B,H,W,C) -> (B,H,W,9*C) with zero padding (stride 1, 'same')."""
  B, H, W, C = x_nhwc.shape
  xp = jnp.pad(x_nhwc, ((0, 0), (1, 1), (1, 1), (0, 0)))
  patches = [xp[:, i:i + H, j:j + W, :] for i in range(3) for j in range(3)]
  return jnp.concatenate(patches, axis=-1)


# ----------------------------------------------------------------------------
# SiamTPN forward (mirrors the PyTorch wrapper)
# ----------------------------------------------------------------------------
def siamtpn_forward(params, train_imgs, test_img):
  """
  train_imgs: (num_images, B, C, H, W)   -- templates
  test_img:   (B, C, Hs, Ws)             -- search image
  """
  N, B, C, Ht, Wt = train_imgs.shape
  _, _, Hs, Ws = test_img.shape
  D = params["fpn_w"].shape[1]
  Lk = N * Ht * Wt                     # template tokens per batch element
  Lq = Hs * Ws                         # search tokens per batch element
  bf16 = jnp.bfloat16
  OUT_W = 128                          # lane-dense packed cls|reg output width

  # --- im2col (channels-last); template rows regrouped per batch element ----
  tr = jnp.transpose(train_imgs.reshape(N * B, C, Ht, Wt), (0, 2, 3, 1))
  tr_cols = _im2col_3x3_same(tr).reshape(N, B, Ht * Wt, 9 * C)
  tr_cols = jnp.transpose(tr_cols, (1, 0, 2, 3)).reshape(B * Lk, 9 * C)

  te = jnp.transpose(test_img, (0, 2, 3, 1))
  te_cols = _im2col_3x3_same(te).reshape(B * Lq, 9 * C)

  # --- pack weights: bf16 MXU operands, f32 biases, lane-dense cls|reg ------
  w_out = jnp.concatenate([params["w_cls"], params["w_reg"]], axis=1)  # (D, 5)
  w_out = jnp.pad(w_out, ((0, 0), (0, OUT_W - w_out.shape[1])))
  b_out = jnp.concatenate([params["b_cls"], params["b_reg"]])
  b_out = jnp.pad(b_out, (0, OUT_W - b_out.shape[0]))

  def w(x):
    return x.astype(bf16)

  def bvec(x):
    return x.reshape(1, -1).astype(jnp.float32)

  args = (
      tr_cols.astype(bf16), te_cols.astype(bf16),
      w(params["bb_w"]), bvec(params["bb_b"]),
      w(params["fpn_w"]), bvec(params["fpn_b"]),
      w(params["wq"]), bvec(params["bq"]),
      w(params["wk"]), bvec(params["bk"]),
      w(params["wv"]), bvec(params["bv"]),
      w(params["wo"]), bvec(params["bo"]),
      w(w_out), bvec(b_out),
  )

  kernel = functools.partial(
      _siamtpn_fused_kernel,
      batch=B, lq=Lq, lk=Lk, scale=1.0 / float(D) ** 0.5)

  out = pl.pallas_call(
      kernel,
      out_shape=jax.ShapeDtypeStruct((B * Lq, OUT_W), jnp.float32),
      grid_spec=pltpu.PrefetchScalarGridSpec(
          num_scalar_prefetch=0,
          grid=(1,),
          in_specs=[pl.BlockSpec(a.shape, lambda i: (0, 0)) for a in args],
          out_specs=pl.BlockSpec((B * Lq, OUT_W), lambda i: (0, 0)),
      ),
      compiler_params=pltpu.CompilerParams(
          dimension_semantics=("arbitrary",),
          vmem_limit_bytes=16 * 1024 * 1024),
  )(*args)

  cls = jnp.transpose(out[:, 0:1].reshape(B, Hs, Ws, 1), (0, 3, 1, 2))  # NCHW
  reg = jnp.transpose(out[:, 1:5].reshape(B, Hs, Ws, 4), (0, 3, 1, 2))
  return {"cls": cls, "reg": reg}


def init_params(key, c_in=4, feat=16, hidden=32):
  keys = jax.random.split(key, 16)
  s = 0.1

  def w(k, shape):
    return (s * jax.random.normal(k, shape)).astype(jnp.float32)

  return {
      "bb_w": w(keys[0], (9 * c_in, feat)),
      "bb_b": jnp.zeros((feat,), jnp.float32),
      "fpn_w": w(keys[1], (feat, hidden)),
      "fpn_b": jnp.zeros((hidden,), jnp.float32),
      "wq": w(keys[2], (hidden, hidden)), "bq": jnp.zeros((hidden,), jnp.float32),
      "wk": w(keys[3], (hidden, hidden)), "bk": jnp.zeros((hidden,), jnp.float32),
      "wv": w(keys[4], (hidden, hidden)), "bv": jnp.zeros((hidden,), jnp.float32),
      "wo": w(keys[5], (hidden, hidden)), "bo": jnp.zeros((hidden,), jnp.float32),
      "w_cls": w(keys[6], (hidden, 1)), "b_cls": jnp.zeros((1,), jnp.float32),
      "w_reg": w(keys[7], (hidden, 4)), "b_reg": jnp.zeros((4,), jnp.float32),
  }


if __name__ == "__main__":
  key = jax.random.PRNGKey(0)
  k_p, k_tr, k_te = jax.random.split(key, 3)

  num_templates, B, C = 2, 2, 4
  Ht = Wt = 8          # template spatial size
  Hs = Ws = 16         # search spatial size
  hidden = 32

  params = init_params(k_p, c_in=C, feat=16, hidden=hidden)
  train_imgs = jax.random.normal(k_tr, (num_templates, B, C, Ht, Wt),
                                 dtype=jnp.float32)
  test_img = jax.random.normal(k_te, (B, C, Hs, Ws), dtype=jnp.float32)

  fwd = jax.jit(siamtpn_forward)
  out = fwd(params, train_imgs, test_img)
  jax.block_until_ready(out)

  assert out["cls"].shape == (B, 1, Hs, Ws)
  assert out["reg"].shape == (B, 4, Hs, Ws)
  print("KERNEL_OK")
</pallas_src>

<mosaic_0001>
module attributes {stable_mosaic.version = 11 : i64} {
  func.func @_siamtpn_fused_kernel(%arg0: i32, %arg1: memref<256x36xbf16, #tpu.memory_space<vmem>>, %arg2: memref<512x36xbf16, #tpu.memory_space<vmem>>, %arg3: memref<36x16xbf16, #tpu.memory_space<vmem>>, %arg4: memref<1x16xf32, #tpu.memory_space<vmem>>, %arg5: memref<16x32xbf16, #tpu.memory_space<vmem>>, %arg6: memref<1x32xf32, #tpu.memory_space<vmem>>, %arg7: memref<32x32xbf16, #tpu.memory_space<vmem>>, %arg8: memref<1x32xf32, #tpu.memory_space<vmem>>, %arg9: memref<32x32xbf16, #tpu.memory_space<vmem>>, %arg10: memref<1x32xf32, #tpu.memory_space<vmem>>, %arg11: memref<32x32xbf16, #tpu.memory_space<vmem>>, %arg12: memref<1x32xf32, #tpu.memory_space<vmem>>, %arg13: memref<32x32xbf16, #tpu.memory_space<vmem>>, %arg14: memref<1x32xf32, #tpu.memory_space<vmem>>, %arg15: memref<32x128xbf16, #tpu.memory_space<vmem>>, %arg16: memref<1x128xf32, #tpu.memory_space<vmem>>, %arg17: memref<512x128xf32, #tpu.memory_space<vmem>>) attributes {dimension_semantics = [#tpu.dimension_semantics<arbitrary>], iteration_bounds = array<i64: 1>, scalar_prefetch = 0 : i64, scratch_operands = 0 : i64, tpu.core_type = #tpu.core_type<tc>, window_params = [{pipeline_mode = #tpu.pipeline_mode<synchronous>, transform_indices = @transform_0, window_bounds = array<i64: 256, 36>}, {pipeline_mode = #tpu.pipeline_mode<synchronous>, transform_indices = @transform_1, window_bounds = array<i64: 512, 36>}, {pipeline_mode = #tpu.pipeline_mode<synchronous>, transform_indices = @transform_2, window_bounds = array<i64: 36, 16>}, {pipeline_mode = #tpu.pipeline_mode<synchronous>, transform_indices = @transform_3, window_bounds = array<i64: 1, 16>}, {pipeline_mode = #tpu.pipeline_mode<synchronous>, transform_indices = @transform_4, window_bounds = array<i64: 16, 32>}, {pipeline_mode = #tpu.pipeline_mode<synchronous>, transform_indices = @transform_5, window_bounds = array<i64: 1, 32>}, {pipeline_mode = #tpu.pipeline_mode<synchronous>, transform_indices = @transform_6, window_bounds = array<i64: 32, 32>}, {pipeline_mode = #tpu.pipeline_mode<synchronous>, transform_indices = @transform_7, window_bounds = array<i64: 1, 32>}, {pipeline_mode = #tpu.pipeline_mode<synchronous>, transform_indices = @transform_8, window_bounds = array<i64: 32, 32>}, {pipeline_mode = #tpu.pipeline_mode<synchronous>, transform_indices = @transform_9, window_bounds = array<i64: 1, 32>}, {pipeline_mode = #tpu.pipeline_mode<synchronous>, transform_indices = @transform_10, window_bounds = array<i64: 32, 32>}, {pipeline_mode = #tpu.pipeline_mode<synchronous>, transform_indices = @transform_11, window_bounds = array<i64: 1, 32>}, {pipeline_mode = #tpu.pipeline_mode<synchronous>, transform_indices = @transform_12, window_bounds = array<i64: 32, 32>}, {pipeline_mode = #tpu.pipeline_mode<synchronous>, transform_indices = @transform_13, window_bounds = array<i64: 1, 32>}, {pipeline_mode = #tpu.pipeline_mode<synchronous>, transform_indices = @transform_14, window_bounds = array<i64: 32, 128>}, {pipeline_mode = #tpu.pipeline_mode<synchronous>, transform_indices = @transform_15, window_bounds = array<i64: 1, 128>}, {pipeline_mode = #tpu.pipeline_mode<synchronous>, transform_indices = @transform_16, window_bounds = array<i64: 512, 128>}]} {
    %c0 = arith.constant 0 : index
    %c0_0 = arith.constant 0 : index
    %0 = vector.load %arg1[%c0, %c0_0] : memref<256x36xbf16, #tpu.memory_space<vmem>>, vector<256x36xbf16>
    %c0_1 = arith.constant 0 : index
    %c0_2 = arith.constant 0 : index
    %1 = vector.load %arg3[%c0_1, %c0_2] : memref<36x16xbf16, #tpu.memory_space<vmem>>, vector<36x16xbf16>
    %cst = arith.constant dense<0.000000e+00> : vector<256x16xf32>
    %2 = tpu.matmul %0, %1, %cst {dimension_numbers = #tpu.dot_dimension_numbers<[1], [0], [0], [1], [0, 0, 1, 1], [], []>} : vector<256x36xbf16>, vector<36x16xbf16>, vector<256x16xf32> -> vector<256x16xf32>
    %c0_3 = arith.constant 0 : index
    %c0_4 = arith.constant 0 : index
    %3 = vector.load %arg4[%c0_3, %c0_4] : memref<1x16xf32, #tpu.memory_space<vmem>>, vector<1x16xf32>
    %4 = vector.broadcast %3 : vector<1x16xf32> to vector<256x16xf32>
    %5 = arith.addf %2, %4 : vector<256x16xf32>
    %cst_5 = arith.constant 0.000000e+00 : f32
    %6 = vector.broadcast %cst_5 : f32 to vector<256x16xf32>
    %7 = arith.maximumf %5, %6 : vector<256x16xf32>
    %8 = arith.truncf %7 : vector<256x16xf32> to vector<256x16xbf16>
    %c0_6 = arith.constant 0 : index
    %c0_7 = arith.constant 0 : index
    %9 = vector.load %arg5[%c0_6, %c0_7] : memref<16x32xbf16, #tpu.memory_space<vmem>>, vector<16x32xbf16>
    %cst_8 = arith.constant dense<0.000000e+00> : vector<256x32xf32>
    %10 = tpu.matmul %8, %9, %cst_8 {dimension_numbers = #tpu.dot_dimension_numbers<[1], [0], [0], [1], [0, 0, 1, 1], [], []>} : vector<256x16xbf16>, vector<16x32xbf16>, vector<256x32xf32> -> vector<256x32xf32>
    %c0_9 = arith.constant 0 : index
    %c0_10 = arith.constant 0 : index
    %11 = vector.load %arg6[%c0_9, %c0_10] : memref<1x32xf32, #tpu.memory_space<vmem>>, vector<1x32xf32>
    %12 = vector.broadcast %11 : vector<1x32xf32> to vector<256x32xf32>
    %13 = arith.addf %10, %12 : vector<256x32xf32>
    %cst_11 = arith.constant 0.000000e+00 : f32
    %14 = vector.broadcast %cst_11 : f32 to vector<256x32xf32>
    %15 = arith.maximumf %13, %14 : vector<256x32xf32>
    %c0_12 = arith.constant 0 : index
    %c0_13 = arith.constant 0 : index
    %16 = vector.load %arg2[%c0_12, %c0_13] : memref<512x36xbf16, #tpu.memory_space<vmem>>, vector<512x36xbf16>
    %c0_14 = arith.constant 0 : index
    %c0_15 = arith.constant 0 : index
    %17 = vector.load %arg3[%c0_14, %c0_15] : memref<36x16xbf16, #tpu.memory_space<vmem>>, vector<36x16xbf16>
    %cst_16 = arith.constant dense<0.000000e+00> : vector<512x16xf32>
    %18 = tpu.matmul %16, %17, %cst_16 {dimension_numbers = #tpu.dot_dimension_numbers<[1], [0], [0], [1], [0, 0, 1, 1], [], []>} : vector<512x36xbf16>, vector<36x16xbf16>, vector<512x16xf32> -> vector<512x16xf32>
    %c0_17 = arith.constant 0 : index
    %c0_18 = arith.constant 0 : index
    %19 = vector.load %arg4[%c0_17, %c0_18] : memref<1x16xf32, #tpu.memory_space<vmem>>, vector<1x16xf32>
    %20 = vector.broadcast %19 : vector<1x16xf32> to vector<512x16xf32>
    %21 = arith.addf %18, %20 : vector<512x16xf32>
    %cst_19 = arith.constant 0.000000e+00 : f32
    %22 = vector.broadcast %cst_19 : f32 to vector<512x16xf32>
    %23 = arith.maximumf %21, %22 : vector<512x16xf32>
    %24 = arith.truncf %23 : vector<512x16xf32> to vector<512x16xbf16>
    %c0_20 = arith.constant 0 : index
    %c0_21 = arith.constant 0 : index
    %25 = vector.load %arg5[%c0_20, %c0_21] : memref<16x32xbf16, #tpu.memory_space<vmem>>, vector<16x32xbf16>
    %cst_22 = arith.constant dense<0.000000e+00> : vector<512x32xf32>
    %26 = tpu.matmul %24, %25, %cst_22 {dimension_numbers = #tpu.dot_dimension_numbers<[1], [0], [0], [1], [0, 0, 1, 1], [], []>} : vector<512x16xbf16>, vector<16x32xbf16>, vector<512x32xf32> -> vector<512x32xf32>
    %c0_23 = arith.constant 0 : index
    %c0_24 = arith.constant 0 : index
    %27 = vector.load %arg6[%c0_23, %c0_24] : memref<1x32xf32, #tpu.memory_space<vmem>>, vector<1x32xf32>
    %28 = vector.broadcast %27 : vector<1x32xf32> to vector<512x32xf32>
    %29 = arith.addf %26, %28 : vector<512x32xf32>
    %cst_25 = arith.constant 0.000000e+00 : f32
    %30 = vector.broadcast %cst_25 : f32 to vector<512x32xf32>
    %31 = arith.maximumf %29, %30 : vector<512x32xf32>
    %32 = arith.truncf %31 : vector<512x32xf32> to vector<512x32xbf16>
    %c0_26 = arith.constant 0 : index
    %c0_27 = arith.constant 0 : index
    %33 = vector.load %arg7[%c0_26, %c0_27] : memref<32x32xbf16, #tpu.memory_space<vmem>>, vector<32x32xbf16>
    %cst_28 = arith.constant dense<0.000000e+00> : vector<512x32xf32>
    %34 = tpu.matmul %32, %33, %cst_28 {dimension_numbers = #tpu.dot_dimension_numbers<[1], [0], [0], [1], [0, 0, 1, 1], [], []>} : vector<512x32xbf16>, vector<32x32xbf16>, vector<512x32xf32> -> vector<512x32xf32>
    %c0_29 = arith.constant 0 : index
    %c0_30 = arith.constant 0 : index
    %35 = vector.load %arg8[%c0_29, %c0_30] : memref<1x32xf32, #tpu.memory_space<vmem>>, vector<1x32xf32>
    %36 = vector.broadcast %35 : vector<1x32xf32> to vector<512x32xf32>
    %37 = arith.addf %34, %36 : vector<512x32xf32>
    %38 = arith.truncf %37 : vector<512x32xf32> to vector<512x32xbf16>
    %39 = arith.truncf %15 : vector<256x32xf32> to vector<256x32xbf16>
    %c0_31 = arith.constant 0 : index
    %c0_32 = arith.constant 0 : index
    %40 = vector.load %arg9[%c0_31, %c0_32] : memref<32x32xbf16, #tpu.memory_space<vmem>>, vector<32x32xbf16>
    %cst_33 = arith.constant dense<0.000000e+00> : vector<256x32xf32>
    %41 = tpu.matmul %39, %40, %cst_33 {dimension_numbers = #tpu.dot_dimension_numbers<[1], [0], [0], [1], [0, 0, 1, 1], [], []>} : vector<256x32xbf16>, vector<32x32xbf16>, vector<256x32xf32> -> vector<256x32xf32>
    %c0_34 = arith.constant 0 : index
    %c0_35 = arith.constant 0 : index
    %42 = vector.load %arg10[%c0_34, %c0_35] : memref<1x32xf32, #tpu.memory_space<vmem>>, vector<1x32xf32>
    %43 = vector.broadcast %42 : vector<1x32xf32> to vector<256x32xf32>
    %44 = arith.addf %41, %43 : vector<256x32xf32>
    %45 = arith.truncf %44 : vector<256x32xf32> to vector<256x32xbf16>
    %46 = arith.truncf %15 : vector<256x32xf32> to vector<256x32xbf16>
    %c0_36 = arith.constant 0 : index
    %c0_37 = arith.constant 0 : index
    %47 = vector.load %arg11[%c0_36, %c0_37] : memref<32x32xbf16, #tpu.memory_space<vmem>>, vector<32x32xbf16>
    %cst_38 = arith.constant dense<0.000000e+00> : vector<256x32xf32>
    %48 = tpu.matmul %46, %47, %cst_38 {dimension_numbers = #tpu.dot_dimension_numbers<[1], [0], [0], [1], [0, 0, 1, 1], [], []>} : vector<256x32xbf16>, vector<32x32xbf16>, vector<256x32xf32> -> vector<256x32xf32>
    %c0_39 = arith.constant 0 : index
    %c0_40 = arith.constant 0 : index
    %49 = vector.load %arg12[%c0_39, %c0_40] : memref<1x32xf32, #tpu.memory_space<vmem>>, vector<1x32xf32>
    %50 = vector.broadcast %49 : vector<1x32xf32> to vector<256x32xf32>
    %51 = arith.addf %48, %50 : vector<256x32xf32>
    %52 = arith.truncf %51 : vector<256x32xf32> to vector<256x32xbf16>
    %53 = vector.extract_strided_slice %38 {offsets = [0, 0], sizes = [256, 32], strides = [1, 1]} : vector<512x32xbf16> to vector<256x32xbf16>
    %54 = vector.extract_strided_slice %45 {offsets = [0, 0], sizes = [128, 32], strides = [1, 1]} : vector<256x32xbf16> to vector<128x32xbf16>
    %55 = vector.extract_strided_slice %52 {offsets = [0, 0], sizes = [128, 32], strides = [1, 1]} : vector<256x32xbf16> to vector<128x32xbf16>
    %56 = tpu.transpose %54, [1, 0] : vector<128x32xbf16> -> vector<32x128xbf16>
    %cst_41 = arith.constant dense<0.000000e+00> : vector<256x128xf32>
    %57 = tpu.matmul %53, %56, %cst_41 {dimension_numbers = #tpu.dot_dimension_numbers<[1], [0], [0], [1], [0, 0, 1, 1], [], []>} : vector<256x32xbf16>, vector<32x128xbf16>, vector<256x128xf32> -> vector<256x128xf32>
    %cst_42 = arith.constant 0.176776692 : f32
    %58 = vector.broadcast %cst_42 : f32 to vector<256x128xf32>
    %59 = arith.mulf %57, %58 : vector<256x128xf32>
    %cst_43 = arith.constant dense<0xFF800000> : vector<256xf32>
    %60 = vector.multi_reduction <maximumf>, %59, %cst_43 [1] : vector<256x128xf32> to vector<256xf32>
    %61 = vector.shape_cast %60 : vector<256xf32> to vector<256x1xf32>
    %62 = vector.broadcast %61 : vector<256x1xf32> to vector<256x128xf32>
    %63 = arith.subf %59, %62 : vector<256x128xf32>
    %64 = math.exp %63 : vector<256x128xf32>
    %cst_44 = arith.constant dense<0.000000e+00> : vector<256xf32>
    %65 = vector.multi_reduction <add>, %64, %cst_44 [1] : vector<256x128xf32> to vector<256xf32>
    %66 = vector.shape_cast %65 : vector<256xf32> to vector<256x1xf32>
    %67 = tpu.reciprocal %66 {approx = true} : vector<256x1xf32> -> vector<256x1xf32>
    %68 = vector.broadcast %67 : vector<256x1xf32> to vector<256x128xf32>
    %69 = arith.mulf %64, %68 : vector<256x128xf32>
    %70 = arith.truncf %69 : vector<256x128xf32> to vector<256x128xbf16>
    %cst_45 = arith.constant dense<0.000000e+00> : vector<256x32xf32>
    %71 = tpu.matmul %70, %55, %cst_45 {dimension_numbers = #tpu.dot_dimension_numbers<[1], [0], [0], [1], [0, 0, 1, 1], [], []>} : vector<256x128xbf16>, vector<128x32xbf16>, vector<256x32xf32> -> vector<256x32xf32>
    %72 = arith.truncf %71 : vector<256x32xf32> to vector<256x32xbf16>
    %c0_46 = arith.constant 0 : index
    %c0_47 = arith.constant 0 : index
    %73 = vector.load %arg13[%c0_46, %c0_47] : memref<32x32xbf16, #tpu.memory_space<vmem>>, vector<32x32xbf16>
    %cst_48 = arith.constant dense<0.000000e+00> : vector<256x32xf32>
    %74 = tpu.matmul %72, %73, %cst_48 {dimension_numbers = #tpu.dot_dimension_numbers<[1], [0], [0], [1], [0, 0, 1, 1], [], []>} : vector<256x32xbf16>, vector<32x32xbf16>, vector<256x32xf32> -> vector<256x32xf32>
    %c0_49 = arith.constant 0 : index
    %c0_50 = arith.constant 0 : index
    %75 = vector.load %arg14[%c0_49, %c0_50] : memref<1x32xf32, #tpu.memory_space<vmem>>, vector<1x32xf32>
    %76 = vector.broadcast %75 : vector<1x32xf32> to vector<256x32xf32>
    %77 = arith.addf %74, %76 : vector<256x32xf32>
    %cst_51 = arith.constant 0.000000e+00 : f32
    %78 = vector.broadcast %cst_51 : f32 to vector<256x32xf32>
    %79 = arith.maximumf %77, %78 : vector<256x32xf32>
    %80 = arith.truncf %79 : vector<256x32xf32> to vector<256x32xbf16>
    %c0_52 = arith.constant 0 : index
    %c0_53 = arith.constant 0 : index
    %81 = vector.load %arg15[%c0_52, %c0_53] : memref<32x128xbf16, #tpu.memory_space<vmem>>, vector<32x128xbf16>
    %cst_54 = arith.constant dense<0.000000e+00> : vector<256x128xf32>
    %82 = tpu.matmul %80, %81, %cst_54 {dimension_numbers = #tpu.dot_dimension_numbers<[1], [0], [0], [1], [0, 0, 1, 1], [], []>} : vector<256x32xbf16>, vector<32x128xbf16>, vector<256x128xf32> -> vector<256x128xf32>
    %c0_55 = arith.constant 0 : index
    %c0_56 = arith.constant 0 : index
    %83 = vector.load %arg16[%c0_55, %c0_56] : memref<1x128xf32, #tpu.memory_space<vmem>>, vector<1x128xf32>
    %84 = vector.broadcast %83 : vector<1x128xf32> to vector<256x128xf32>
    %85 = arith.addf %82, %84 : vector<256x128xf32>
    %c0_57 = arith.constant 0 : index
    %c0_58 = arith.constant 0 : index
    %86 = vector.load %arg17[%c0_57, %c0_58] : memref<512x128xf32, #tpu.memory_space<vmem>>, vector<256x128xf32>
    tpu.vector_store %arg17[%c0_57, %c0_58], %85 {strides = array<i32>} : memref<512x128xf32, #tpu.memory_space<vmem>>, vector<256x128xf32>,
    %87 = vector.extract_strided_slice %38 {offsets = [256, 0], sizes = [256, 32], strides = [1, 1]} : vector<512x32xbf16> to vector<256x32xbf16>
    %88 = vector.extract_strided_slice %45 {offsets = [128, 0], sizes = [128, 32], strides = [1, 1]} : vector<256x32xbf16> to vector<128x32xbf16>
    %89 = vector.extract_strided_slice %52 {offsets = [128, 0], sizes = [128, 32], strides = [1, 1]} : vector<256x32xbf16> to vector<128x32xbf16>
    %90 = tpu.transpose %88, [1, 0] : vector<128x32xbf16> -> vector<32x128xbf16>
    %cst_59 = arith.constant dense<0.000000e+00> : vector<256x128xf32>
    %91 = tpu.matmul %87, %90, %cst_59 {dimension_numbers = #tpu.dot_dimension_numbers<[1], [0], [0], [1], [0, 0, 1, 1], [], []>} : vector<256x32xbf16>, vector<32x128xbf16>, vector<256x128xf32> -> vector<256x128xf32>
    %cst_60 = arith.constant 0.176776692 : f32
    %92 = vector.broadcast %cst_60 : f32 to vector<256x128xf32>
    %93 = arith.mulf %91, %92 : vector<256x128xf32>
    %cst_61 = arith.constant dense<0xFF800000> : vector<256xf32>
    %94 = vector.multi_reduction <maximumf>, %93, %cst_61 [1] : vector<256x128xf32> to vector<256xf32>
    %95 = vector.shape_cast %94 : vector<256xf32> to vector<256x1xf32>
    %96 = vector.broadcast %95 : vector<256x1xf32> to vector<256x128xf32>
    %97 = arith.subf %93, %96 : vector<256x128xf32>
    %98 = math.exp %97 : vector<256x128xf32>
    %cst_62 = arith.constant dense<0.000000e+00> : vector<256xf32>
    %99 = vector.multi_reduction <add>, %98, %cst_62 [1] : vector<256x128xf32> to vector<256xf32>
    %100 = vector.shape_cast %99 : vector<256xf32> to vector<256x1xf32>
    %101 = tpu.reciprocal %100 {approx = true} : vector<256x1xf32> -> vector<256x1xf32>
    %102 = vector.broadcast %101 : vector<256x1xf32> to vector<256x128xf32>
    %103 = arith.mulf %98, %102 : vector<256x128xf32>
    %104 = arith.truncf %103 : vector<256x128xf32> to vector<256x128xbf16>
    %cst_63 = arith.constant dense<0.000000e+00> : vector<256x32xf32>
    %105 = tpu.matmul %104, %89, %cst_63 {dimension_numbers = #tpu.dot_dimension_numbers<[1], [0], [0], [1], [0, 0, 1, 1], [], []>} : vector<256x128xbf16>, vector<128x32xbf16>, vector<256x32xf32> -> vector<256x32xf32>
    %106 = arith.truncf %105 : vector<256x32xf32> to vector<256x32xbf16>
    %c0_64 = arith.constant 0 : index
    %c0_65 = arith.constant 0 : index
    %107 = vector.load %arg13[%c0_64, %c0_65] : memref<32x32xbf16, #tpu.memory_space<vmem>>, vector<32x32xbf16>
    %cst_66 = arith.constant dense<0.000000e+00> : vector<256x32xf32>
    %108 = tpu.matmul %106, %107, %cst_66 {dimension_numbers = #tpu.dot_dimension_numbers<[1], [0], [0], [1], [0, 0, 1, 1], [], []>} : vector<256x32xbf16>, vector<32x32xbf16>, vector<256x32xf32> -> vector<256x32xf32>
    %c0_67 = arith.constant 0 : index
    %c0_68 = arith.constant 0 : index
    %109 = vector.load %arg14[%c0_67, %c0_68] : memref<1x32xf32, #tpu.memory_space<vmem>>, vector<1x32xf32>
    %110 = vector.broadcast %109 : vector<1x32xf32> to vector<256x32xf32>
    %111 = arith.addf %108, %110 : vector<256x32xf32>
    %cst_69 = arith.constant 0.000000e+00 : f32
    %112 = vector.broadcast %cst_69 : f32 to vector<256x32xf32>
    %113 = arith.maximumf %111, %112 : vector<256x32xf32>
    %114 = arith.truncf %113 : vector<256x32xf32> to vector<256x32xbf16>
    %c0_70 = arith.constant 0 : index
    %c0_71 = arith.constant 0 : index
    %115 = vector.load %arg15[%c0_70, %c0_71] : memref<32x128xbf16, #tpu.memory_space<vmem>>, vector<32x128xbf16>
    %cst_72 = arith.constant dense<0.000000e+00> : vector<256x128xf32>
    %116 = tpu.matmul %114, %115, %cst_72 {dimension_numbers = #tpu.dot_dimension_numbers<[1], [0], [0], [1], [0, 0, 1, 1], [], []>} : vector<256x32xbf16>, vector<32x128xbf16>, vector<256x128xf32> -> vector<256x128xf32>
    %c0_73 = arith.constant 0 : index
    %c0_74 = arith.constant 0 : index
    %117 = vector.load %arg16[%c0_73, %c0_74] : memref<1x128xf32, #tpu.memory_space<vmem>>, vector<1x128xf32>
    %118 = vector.broadcast %117 : vector<1x128xf32> to vector<256x128xf32>
    %119 = arith.addf %116, %118 : vector<256x128xf32>
    %c256 = arith.constant 256 : index
    %c0_75 = arith.constant 0 : index
    %120 = vector.load %arg17[%c256, %c0_75] : memref<512x128xf32, #tpu.memory_space<vmem>>, vector<256x128xf32>
    tpu.vector_store %arg17[%c256, %c0_75], %119 {strides = array<i32>} : memref<512x128xf32, #tpu.memory_space<vmem>>, vector<256x128xf32>,
    return
  }
  func.func @transform_0(%arg0: i32) -> (i32, i32) {
    %c0_i32 = arith.constant 0 : i32
    %c0_i32_0 = arith.constant 0 : i32
    %c0_i32_1 = arith.constant 0 : i32
    return %c0_i32, %c0_i32_0 : i32, i32
  }
  func.func @transform_1(%arg0: i32) -> (i32, i32) {
    %c0_i32 = arith.constant 0 : i32
    %c0_i32_0 = arith.constant 0 : i32
    %c0_i32_1 = arith.constant 0 : i32
    return %c0_i32, %c0_i32_0 : i32, i32
  }
  func.func @transform_2(%arg0: i32) -> (i32, i32) {
    %c0_i32 = arith.constant 0 : i32
    %c0_i32_0 = arith.constant 0 : i32
    %c0_i32_1 = arith.constant 0 : i32
    return %c0_i32, %c0_i32_0 : i32, i32
  }
  func.func @transform_3(%arg0: i32) -> (i32, i32) {
    %c0_i32 = arith.constant 0 : i32
    %c0_i32_0 = arith.constant 0 : i32
    %c0_i32_1 = arith.constant 0 : i32
    return %c0_i32, %c0_i32_0 : i32, i32
  }
  func.func @transform_4(%arg0: i32) -> (i32, i32) {
    %c0_i32 = arith.constant 0 : i32
    %c0_i32_0 = arith.constant 0 : i32
    %c0_i32_1 = arith.constant 0 : i32
    return %c0_i32, %c0_i32_0 : i32, i32
  }
  func.func @transform_5(%arg0: i32) -> (i32, i32) {
    %c0_i32 = arith.constant 0 : i32
    %c0_i32_0 = arith.constant 0 : i32
    %c0_i32_1 = arith.constant 0 : i32
    return %c0_i32, %c0_i32_0 : i32, i32
  }
  func.func @transform_6(%arg0: i32) -> (i32, i32) {
    %c0_i32 = arith.constant 0 : i32
    %c0_i32_0 = arith.constant 0 : i32
    %c0_i32_1 = arith.constant 0 : i32
    return %c0_i32, %c0_i32_0 : i32, i32
  }
  func.func @transform_7(%arg0: i32) -> (i32, i32) {
    %c0_i32 = arith.constant 0 : i32
    %c0_i32_0 = arith.constant 0 : i32
    %c0_i32_1 = arith.constant 0 : i32
    return %c0_i32, %c0_i32_0 : i32, i32
  }
  func.func @transform_8(%arg0: i32) -> (i32, i32) {
    %c0_i32 = arith.constant 0 : i32
    %c0_i32_0 = arith.constant 0 : i32
    %c0_i32_1 = arith.constant 0 : i32
    return %c0_i32, %c0_i32_0 : i32, i32
  }
  func.func @transform_9(%arg0: i32) -> (i32, i32) {
    %c0_i32 = arith.constant 0 : i32
    %c0_i32_0 = arith.constant 0 : i32
    %c0_i32_1 = arith.constant 0 : i32
    return %c0_i32, %c0_i32_0 : i32, i32
  }
  func.func @transform_10(%arg0: i32) -> (i32, i32) {
    %c0_i32 = arith.constant 0 : i32
    %c0_i32_0 = arith.constant 0 : i32
    %c0_i32_1 = arith.constant 0 : i32
    return %c0_i32, %c0_i32_0 : i32, i32
  }
  func.func @transform_11(%arg0: i32) -> (i32, i32) {
    %c0_i32 = arith.constant 0 : i32
    %c0_i32_0 = arith.constant 0 : i32
    %c0_i32_1 = arith.constant 0 : i32
    return %c0_i32, %c0_i32_0 : i32, i32
  }
  func.func @transform_12(%arg0: i32) -> (i32, i32) {
    %c0_i32 = arith.constant 0 : i32
    %c0_i32_0 = arith.constant 0 : i32
    %c0_i32_1 = arith.constant 0 : i32
    return %c0_i32, %c0_i32_0 : i32, i32
  }
  func.func @transform_13(%arg0: i32) -> (i32, i32) {
    %c0_i32 = arith.constant 0 : i32
    %c0_i32_0 = arith.constant 0 : i32
    %c0_i32_1 = arith.constant 0 : i32
    return %c0_i32, %c0_i32_0 : i32, i32
  }
  func.func @transform_14(%arg0: i32) -> (i32, i32) {
    %c0_i32 = arith.constant 0 : i32
    %c0_i32_0 = arith.constant 0 : i32
    %c0_i32_1 = arith.constant 0 : i32
    return %c0_i32, %c0_i32_0 : i32, i32
  }
  func.func @transform_15(%arg0: i32) -> (i32, i32) {
    %c0_i32 = arith.constant 0 : i32
    %c0_i32_0 = arith.constant 0 : i32
    %c0_i32_1 = arith.constant 0 : i32
    return %c0_i32, %c0_i32_0 : i32, i32
  }
  func.func @transform_16(%arg0: i32) -> (i32, i32) {
    %c0_i32 = arith.constant 0 : i32
    %c0_i32_0 = arith.constant 0 : i32
    %c0_i32_1 = arith.constant 0 : i32
    return %c0_i32, %c0_i32_0 : i32, i32
  }
}

</mosaic_0001>

<bundles_post_ra>
// kernel: siamtpn_forward.1
= control target key start
LH: loop header
LB: loop body
LE: loop exit
PB: predicated region body
PF: predicated region fallthrough
CT: control target
= control target key end

     0   :  { %vm193_vm0 = vcmask 293888   ;;  %vm242_vm1 = vcmask 1041408   ;;  %vm470_vm2 = vcmask 130048   ;;  %vm1921_vm3 = vcmask 261120   ;;  %s9176_s2 = inlined_call_operand.vmem [shape: bf16[36,16], index: 2, kind: input, shape index: {}]   ;;  %s9177_s0 = inlined_call_operand.vmem [shape: bf16[256,36], index: 0, kind: input, shape index: {}]   ;;  %s9178_s4 = inlined_call_operand.vmem [shape: bf16[16,32], index: 4, kind: input, shape index: {}]   ;;  %s9179_s1 = inlined_call_operand.vmem [shape: bf16[512,36], index: 1, kind: input, shape index: {}]   ;;  %s9180_s3 = inlined_call_operand.vmem [shape: f32[1,16], index: 3, kind: input, shape index: {}]   ;;  %s9181_s5 = inlined_call_operand.vmem [shape: f32[1,32], index: 5, kind: input, shape index: {}]   ;;  %s9182_s8 = inlined_call_operand.vmem [shape: bf16[32,32], index: 8, kind: input, shape index: {}]   ;;  %s9183_s6 = inlined_call_operand.vmem [shape: bf16[32,32], index: 6, kind: input, shape index: {}]   ;;  %s9184_s10 = inlined_call_operand.vmem [shape: bf16[32,32], index: 10, kind: input, shape index: {}]   ;;  %s9185_s12 = inlined_call_operand.vmem [shape: bf16[32,32], index: 12, kind: input, shape index: {}]   ;;  %s9186_s9 = inlined_call_operand.vmem [shape: f32[1,32], index: 9, kind: input, shape index: {}]   ;;  %s9187_s11 = inlined_call_operand.vmem [shape: f32[1,32], index: 11, kind: input, shape index: {}]   ;;  %s9188_s7 = inlined_call_operand.vmem [shape: f32[1,32], index: 7, kind: input, shape index: {}]   ;;  %s9189_s14 = inlined_call_operand.vmem [shape: bf16[32,128], index: 14, kind: input, shape index: {}]   ;;  %s9190_s13 = inlined_call_operand.vmem [shape: f32[1,32], index: 13, kind: input, shape index: {}]   ;;  %s9191_s15 = inlined_call_operand.vmem [shape: f32[1,128], index: 15, kind: input, shape index: {}]   ;;  %s9192_s16 = inlined_call_operand.vmem [shape: f32[512,128], index: 16, kind: output, shape index: {}]  }
   0x1   :  { %9226 = sst [smem:[#allocation34_spill]] %s9176_s2  ;;  %v6765_v3 = vld [vmem:[%s9177_s0] sm:$0xff]   ;;  %v6766_v5 = vld [vmem:[%s9177_s0 + $0x8] sm:$0xff]   ;;  %v6767_v6 = vld [vmem:[%s9177_s0 + $0x10] sm:$0xff]  }
   0x2   :  { %s9227_s23 = sld [smem:[#allocation34_spill]]  ;;  %6066 = vmatprep.mubr.msk.bf16.mxu0 %vm193_vm0, %v6765_v3  ;;  %v6768_v7 = vld [vmem:[%s9177_s0 + $0x18] sm:$0xff]   ;;  %v6769_v8 = vld [vmem:[%s9177_s0 + $0x20] sm:$0xff]   ;;  %v6770_v9 = vld [vmem:[%s9177_s0 + $0x28] sm:$0xff]  }
   0x3   :  { %v6771_v10 = vld [vmem:[%s9177_s0 + $0x30] sm:$0xff]   ;;  %v6772_v11 = vld [vmem:[%s9177_s0 + $0x38] sm:$0xff]   ;;  %v6773_v12 = vld [vmem:[%s9177_s0 + $0x40] sm:$0xff]  }
   0x4   :  { %v6774_v13 = vld [vmem:[%s9177_s0 + $0x48] sm:$0xff]   ;;  %v6775_v14 = vld [vmem:[%s9177_s0 + $0x50] sm:$0xff]   ;;  %v6776_v15 = vld [vmem:[%s9177_s0 + $0x58] sm:$0xff]  }
   0x5   :  { %v6777_v16 = vld [vmem:[%s9177_s0 + $0x60] sm:$0xff]   ;;  %v6778_v17 = vld [vmem:[%s9177_s0 + $0x68] sm:$0xff]   ;;  %v6779_v18 = vld [vmem:[%s9177_s0 + $0x70] sm:$0xff]  }
   0x6   :  { %v6780_v19 = vld [vmem:[%s9177_s0 + $0x78] sm:$0xff]   ;;  %v6781_v20 = vld [vmem:[%s9178_s4] sm:$0xff]  }
   0x7   :  { %6098 = vmatprep.subr.bf16.mxu1 %v6781_v20  ;;  %v7268_v21 = vld [vmem:[%s9180_s3] ss:$0 sm:$0xff] }
   0x8   :  { %v7174_v0 = vld [vmem:[%s9227_s23] sm:$0xff]   ;;  %v7179_v1 = vld [vmem:[%s9227_s23 + $0x8] sm:$0xff]   ;;  %v7185_v2 = vld [vmem:[%s9227_s23 + $0x10] ss:$0 sps:$4 sm:$0x33]   ;;  %6099 = vmatpush3.bf16.msra.mxu1 %v6781_v20 }
   0x9   :  { %6060 = vmatprep.subr.bf16.mxu0 %v7174_v0  ;;  %v7198_v4 = vsel %vm242_vm1, %v7185_v2, 0  ;;  %6132 = vmatprep.subr.bf16.mxu1 %v7174_v0 }
   0xa   :  { %6061 = vmatpush3.bf16.msra.mxu0 %v7174_v0 }
   0xb   :  { %6062 = vmatprep.subr.bf16.mxu0 %v7179_v1 }
   0xe   :  { %6063 = vmatpush3.bf16.msra.mxu0 %v7179_v1 }
   0xf   :  { %6744 = vmatprep.subr.msk.bf16.mxu0 %vm242_vm1, %v7185_v2 }
  0x12   :  { %6065 = vmatpush3.bf16.msra.mxu0 %v7198_v4 }
  0x13   :  { %6202 = vmatprep.subr.bf16.mxu0 %v6781_v20 }
  0x15   :  { %6067 = vmatmul.mubr.msk.bf16.vlgmr.msra.gmra.mrb[0].mxu0 %vm193_vm0, %v6766_v5 }
  0x16   :  { %6070 = vmatprep.mubr.msk.bf16.mxu0 %vm193_vm0, %v6767_v6  ;;  %6203 = vmatpush3.bf16.msra.mxu0 %v6781_v20 }
  0x1d   :  { %6071 = vmatmul.mubr.msk.bf16.gmra.mrb[4].mxu0 %vm193_vm0, %v6768_v7 }
  0x1e   :  { %6074 = vmatprep.mubr.msk.bf16.mxu0 %vm193_vm0, %v6769_v8 }
  0x25   :  { %6075 = vmatmul.mubr.msk.bf16.gmra.mrb[8].mxu0 %vm193_vm0, %v6770_v9 }
  0x26   :  { %6078 = vmatprep.mubr.msk.bf16.mxu0 %vm193_vm0, %v6771_v10 }
  0x2d   :  { %6079 = vmatmul.mubr.msk.bf16.gmra.mrb[12].mxu0 %vm193_vm0, %v6772_v11 }
  0x2e   :  { %6082 = vmatprep.mubr.msk.bf16.mxu0 %vm193_vm0, %v6773_v12 }
  0x35   :  { %6083 = vmatmul.mubr.msk.bf16.gmra.mrb[16].mxu0 %vm193_vm0, %v6774_v13 }
  0x36   :  { %6086 = vmatprep.mubr.msk.bf16.mxu0 %vm193_vm0, %v6775_v14 }
  0x3d   :  { %6087 = vmatmul.mubr.msk.bf16.gmra.mrb[20].mxu0 %vm193_vm0, %v6776_v15 }
  0x3e   :  { %6090 = vmatprep.mubr.msk.bf16.mxu0 %vm193_vm0, %v6777_v16 }
  0x45   :  { %6091 = vmatmul.mubr.msk.bf16.gmra.mrb[24].mxu0 %vm193_vm0, %v6778_v17 }
  0x46   :  { %6094 = vmatprep.mubr.msk.bf16.mxu0 %vm193_vm0, %v6779_v18 }
  0x4d   :  { %6095 = vmatmul.mubr.msk.bf16.gmra.mrb[28].mxu0 %vm193_vm0, %v6780_v19 }
  0xe8   :  { %v6068_v22 = vpop.f32.mrb[0].mxu0 }
  0xe9   :  { %v289_v23 = vadd.f32 %v6068_v22, %v7268_v21  ;;  %v280_v24 = vpop.f32.mrb[1].mxu0 }
  0xea   :  { %v281_v25 = vadd.f32 %v7268_v21, %v280_v24  ;;  %v6069_v26 = vpop.f32.mrb[2].mxu0 }
  0xeb   :  { %v292_v27 = vadd.f32 %v6069_v26, %v7268_v21  ;;  %v283_v28 = vpop.f32.mrb[3].mxu0  ;;  %v409_v30 = vmax.f32 %v289_v23, 0.0 }
  0xec   :  { %v284_v29 = vadd.f32 %v7268_v21, %v283_v28  ;;  %v407_v32 = vmax.f32 %v281_v25, 0.0 }
  0xed   :  { %v410_v31 = vmax.f32 %v292_v27, 0.0 }
  0xee   :  { %v408_v33 = vmax.f32 %v284_v29, 0.0 }
  0xef   :  { %v440_v34 = vpack.c.bf16 %v410_v31, %v409_v30 }
  0xf0   :  { %v6072_v35 = vpop.f32.mrb[4].mxu0  ;;  %v439_v36 = vpack.c.bf16 %v408_v33, %v407_v32 }
  0xf1   :  { %v305_v37 = vadd.f32 %v6072_v35, %v7268_v21  ;;  %v296_v38 = vpop.f32.mrb[5].mxu0 }
  0xf2   :  { %v297_v39 = vadd.f32 %v7268_v21, %v296_v38  ;;  %v6073_v40 = vpop.f32.mrb[6].mxu0  ;;  %6100 = vmatprep.mubr.msk.bf16.mxu1 %vm470_vm2, %v439_v36 }
  0xf3   :  { %v308_v41 = vadd.f32 %v6073_v40, %v7268_v21  ;;  %v299_v42 = vpop.f32.mrb[7].mxu0  ;;  %6101 = vmatmul.mubr.msk.bf16.vlgmr.msra.gmra.mrb[0].mxu1 %vm470_vm2, %v440_v34  ;;  %v413_v44 = vmax.f32 %v305_v37, 0.0 }
  0xf4   :  { %v300_v43 = vadd.f32 %v7268_v21, %v299_v42  ;;  %6133 = vmatpush3.bf16.msra.mxu1 %v7174_v0  ;;  %v411_v46 = vmax.f32 %v297_v39, 0.0 }
  0xf5   :  { %v414_v45 = vmax.f32 %v308_v41, 0.0  ;;  %6134 = vmatprep.subr.bf16.mxu1 %v7179_v1 }
  0xf6   :  { %v412_v47 = vmax.f32 %v300_v43, 0.0 }
  0xf7   :  { %v442_v48 = vpack.c.bf16 %v414_v45, %v413_v44 }
  0xf8   :  { %v441_v49 = vpack.c.bf16 %v412_v47, %v411_v46  ;;  %v6076_v50 = vpop.f32.mrb[8].mxu0  ;;  %6135 = vmatpush3.bf16.msra.mxu1 %v7179_v1 }
  0xf9   :  { %v321_v51 = vadd.f32 %v6076_v50, %v7268_v21  ;;  %v312_v52 = vpop.f32.mrb[9].mxu0  ;;  %6745 = vmatprep.subr.msk.bf16.mxu1 %vm242_vm1, %v7185_v2 }
  0xfa   :  { %v313_v53 = vadd.f32 %v7268_v21, %v312_v52  ;;  %v6077_v54 = vpop.f32.mrb[10].mxu0  ;;  %6104 = vmatprep.mubr.msk.bf16.mxu1 %vm470_vm2, %v441_v49 }
  0xfb   :  { %v324_v55 = vadd.f32 %v6077_v54, %v7268_v21  ;;  %v315_v56 = vpop.f32.mrb[11].mxu0  ;;  %6105 = vmatmul.mubr.msk.bf16.gmra.mrb[4].mxu1 %vm470_vm2, %v442_v48  ;;  %v417_v58 = vmax.f32 %v321_v51, 0.0 }
  0xfc   :  { %v316_v57 = vadd.f32 %v7268_v21, %v315_v56  ;;  %6137 = vmatpush3.bf16.msra.mxu1 %v7198_v4  ;;  %v415_v60 = vmax.f32 %v313_v53, 0.0 }
  0xfd   :  { %v418_v59 = vmax.f32 %v324_v55, 0.0 }
  0xfe   :  { %v416_v61 = vmax.f32 %v316_v57, 0.0 }
  0xff   :  { %v444_v62 = vpack.c.bf16 %v418_v59, %v417_v58 }
 0x100   :  { %v443_v63 = vpack.c.bf16 %v416_v61, %v415_v60  ;;  %v6080_v0 = vpop.f32.mrb[12].mxu0 }
 0x101   :  { %v337_v1 = vadd.f32 %v6080_v0, %v7268_v21  ;;  %v328_v2 = vpop.f32.mrb[13].mxu0 }
 0x102   :  { %v329_v3 = vadd.f32 %v7268_v21, %v328_v2  ;;  %v6081_v5 = vpop.f32.mrb[14].mxu0  ;;  %6108 = vmatprep.mubr.msk.bf16.mxu1 %vm470_vm2, %v443_v63 }
 0x103   :  { %v340_v6 = vadd.f32 %v6081_v5, %v7268_v21  ;;  %v331_v7 = vpop.f32.mrb[15].mxu0  ;;  %6109 = vmatmul.mubr.msk.bf16.gmra.mrb[8].mxu1 %vm470_vm2, %v444_v62  ;;  %v421_v8 = vmax.f32 %v337_v1, 0.0 }
 0x104   :  { %v332_v4 = vadd.f32 %v7268_v21, %v331_v7  ;;  %v419_v10 = vmax.f32 %v329_v3, 0.0 }
 0x105   :  { %v422_v9 = vmax.f32 %v340_v6, 0.0 }
 0x106   :  { %v420_v11 = vmax.f32 %v332_v4, 0.0  ;;  %v6782_v4 = vld [vmem:[%s9179_s1] sm:$0xff]  }
 0x107   :  { %v446_v12 = vpack.c.bf16 %v422_v9, %v421_v8  ;;  %v6783_v8 = vld [vmem:[%s9179_s1 + $0x8] sm:$0xff]   ;;  %v6784_v9 = vld [vmem:[%s9179_s1 + $0x10] sm:$0xff]  }
 0x108   :  { %v445_v13 = vpack.c.bf16 %v420_v11, %v419_v10  ;;  %v6084_v14 = vpop.f32.mrb[16].mxu0  ;;  %v6785_v10 = vld [vmem:[%s9179_s1 + $0x18] sm:$0xff]   ;;  %v6786_v11 = vld [vmem:[%s9179_s1 + $0x20] sm:$0xff]  }
 0x109   :  { %v353_v15 = vadd.f32 %v6084_v14, %v7268_v21  ;;  %v344_v16 = vpop.f32.mrb[17].mxu0  ;;  %v6789_v14 = vld [vmem:[%s9179_s1 + $0x38] sm:$0xff]  }
 0x10a   :  { %v345_v17 = vadd.f32 %v7268_v21, %v344_v16  ;;  %v6085_v18 = vpop.f32.mrb[18].mxu0  ;;  %6112 = vmatprep.mubr.msk.bf16.mxu1 %vm470_vm2, %v445_v13  ;;  %v6788_v13 = vld [vmem:[%s9179_s1 + $0x30] sm:$0xff]   ;;  %v6791_v16 = vld [vmem:[%s9179_s1 + $0x48] sm:$0xff]  }
 0x10b   :  { %v356_v19 = vadd.f32 %v6085_v18, %v7268_v21  ;;  %v347_v20 = vpop.f32.mrb[19].mxu0  ;;  %6113 = vmatmul.mubr.msk.bf16.gmra.mrb[12].mxu1 %vm470_vm2, %v446_v12  ;;  %v425_v23 = vmax.f32 %v353_v15, 0.0  ;;  %v6787_v12 = vld [vmem:[%s9179_s1 + $0x28] sm:$0xff]   ;;  %v6790_v15 = vld [vmem:[%s9179_s1 + $0x40] sm:$0xff]   ;;  %v6793_v18 = vld [vmem:[%s9179_s1 + $0x58] sm:$0xff]  }
 0x10c   :  { %v348_v22 = vadd.f32 %v7268_v21, %v347_v20  ;;  %v423_v25 = vmax.f32 %v345_v17, 0.0  ;;  %v6792_v17 = vld [vmem:[%s9179_s1 + $0x50] sm:$0xff]   ;;  %v6795_v20 = vld [vmem:[%s9179_s1 + $0x68] sm:$0xff]  }
 0x10d   :  { %v426_v24 = vmax.f32 %v356_v19, 0.0  ;;  %v6794_v19 = vld [vmem:[%s9179_s1 + $0x60] sm:$0xff]  }
 0x10e   :  { %v424_v26 = vmax.f32 %v348_v22, 0.0  ;;  %v6796_v22 = vld [vmem:[%s9179_s1 + $0x70] sm:$0xff]  }
 0x10f   :  { %v448_v27 = vpack.c.bf16 %v426_v24, %v425_v23  ;;  %v6797_v23 = vld [vmem:[%s9179_s1 + $0x78] sm:$0xff]   ;;  %v6798_v24 = vld [vmem:[%s9179_s1 + $0x80] sm:$0xff]  }
 0x110   :  { %v447_v28 = vpack.c.bf16 %v424_v26, %v423_v25  ;;  %v6088_v29 = vpop.f32.mrb[20].mxu0  ;;  %v6799_v25 = vld [vmem:[%s9179_s1 + $0x88] sm:$0xff]   ;;  %v6800_v26 = vld [vmem:[%s9179_s1 + $0x90] sm:$0xff]  }
 0x111   :  { %v369_v30 = vadd.f32 %v6088_v29, %v7268_v21  ;;  %v360_v31 = vpop.f32.mrb[21].mxu0  ;;  %v6803_v29 = vld [vmem:[%s9179_s1 + $0xa8] sm:$0xff]  }
 0x112   :  { %v361_v32 = vadd.f32 %v7268_v21, %v360_v31  ;;  %v6089_v33 = vpop.f32.mrb[22].mxu0  ;;  %6116 = vmatprep.mubr.msk.bf16.mxu1 %vm470_vm2, %v447_v28  ;;  %v6802_v28 = vld [vmem:[%s9179_s1 + $0xa0] sm:$0xff]   ;;  %v6805_v31 = vld [vmem:[%s9179_s1 + $0xb8] sm:$0xff]  }
 0x113   :  { %v372_v34 = vadd.f32 %v6089_v33, %v7268_v21  ;;  %v363_v35 = vpop.f32.mrb[23].mxu0  ;;  %6117 = vmatmul.mubr.msk.bf16.gmra.mrb[16].mxu1 %vm470_vm2, %v448_v27  ;;  %v429_v37 = vmax.f32 %v369_v30, 0.0  ;;  %v6801_v27 = vld [vmem:[%s9179_s1 + $0x98] sm:$0xff]   ;;  %v6804_v30 = vld [vmem:[%s9179_s1 + $0xb0] sm:$0xff]   ;;  %v6807_v33 = vld [vmem:[%s9179_s1 + $0xc8] sm:$0xff]  }
 0x114   :  { %v364_v36 = vadd.f32 %v7268_v21, %v363_v35  ;;  %v427_v39 = vmax.f32 %v361_v32, 0.0  ;;  %v6806_v32 = vld [vmem:[%s9179_s1 + $0xc0] sm:$0xff]   ;;  %v6809_v35 = vld [vmem:[%s9179_s1 + $0xd8] sm:$0xff]  }
 0x115   :  { %v430_v38 = vmax.f32 %v372_v34, 0.0  ;;  %v6808_v34 = vld [vmem:[%s9179_s1 + $0xd0] sm:$0xff]  }
 0x116   :  { %v428_v40 = vmax.f32 %v364_v36, 0.0  ;;  %v6810_v36 = vld [vmem:[%s9179_s1 + $0xe0] sm:$0xff]  }
 0x117   :  { %v450_v41 = vpack.c.bf16 %v430_v38, %v429_v37  ;;  %v6811_v37 = vld [vmem:[%s9179_s1 + $0xe8] sm:$0xff]   ;;  %v6812_v38 = vld [vmem:[%s9179_s1 + $0xf0] sm:$0xff]  }
 0x118   :  { %v449_v42 = vpack.c.bf16 %v428_v40, %v427_v39  ;;  %v6092_v43 = vpop.f32.mrb[24].mxu0  ;;  %v6813_v39 = vld [vmem:[%s9179_s1 + $0xf8] sm:$0xff]   ;;  %v7455_v40 = vld [vmem:[%s9181_s5] ss:$0 sm:$0xff] }
 0x119   :  { %v385_v44 = vadd.f32 %v6092_v43, %v7268_v21  ;;  %v376_v45 = vpop.f32.mrb[25].mxu0 }
 0x11a   :  { %v377_v46 = vadd.f32 %v7268_v21, %v376_v45  ;;  %v6093_v47 = vpop.f32.mrb[26].mxu0  ;;  %6120 = vmatprep.mubr.msk.bf16.mxu1 %vm470_vm2, %v449_v42 }
 0x11b   :  { %v388_v48 = vadd.f32 %v6093_v47, %v7268_v21  ;;  %v379_v49 = vpop.f32.mrb[27].mxu0  ;;  %6121 = vmatmul.mubr.msk.bf16.gmra.mrb[20].mxu1 %vm470_vm2, %v450_v41  ;;  %v433_v51 = vmax.f32 %v385_v44, 0.0 }
 0x11c   :  { %v380_v50 = vadd.f32 %v7268_v21, %v379_v49  ;;  %v431_v53 = vmax.f32 %v377_v46, 0.0 }
 0x11d   :  { %v434_v52 = vmax.f32 %v388_v48, 0.0 }
 0x11e   :  { %v432_v54 = vmax.f32 %v380_v50, 0.0 }
 0x11f   :  { %v452_v55 = vpack.c.bf16 %v434_v52, %v433_v51 }
 0x120   :  { %v451_v56 = vpack.c.bf16 %v432_v54, %v431_v53  ;;  %v6096_v57 = vpop.f32.mrb[28].mxu0 }
 0x121   :  { %v401_v58 = vadd.f32 %v6096_v57, %v7268_v21  ;;  %v392_v59 = vpop.f32.mrb[29].mxu0 }
 0x122   :  { %v393_v60 = vadd.f32 %v7268_v21, %v392_v59  ;;  %v6097_v61 = vpop.f32.mrb[30].mxu0  ;;  %6124 = vmatprep.mubr.msk.bf16.mxu1 %vm470_vm2, %v451_v56 }
 0x123   :  { %v404_v62 = vadd.f32 %v6097_v61, %v7268_v21  ;;  %v395_v63 = vpop.f32.mrb[31].mxu0  ;;  %6125 = vmatmul.mubr.msk.bf16.gmra.mrb[24].mxu1 %vm470_vm2, %v452_v55  ;;  %v437_v1 = vmax.f32 %v401_v58, 0.0 }
 0x124   :  { %v396_v0 = vadd.f32 %v7268_v21, %v395_v63  ;;  %v435_v3 = vmax.f32 %v393_v60, 0.0 }
 0x125   :  { %v438_v2 = vmax.f32 %v404_v62, 0.0 }
 0x126   :  { %v436_v5 = vmax.f32 %v396_v0, 0.0 }
 0x127   :  { %v454_v6 = vpack.c.bf16 %v438_v2, %v437_v1 }
 0x128   :  { %v453_v7 = vpack.c.bf16 %v436_v5, %v435_v3 }
 0x12a   :  { %6128 = vmatprep.mubr.msk.bf16.mxu1 %vm470_vm2, %v453_v7 }
 0x12b   :  { %6129 = vmatmul.mubr.msk.bf16.gmra.mrb[28].mxu1 %vm470_vm2, %v454_v6 }
 0x12c   :  { %6138 = vmatprep.mubr.msk.bf16.mxu1 %vm193_vm0, %v6782_v4 }
 0x133   :  { %6139 = vmatmul.mubr.msk.bf16.vlgmr.msra.gmra.mrb[32].mxu1 %vm193_vm0, %v6783_v8  ;;  %v7477_v8 = vld [vmem:[%s9182_s8] sm:$0xff]  }
 0x134   :  { %6142 = vmatprep.mubr.msk.bf16.mxu1 %vm193_vm0, %v6784_v9  ;;  %6336 = vmatprep.subr.bf16.mxu0 %v7477_v8 }
 0x13b   :  { %6143 = vmatmul.mubr.msk.bf16.gmra.mrb[36].mxu1 %vm193_vm0, %v6785_v10 }
 0x13c   :  { %6146 = vmatprep.mubr.msk.bf16.mxu1 %vm193_vm0, %v6786_v11 }
 0x143   :  { %6147 = vmatmul.mubr.msk.bf16.gmra.mrb[40].mxu1 %vm193_vm0, %v6787_v12 }
 0x144   :  { %6150 = vmatprep.mubr.msk.bf16.mxu1 %vm193_vm0, %v6788_v13 }
 0x14b   :  { %6151 = vmatmul.mubr.msk.bf16.gmra.mrb[44].mxu1 %vm193_vm0, %v6789_v14 }
 0x14c   :  { %6154 = vmatprep.mubr.msk.bf16.mxu1 %vm193_vm0, %v6790_v15 }
 0x153   :  { %6155 = vmatmul.mubr.msk.bf16.gmra.mrb[48].mxu1 %vm193_vm0, %v6791_v16 }
 0x154   :  { %6158 = vmatprep.mubr.msk.bf16.mxu1 %vm193_vm0, %v6792_v17 }
 0x15b   :  { %6159 = vmatmul.mubr.msk.bf16.gmra.mrb[52].mxu1 %vm193_vm0, %v6793_v18 }
 0x15c   :  { %6162 = vmatprep.mubr.msk.bf16.mxu1 %vm193_vm0, %v6794_v19 }
 0x163   :  { %6163 = vmatmul.mubr.msk.bf16.gmra.mrb[56].mxu1 %vm193_vm0, %v6795_v20 }
 0x164   :  { %6166 = vmatprep.mubr.msk.bf16.mxu1 %vm193_vm0, %v6796_v22 }
 0x16b   :  { %6167 = vmatmul.mubr.msk.bf16.gmra.mrb[60].mxu1 %vm193_vm0, %v6797_v23 }
 0x16c   :  { %6170 = vmatprep.mubr.msk.bf16.mxu1 %vm193_vm0, %v6798_v24 }
 0x173   :  { %6171 = vmatmul.mubr.msk.bf16.gmra.mrb[64].mxu1 %vm193_vm0, %v6799_v25 }
 0x174   :  { %6174 = vmatprep.mubr.msk.bf16.mxu1 %vm193_vm0, %v6800_v26 }
 0x17b   :  { %6175 = vmatmul.mubr.msk.bf16.gmra.mrb[68].mxu1 %vm193_vm0, %v6801_v27 }
 0x17c   :  { %6178 = vmatprep.mubr.msk.bf16.mxu1 %vm193_vm0, %v6802_v28 }
 0x183   :  { %6179 = vmatmul.mubr.msk.bf16.gmra.mrb[72].mxu1 %vm193_vm0, %v6803_v29 }
 0x184   :  { %6182 = vmatprep.mubr.msk.bf16.mxu1 %vm193_vm0, %v6804_v30 }
 0x18b   :  { %6183 = vmatmul.mubr.msk.bf16.gmra.mrb[76].mxu1 %vm193_vm0, %v6805_v31 }
 0x18c   :  { %6186 = vmatprep.mubr.msk.bf16.mxu1 %vm193_vm0, %v6806_v32 }
 0x193   :  { %6187 = vmatmul.mubr.msk.bf16.gmra.mrb[80].mxu1 %vm193_vm0, %v6807_v33 }
 0x194   :  { %6190 = vmatprep.mubr.msk.bf16.mxu1 %vm193_vm0, %v6808_v34 }
 0x19b   :  { %6191 = vmatmul.mubr.msk.bf16.gmra.mrb[84].mxu1 %vm193_vm0, %v6809_v35 }
 0x19c   :  { %6194 = vmatprep.mubr.msk.bf16.mxu1 %vm193_vm0, %v6810_v36 }
 0x1a3   :  { %6195 = vmatmul.mubr.msk.bf16.gmra.mrb[88].mxu1 %vm193_vm0, %v6811_v37 }
 0x1a4   :  { %6198 = vmatprep.mubr.msk.bf16.mxu1 %vm193_vm0, %v6812_v38 }
 0x1ab   :  { %6199 = vmatmul.mubr.msk.bf16.gmra.mrb[92].mxu1 %vm193_vm0, %v6813_v39 }
 0x1c6   :  { %v6102_v41 = vpop.f32.mrb[0].mxu1 }
 0x1c7   :  { %v562_v42 = vadd.f32 %v6102_v41, %v7455_v40  ;;  %v553_v43 = vpop.f32.mrb[1].mxu1 }
 0x1c8   :  { %v554_v44 = vadd.f32 %v7455_v40, %v553_v43  ;;  %v6103_v45 = vpop.f32.mrb[2].mxu1 }
 0x1c9   :  { %v565_v46 = vadd.f32 %v6103_v45, %v7455_v40  ;;  %v556_v47 = vpop.f32.mrb[3].mxu1  ;;  %v682_v49 = vmax.f32 %v562_v42, 0.0 }
 0x1ca   :  { %v557_v48 = vadd.f32 %v7455_v40, %v556_v47  ;;  %v680_v51 = vmax.f32 %v554_v44, 0.0 }
 0x1cb   :  { %v683_v50 = vmax.f32 %v565_v46, 0.0 }
 0x1cc   :  { %v681_v52 = vmax.f32 %v557_v48, 0.0 }
 0x1cd   :  { %v7461_v53 = vpack.c.bf16 %v683_v50, %v682_v49 }
 0x1ce   :  { %v7463_v54 = vpack.c.bf16 %v681_v52, %v680_v51  ;;  %v6106_v55 = vpop.f32.mrb[4].mxu1 }
 0x1cf   :  { %v578_v56 = vadd.f32 %v6106_v55, %v7455_v40  ;;  %v569_v57 = vpop.f32.mrb[5].mxu1 }
 0x1d0   :  { %v570_v58 = vadd.f32 %v7455_v40, %v569_v57  ;;  %v6107_v59 = vpop.f32.mrb[6].mxu1 }
 0x1d1   :  { %v581_v60 = vadd.f32 %v6107_v59, %v7455_v40  ;;  %v572_v61 = vpop.f32.mrb[7].mxu1  ;;  %v686_v63 = vmax.f32 %v578_v56, 0.0 }
 0x1d2   :  { %v573_v62 = vadd.f32 %v7455_v40, %v572_v61  ;;  %v684_v1 = vmax.f32 %v570_v58, 0.0 }
 0x1d3   :  { %v687_v0 = vmax.f32 %v581_v60, 0.0 }
 0x1d4   :  { %v685_v2 = vmax.f32 %v573_v62, 0.0 }
 0x1d5   :  { %v7469_v3 = vpack.c.bf16 %v687_v0, %v686_v63 }
 0x1d6   :  { %v7471_v5 = vpack.c.bf16 %v685_v2, %v684_v1  ;;  %v6110_v6 = vpop.f32.mrb[8].mxu1 }
 0x1d7   :  { %v594_v7 = vadd.f32 %v6110_v6, %v7455_v40  ;;  %v585_v4 = vpop.f32.mrb[9].mxu1 }
 0x1d8   :  { %v586_v9 = vadd.f32 %v7455_v40, %v585_v4  ;;  %v6111_v10 = vpop.f32.mrb[10].mxu1 }
 0x1d9   :  { %v597_v11 = vadd.f32 %v6111_v10, %v7455_v40  ;;  %v588_v12 = vpop.f32.mrb[11].mxu1  ;;  %v690_v14 = vmax.f32 %v594_v7, 0.0 }
 0x1da   :  { %v589_v13 = vadd.f32 %v7455_v40, %v588_v12  ;;  %v688_v16 = vmax.f32 %v586_v9, 0.0 }
 0x1db   :  { %v691_v15 = vmax.f32 %v597_v11, 0.0 }
 0x1dc   :  { %v689_v17 = vmax.f32 %v589_v13, 0.0 }
 0x1dd   :  { %v7483_v18 = vpack.c.bf16 %v691_v15, %v690_v14 }
 0x1de   :  { %v7485_v19 = vpack.c.bf16 %v689_v17, %v688_v16  ;;  %v6114_v20 = vpop.f32.mrb[12].mxu1 }
 0x1df   :  { %v610_v22 = vadd.f32 %v6114_v20, %v7455_v40  ;;  %v601_v23 = vpop.f32.mrb[13].mxu1 }
 0x1e0   :  { %v602_v24 = vadd.f32 %v7455_v40, %v601_v23  ;;  %v6115_v25 = vpop.f32.mrb[14].mxu1 }
 0x1e1   :  { %v613_v26 = vadd.f32 %v6115_v25, %v7455_v40  ;;  %v604_v27 = vpop.f32.mrb[15].mxu1  ;;  %v694_v29 = vmax.f32 %v610_v22, 0.0 }
 0x1e2   :  { %v605_v28 = vadd.f32 %v7455_v40, %v604_v27  ;;  %v692_v31 = vmax.f32 %v602_v24, 0.0 }
 0x1e3   :  { %v695_v30 = vmax.f32 %v613_v26, 0.0 }
 0x1e4   :  { %v693_v32 = vmax.f32 %v605_v28, 0.0 }
 0x1e5   :  { %v7491_v33 = vpack.c.bf16 %v695_v30, %v694_v29 }
 0x1e6   :  { %v7493_v34 = vpack.c.bf16 %v693_v32, %v692_v31  ;;  %v6118_v35 = vpop.f32.mrb[16].mxu1 }
 0x1e7   :  { %v626_v36 = vadd.f32 %v6118_v35, %v7455_v40  ;;  %v617_v37 = vpop.f32.mrb[17].mxu1 }
 0x1e8   :  { %v618_v38 = vadd.f32 %v7455_v40, %v617_v37  ;;  %v6119_v39 = vpop.f32.mrb[18].mxu1 }
 0x1e9   :  { %v629_v41 = vadd.f32 %v6119_v39, %v7455_v40  ;;  %v620_v42 = vpop.f32.mrb[19].mxu1  ;;  %v698_v44 = vmax.f32 %v626_v36, 0.0 }
 0x1ea   :  { %v621_v43 = vadd.f32 %v7455_v40, %v620_v42  ;;  %v696_v46 = vmax.f32 %v618_v38, 0.0 }
 0x1eb   :  { %v699_v45 = vmax.f32 %v629_v41, 0.0 }
 0x1ec   :  { %v697_v47 = vmax.f32 %v621_v43, 0.0 }
 0x1ed   :  { %v7499_v48 = vpack.c.bf16 %v699_v45, %v698_v44 }
 0x1ee   :  { %v7501_v49 = vpack.c.bf16 %v697_v47, %v696_v46  ;;  %v6122_v50 = vpop.f32.mrb[20].mxu1 }
 0x1ef   :  { %v642_v51 = vadd.f32 %v6122_v50, %v7455_v40  ;;  %v633_v52 = vpop.f32.mrb[21].mxu1 }
 0x1f0   :  { %v634_v55 = vadd.f32 %v7455_v40, %v633_v52  ;;  %v6123_v56 = vpop.f32.mrb[22].mxu1 }
 0x1f1   :  { %v645_v57 = vadd.f32 %v6123_v56, %v7455_v40  ;;  %v636_v58 = vpop.f32.mrb[23].mxu1  ;;  %v702_v60 = vmax.f32 %v642_v51, 0.0  ;;  %v6816_v51 = vld [vmem:[%s9183_s6] sm:$0xff]  }
 0x1f2   :  { %v637_v59 = vadd.f32 %v7455_v40, %v636_v58  ;;  %v700_v62 = vmax.f32 %v634_v55, 0.0  ;;  %6268 = vmatprep.subr.bf16.mxu1 %v6816_v51 }
 0x1f3   :  { %v703_v61 = vmax.f32 %v645_v57, 0.0  ;;  %6269 = vmatpush3.bf16.msra.mxu1 %v6816_v51 }
 0x1f4   :  { %v701_v63 = vmax.f32 %v637_v59, 0.0 }
 0x1f5   :  { %v7507_v0 = vpack.c.bf16 %v703_v61, %v702_v60  ;;  %v6815_v61 = vld [vmem:[%s9182_s8 + $0x8] sm:$0xff]  }
 0x1f6   :  { %v7509_v1 = vpack.c.bf16 %v701_v63, %v700_v62  ;;  %v6126_v2 = vpop.f32.mrb[24].mxu1 }
 0x1f7   :  { %v658_v6 = vadd.f32 %v6126_v2, %v7455_v40  ;;  %v649_v7 = vpop.f32.mrb[25].mxu1 }
 0x1f8   :  { %v650_v4 = vadd.f32 %v7455_v40, %v649_v7  ;;  %v6127_v9 = vpop.f32.mrb[26].mxu1 }
 0x1f9   :  { %v661_v10 = vadd.f32 %v6127_v9, %v7455_v40  ;;  %v652_v11 = vpop.f32.mrb[27].mxu1  ;;  %v706_v13 = vmax.f32 %v658_v6, 0.0 }
 0x1fa   :  { %v653_v12 = vadd.f32 %v7455_v40, %v652_v11  ;;  %v704_v15 = vmax.f32 %v650_v4, 0.0 }
 0x1fb   :  { %v707_v14 = vmax.f32 %v661_v10, 0.0 }
 0x1fc   :  { %v705_v16 = vmax.f32 %v653_v12, 0.0 }
 0x1fd   :  { %v7515_v17 = vpack.c.bf16 %v707_v14, %v706_v13 }
 0x1fe   :  { %v7517_v20 = vpack.c.bf16 %v705_v16, %v704_v15  ;;  %v6130_v22 = vpop.f32.mrb[28].mxu1 }
 0x1ff   :  { %v674_v23 = vadd.f32 %v6130_v22, %v7455_v40  ;;  %v665_v24 = vpop.f32.mrb[29].mxu1 }
 0x200   :  { %v666_v25 = vadd.f32 %v7455_v40, %v665_v24  ;;  %v6131_v26 = vpop.f32.mrb[30].mxu1 }
 0x201   :  { %v677_v27 = vadd.f32 %v6131_v26, %v7455_v40  ;;  %v668_v28 = vpop.f32.mrb[31].mxu1  ;;  %v710_v30 = vmax.f32 %v674_v23, 0.0 }
 0x202   :  { %v669_v29 = vadd.f32 %v7455_v40, %v668_v28  ;;  %v708_v32 = vmax.f32 %v666_v25, 0.0 }
 0x203   :  { %v711_v31 = vmax.f32 %v677_v27, 0.0 }
 0x204   :  { %v709_v35 = vmax.f32 %v669_v29, 0.0 }
 0x205   :  { %v7523_v36 = vpack.c.bf16 %v711_v31, %v710_v30 }
 0x206   :  { %v7525_v37 = vpack.c.bf16 %v709_v35, %v708_v32  ;;  %v6140_v38 = vpop.f32.mrb[32].mxu1 }
 0x207   :  { %v1075_v39 = vadd.f32 %v6140_v38, %v7268_v21  ;;  %v1066_v41 = vpop.f32.mrb[33].mxu1 }
 0x208   :  { %v1067_v42 = vadd.f32 %v7268_v21, %v1066_v41  ;;  %v6141_v43 = vpop.f32.mrb[34].mxu1 }
 0x209   :  { %v1078_v44 = vadd.f32 %v6141_v43, %v7268_v21  ;;  %v1069_v45 = vpop.f32.mrb[35].mxu1  ;;  %v1323_v46 = vmax.f32 %v1075_v39, 0.0 }
 0x20a   :  { %v1070_v47 = vadd.f32 %v7268_v21, %v1069_v45  ;;  %v1321_v52 = vmax.f32 %v1067_v42, 0.0 }
 0x20b   :  { %v1324_v50 = vmax.f32 %v1078_v44, 0.0 }
 0x20c   :  { %v1322_v55 = vmax.f32 %v1070_v47, 0.0 }
 0x20d   :  { %v1386_v56 = vpack.c.bf16 %v1324_v50, %v1323_v46 }
 0x20e   :  { %v1385_v57 = vpack.c.bf16 %v1322_v55, %v1321_v52  ;;  %v6144_v58 = vpop.f32.mrb[36].mxu1 }
 0x20f   :  { %v1091_v59 = vadd.f32 %v6144_v58, %v7268_v21  ;;  %v1082_v60 = vpop.f32.mrb[37].mxu1 }
 0x210   :  { %v1083_v62 = vadd.f32 %v7268_v21, %v1082_v60  ;;  %v6145_v63 = vpop.f32.mrb[38].mxu1  ;;  %6204 = vmatprep.mubr.msk.bf16.mxu0 %vm470_vm2, %v1385_v57 }
 0x211   :  { %v1327_v2 = vmax.f32 %v1091_v59, 0.0  ;;  %v1094_v6 = vadd.f32 %v6145_v63, %v7268_v21  ;;  %v1085_v7 = vpop.f32.mrb[39].mxu1  ;;  %6205 = vmatmul.mubr.msk.bf16.vlgmr.msra.gmra.mrb[32].mxu0 %vm470_vm2, %v1386_v56 }
 0x212   :  { %v1325_v4 = vmax.f32 %v1083_v62, 0.0  ;;  %v1086_v9 = vadd.f32 %v7268_v21, %v1085_v7  ;;  %6337 = vmatpush3.bf16.msra.mxu0 %v7477_v8 }
 0x213   :  { %v1328_v10 = vmax.f32 %v1094_v6, 0.0  ;;  %6338 = vmatprep.subr.bf16.mxu0 %v6815_v61 }
 0x214   :  { %v1326_v11 = vmax.f32 %v1086_v9, 0.0 }
 0x215   :  { %v1388_v12 = vpack.c.bf16 %v1328_v10, %v1327_v2 }
 0x216   :  { %v1387_v13 = vpack.c.bf16 %v1326_v11, %v1325_v4  ;;  %v6148_v14 = vpop.f32.mrb[40].mxu1  ;;  %6339 = vmatpush3.bf16.msra.mxu0 %v6815_v61 }
 0x217   :  { %v1107_v15 = vadd.f32 %v6148_v14, %v7268_v21  ;;  %v1098_v16 = vpop.f32.mrb[41].mxu1 }
 0x218   :  { %v1099_v22 = vadd.f32 %v7268_v21, %v1098_v16  ;;  %v6149_v23 = vpop.f32.mrb[42].mxu1  ;;  %6208 = vmatprep.mubr.msk.bf16.mxu0 %vm470_vm2, %v1387_v13 }
 0x219   :  { %v1331_v24 = vmax.f32 %v1107_v15, 0.0  ;;  %v1110_v25 = vadd.f32 %v6149_v23, %v7268_v21  ;;  %v1101_v26 = vpop.f32.mrb[43].mxu1  ;;  %6209 = vmatmul.mubr.msk.bf16.gmra.mrb[36].mxu0 %vm470_vm2, %v1388_v12 }
 0x21a   :  { %v1329_v8 = vmax.f32 %v1099_v22, 0.0  ;;  %v1102_v27 = vadd.f32 %v7268_v21, %v1101_v26 }
 0x21b   :  { %v1332_v28 = vmax.f32 %v1110_v25, 0.0 }
 0x21c   :  { %v1330_v29 = vmax.f32 %v1102_v27, 0.0 }
 0x21d   :  { %v1390_v30 = vpack.c.bf16 %v1332_v28, %v1331_v24 }
 0x21e   :  { %v1389_v31 = vpack.c.bf16 %v1330_v29, %v1329_v8  ;;  %v6152_v32 = vpop.f32.mrb[44].mxu1 }
 0x21f   :  { %v1123_v35 = vadd.f32 %v6152_v32, %v7268_v21  ;;  %v1114_v38 = vpop.f32.mrb[45].mxu1 }
 0x220   :  { %v1115_v39 = vadd.f32 %v7268_v21, %v1114_v38  ;;  %v6153_v41 = vpop.f32.mrb[46].mxu1  ;;  %6212 = vmatprep.mubr.msk.bf16.mxu0 %vm470_vm2, %v1389_v31 }
 0x221   :  { %v1335_v42 = vmax.f32 %v1123_v35, 0.0  ;;  %v1126_v43 = vadd.f32 %v6153_v41, %v7268_v21  ;;  %v1117_v44 = vpop.f32.mrb[47].mxu1  ;;  %6213 = vmatmul.mubr.msk.bf16.gmra.mrb[40].mxu0 %vm470_vm2, %v1390_v30 }
 0x222   :  { %v1333_v45 = vmax.f32 %v1115_v39, 0.0  ;;  %v1118_v46 = vadd.f32 %v7268_v21, %v1117_v44 }
 0x223   :  { %v1336_v47 = vmax.f32 %v1126_v43, 0.0 }
 0x224   :  { %v1334_v50 = vmax.f32 %v1118_v46, 0.0 }
 0x225   :  { %v1392_v51 = vpack.c.bf16 %v1336_v47, %v1335_v42 }
 0x226   :  { %v1391_v52 = vpack.c.bf16 %v1334_v50, %v1333_v45  ;;  %v6156_v55 = vpop.f32.mrb[48].mxu1 }
 0x227   :  { %v1139_v56 = vadd.f32 %v6156_v55, %v7268_v21  ;;  %v1130_v57 = vpop.f32.mrb[49].mxu1 }
 0x228   :  { %v1131_v58 = vadd.f32 %v7268_v21, %v1130_v57  ;;  %v6157_v59 = vpop.f32.mrb[50].mxu1  ;;  %6216 = vmatprep.mubr.msk.bf16.mxu0 %vm470_vm2, %v1391_v52 }
 0x229   :  { %v1339_v60 = vmax.f32 %v1139_v56, 0.0  ;;  %v1142_v61 = vadd.f32 %v6157_v59, %v7268_v21  ;;  %v1133_v62 = vpop.f32.mrb[51].mxu1  ;;  %6217 = vmatmul.mubr.msk.bf16.gmra.mrb[44].mxu0 %vm470_vm2, %v1392_v51 }
 0x22a   :  { %v1337_v63 = vmax.f32 %v1131_v58, 0.0  ;;  %v1134_v2 = vadd.f32 %v7268_v21, %v1133_v62 }
 0x22b   :  { %v1340_v6 = vmax.f32 %v1142_v61, 0.0 }
 0x22c   :  { %v1338_v7 = vmax.f32 %v1134_v2, 0.0 }
 0x22d   :  { %v1394_v4 = vpack.c.bf16 %v1340_v6, %v1339_v60 }
 0x22e   :  { %v1393_v9 = vpack.c.bf16 %v1338_v7, %v1337_v63  ;;  %v6160_v10 = vpop.f32.mrb[52].mxu1 }
 0x22f   :  { %v1155_v11 = vadd.f32 %v6160_v10, %v7268_v21  ;;  %v1146_v12 = vpop.f32.mrb[53].mxu1 }
 0x230   :  { %v1147_v13 = vadd.f32 %v7268_v21, %v1146_v12  ;;  %v6161_v14 = vpop.f32.mrb[54].mxu1  ;;  %6220 = vmatprep.mubr.msk.bf16.mxu0 %vm470_vm2, %v1393_v9  ;;  %v7584_v9 = vld [vmem:[%s9184_s10] sm:$0xff]  }
 0x231   :  { %v1343_v15 = vmax.f32 %v1155_v11, 0.0  ;;  %v1158_v16 = vadd.f32 %v6161_v14, %v7268_v21  ;;  %v1149_v22 = vpop.f32.mrb[55].mxu1  ;;  %6221 = vmatmul.mubr.msk.bf16.gmra.mrb[48].mxu0 %vm470_vm2, %v1394_v4  ;;  %6372 = vmatprep.subr.bf16.mxu0 %v7584_v9 }
 0x232   :  { %v1341_v23 = vmax.f32 %v1147_v13, 0.0  ;;  %v1150_v24 = vadd.f32 %v7268_v21, %v1149_v22  ;;  %v6819_v22 = vld [vmem:[%s9183_s6 + $0x8] sm:$0xff]  }
 0x233   :  { %v1344_v25 = vmax.f32 %v1158_v16, 0.0  ;;  %6270 = vmatprep.subr.bf16.mxu1 %v6819_v22 }
 0x234   :  { %v1342_v26 = vmax.f32 %v1150_v24, 0.0  ;;  %6271 = vmatpush3.bf16.msra.mxu1 %v6819_v22 }
 0x235   :  { %v1396_v8 = vpack.c.bf16 %v1344_v25, %v1343_v15 }
 0x236   :  { %v1395_v27 = vpack.c.bf16 %v1342_v26, %v1341_v23  ;;  %v6164_v28 = vpop.f32.mrb[56].mxu1 }
 0x237   :  { %v1171_v29 = vadd.f32 %v6164_v28, %v7268_v21  ;;  %v1162_v30 = vpop.f32.mrb[57].mxu1 }
 0x238   :  { %v1163_v31 = vadd.f32 %v7268_v21, %v1162_v30  ;;  %v6165_v32 = vpop.f32.mrb[58].mxu1  ;;  %6224 = vmatprep.mubr.msk.bf16.mxu0 %vm470_vm2, %v1395_v27 }
 0x239   :  { %v1347_v35 = vmax.f32 %v1171_v29, 0.0  ;;  %v1174_v38 = vadd.f32 %v6165_v32, %v7268_v21  ;;  %v1165_v39 = vpop.f32.mrb[59].mxu1  ;;  %6225 = vmatmul.mubr.msk.bf16.gmra.mrb[52].mxu0 %vm470_vm2, %v1396_v8 }
 0x23a   :  { %v1345_v41 = vmax.f32 %v1163_v31, 0.0  ;;  %v1166_v42 = vadd.f32 %v7268_v21, %v1165_v39 }
 0x23b   :  { %v1348_v43 = vmax.f32 %v1174_v38, 0.0 }
 0x23c   :  { %v1346_v44 = vmax.f32 %v1166_v42, 0.0 }
 0x23d   :  { %v1398_v45 = vpack.c.bf16 %v1348_v43, %v1347_v35 }
 0x23e   :  { %v1397_v46 = vpack.c.bf16 %v1346_v44, %v1345_v41  ;;  %v6168_v47 = vpop.f32.mrb[60].mxu1 }
 0x23f   :  { %v1187_v50 = vadd.f32 %v6168_v47, %v7268_v21  ;;  %v1178_v51 = vpop.f32.mrb[61].mxu1 }
 0x240   :  { %v1179_v52 = vadd.f32 %v7268_v21, %v1178_v51  ;;  %v6169_v55 = vpop.f32.mrb[62].mxu1  ;;  %6228 = vmatprep.mubr.msk.bf16.mxu0 %vm470_vm2, %v1397_v46 }
 0x241   :  { %v1351_v56 = vmax.f32 %v1187_v50, 0.0  ;;  %v1190_v57 = vadd.f32 %v6169_v55, %v7268_v21  ;;  %v1181_v58 = vpop.f32.mrb[63].mxu1  ;;  %6229 = vmatmul.mubr.msk.bf16.gmra.mrb[56].mxu0 %vm470_vm2, %v1398_v45 }
 0x242   :  { %v1349_v59 = vmax.f32 %v1179_v52, 0.0  ;;  %v1182_v60 = vadd.f32 %v7268_v21, %v1181_v58 }
 0x243   :  { %v1352_v61 = vmax.f32 %v1190_v57, 0.0 }
 0x244   :  { %v1350_v62 = vmax.f32 %v1182_v60, 0.0 }
 0x245   :  { %v1400_v63 = vpack.c.bf16 %v1352_v61, %v1351_v56 }
 0x246   :  { %v1399_v2 = vpack.c.bf16 %v1350_v62, %v1349_v59  ;;  %v6172_v6 = vpop.f32.mrb[64].mxu1 }
 0x247   :  { %v1203_v7 = vadd.f32 %v6172_v6, %v7268_v21  ;;  %v1194_v4 = vpop.f32.mrb[65].mxu1 }
 0x248   :  { %v1195_v10 = vadd.f32 %v7268_v21, %v1194_v4  ;;  %v6173_v11 = vpop.f32.mrb[66].mxu1  ;;  %6232 = vmatprep.mubr.msk.bf16.mxu0 %vm470_vm2, %v1399_v2  ;;  %v7610_v2 = vld [vmem:[%s9180_s3] ss:$0 sm:$0xff] }
 0x249   :  { %v1355_v12 = vmax.f32 %v1203_v7, 0.0  ;;  %v1206_v13 = vadd.f32 %v6173_v11, %v7268_v21  ;;  %v1197_v14 = vpop.f32.mrb[67].mxu1  ;;  %6233 = vmatmul.mubr.msk.bf16.gmra.mrb[60].mxu0 %vm470_vm2, %v1400_v63 }
 0x24a   :  { %v1353_v15 = vmax.f32 %v1195_v10, 0.0  ;;  %v1198_v16 = vadd.f32 %v7268_v21, %v1197_v14 }
 0x24b   :  { %v1356_v23 = vmax.f32 %v1206_v13, 0.0 }
 0x24c   :  { %v1354_v24 = vmax.f32 %v1198_v16, 0.0 }
 0x24d   :  { %v1402_v25 = vpack.c.bf16 %v1356_v23, %v1355_v12 }
 0x24e   :  { %v1401_v26 = vpack.c.bf16 %v1354_v24, %v1353_v15  ;;  %v6176_v8 = vpop.f32.mrb[68].mxu1 }
 0x24f   :  { %v1219_v27 = vadd.f32 %v6176_v8, %v7268_v21  ;;  %v1210_v28 = vpop.f32.mrb[69].mxu1 }
 0x250   :  { %v1211_v29 = vadd.f32 %v7268_v21, %v1210_v28  ;;  %v6177_v30 = vpop.f32.mrb[70].mxu1  ;;  %6236 = vmatprep.mubr.msk.bf16.mxu0 %vm470_vm2, %v1401_v26 }
 0x251   :  { %v1359_v31 = vmax.f32 %v1219_v27, 0.0  ;;  %v1222_v32 = vadd.f32 %v6177_v30, %v7268_v21  ;;  %v1213_v35 = vpop.f32.mrb[71].mxu1  ;;  %6237 = vmatmul.mubr.msk.bf16.gmra.mrb[64].mxu0 %vm470_vm2, %v1402_v25 }
 0x252   :  { %v1357_v38 = vmax.f32 %v1211_v29, 0.0  ;;  %v1214_v39 = vadd.f32 %v7268_v21, %v1213_v35 }
 0x253   :  { %v1360_v41 = vmax.f32 %v1222_v32, 0.0 }
 0x254   :  { %v1358_v42 = vmax.f32 %v1214_v39, 0.0 }
 0x255   :  { %v1404_v43 = vpack.c.bf16 %v1360_v41, %v1359_v31 }
 0x256   :  { %v1403_v44 = vpack.c.bf16 %v1358_v42, %v1357_v38  ;;  %v6180_v45 = vpop.f32.mrb[72].mxu1 }
 0x257   :  { %v1235_v46 = vadd.f32 %v6180_v45, %v7268_v21  ;;  %v1226_v47 = vpop.f32.mrb[73].mxu1 }
 0x258   :  { %v1227_v50 = vadd.f32 %v7268_v21, %v1226_v47  ;;  %v6181_v51 = vpop.f32.mrb[74].mxu1  ;;  %6240 = vmatprep.mubr.msk.bf16.mxu0 %vm470_vm2, %v1403_v44 }
 0x259   :  { %v1363_v52 = vmax.f32 %v1235_v46, 0.0  ;;  %v1238_v55 = vadd.f32 %v6181_v51, %v7268_v21  ;;  %v1229_v56 = vpop.f32.mrb[75].mxu1  ;;  %6241 = vmatmul.mubr.msk.bf16.gmra.mrb[68].mxu0 %vm470_vm2, %v1404_v43 }
 0x25a   :  { %v1361_v57 = vmax.f32 %v1227_v50, 0.0  ;;  %v1230_v58 = vadd.f32 %v7268_v21, %v1229_v56 }
 0x25b   :  { %v1364_v59 = vmax.f32 %v1238_v55, 0.0 }
 0x25c   :  { %v1362_v60 = vmax.f32 %v1230_v58, 0.0 }
 0x25d   :  { %v1406_v61 = vpack.c.bf16 %v1364_v59, %v1363_v52 }
 0x25e   :  { %v1405_v62 = vpack.c.bf16 %v1362_v60, %v1361_v57  ;;  %v6184_v63 = vpop.f32.mrb[76].mxu1 }
 0x25f   :  { %v1251_v6 = vadd.f32 %v7610_v2, %v6184_v63  ;;  %v1242_v7 = vpop.f32.mrb[77].mxu1 }
 0x260   :  { %v1243_v4 = vadd.f32 %v7610_v2, %v1242_v7  ;;  %v6185_v10 = vpop.f32.mrb[78].mxu1  ;;  %6244 = vmatprep.mubr.msk.bf16.mxu0 %vm470_vm2, %v1405_v62 }
 0x261   :  { %v1367_v11 = vmax.f32 %v1251_v6, 0.0  ;;  %v1254_v21 = vadd.f32 %v7610_v2, %v6185_v10  ;;  %v1245_v12 = vpop.f32.mrb[79].mxu1  ;;  %6245 = vmatmul.mubr.msk.bf16.gmra.mrb[72].mxu0 %vm470_vm2, %v1406_v61 }
 0x262   :  { %v1365_v13 = vmax.f32 %v1243_v4, 0.0  ;;  %v1246_v14 = vadd.f32 %v7610_v2, %v1245_v12 }
 0x263   :  { %v1368_v15 = vmax.f32 %v1254_v21, 0.0 }
 0x264   :  { %v1366_v16 = vmax.f32 %v1246_v14, 0.0 }
 0x265   :  { %v1408_v22 = vpack.c.bf16 %v1368_v15, %v1367_v11 }
 0x266   :  { %v1407_v23 = vpack.c.bf16 %v1366_v16, %v1365_v13  ;;  %v6188_v24 = vpop.f32.mrb[80].mxu1 }
 0x267   :  { %v1267_v25 = vadd.f32 %v7610_v2, %v6188_v24  ;;  %v1258_v26 = vpop.f32.mrb[81].mxu1 }
 0x268   :  { %v1259_v8 = vadd.f32 %v7610_v2, %v1258_v26  ;;  %v6189_v27 = vpop.f32.mrb[82].mxu1  ;;  %6248 = vmatprep.mubr.msk.bf16.mxu0 %vm470_vm2, %v1407_v23 }
 0x269   :  { %v1371_v28 = vmax.f32 %v1267_v25, 0.0  ;;  %v1270_v29 = vadd.f32 %v7610_v2, %v6189_v27  ;;  %v1261_v30 = vpop.f32.mrb[83].mxu1  ;;  %6249 = vmatmul.mubr.msk.bf16.gmra.mrb[76].mxu0 %vm470_vm2, %v1408_v22 }
 0x26a   :  { %v1369_v31 = vmax.f32 %v1259_v8, 0.0  ;;  %v1262_v32 = vadd.f32 %v7610_v2, %v1261_v30 }
 0x26b   :  { %v1372_v35 = vmax.f32 %v1270_v29, 0.0 }
 0x26c   :  { %v1370_v38 = vmax.f32 %v1262_v32, 0.0 }
 0x26d   :  { %v1410_v39 = vpack.c.bf16 %v1372_v35, %v1371_v28 }
 0x26e   :  { %v1409_v41 = vpack.c.bf16 %v1370_v38, %v1369_v31  ;;  %v6192_v42 = vpop.f32.mrb[84].mxu1  ;;  %v6818_v38 = vld [vmem:[%s9184_s10 + $0x8] sm:$0xff]  }
 0x26f   :  { %v1283_v43 = vadd.f32 %v7610_v2, %v6192_v42  ;;  %v1274_v44 = vpop.f32.mrb[85].mxu1 }
 0x270   :  { %v1275_v45 = vadd.f32 %v7610_v2, %v1274_v44  ;;  %v6193_v46 = vpop.f32.mrb[86].mxu1  ;;  %6252 = vmatprep.mubr.msk.bf16.mxu0 %vm470_vm2, %v1409_v41 }
 0x271   :  { %v1375_v47 = vmax.f32 %v1283_v43, 0.0  ;;  %v1286_v50 = vadd.f32 %v7610_v2, %v6193_v46  ;;  %v1277_v51 = vpop.f32.mrb[87].mxu1  ;;  %6253 = vmatmul.mubr.msk.bf16.gmra.mrb[80].mxu0 %vm470_vm2, %v1410_v39 }
 0x272   :  { %v1373_v52 = vmax.f32 %v1275_v45, 0.0  ;;  %v1278_v55 = vadd.f32 %v7610_v2, %v1277_v51 }
 0x273   :  { %v1376_v56 = vmax.f32 %v1286_v50, 0.0 }
 0x274   :  { %v1374_v57 = vmax.f32 %v1278_v55, 0.0 }
 0x275   :  { %v1412_v58 = vpack.c.bf16 %v1376_v56, %v1375_v47 }
 0x276   :  { %v1411_v59 = vpack.c.bf16 %v1374_v57, %v1373_v52  ;;  %v6196_v60 = vpop.f32.mrb[88].mxu1 }
 0x277   :  { %v1299_v61 = vadd.f32 %v7610_v2, %v6196_v60  ;;  %v1290_v62 = vpop.f32.mrb[89].mxu1 }
 0x278   :  { %v1291_v63 = vadd.f32 %v7610_v2, %v1290_v62  ;;  %v6197_v6 = vpop.f32.mrb[90].mxu1  ;;  %6256 = vmatprep.mubr.msk.bf16.mxu0 %vm470_vm2, %v1411_v59 }
 0x279   :  { %v1379_v7 = vmax.f32 %v1299_v61, 0.0  ;;  %v1302_v4 = vadd.f32 %v7610_v2, %v6197_v6  ;;  %v1293_v10 = vpop.f32.mrb[91].mxu1  ;;  %6257 = vmatmul.mubr.msk.bf16.gmra.mrb[84].mxu0 %vm470_vm2, %v1412_v58 }
 0x27a   :  { %v1377_v11 = vmax.f32 %v1291_v63, 0.0  ;;  %v1294_v21 = vadd.f32 %v7610_v2, %v1293_v10 }
 0x27b   :  { %v1380_v12 = vmax.f32 %v1302_v4, 0.0 }
 0x27c   :  { %v1378_v13 = vmax.f32 %v1294_v21, 0.0 }
 0x27d   :  { %v1414_v14 = vpack.c.bf16 %v1380_v12, %v1379_v7 }
 0x27e   :  { %v1413_v15 = vpack.c.bf16 %v1378_v13, %v1377_v11  ;;  %v6200_v16 = vpop.f32.mrb[92].mxu1 }
 0x27f   :  { %v1315_v22 = vadd.f32 %v7610_v2, %v6200_v16  ;;  %v1306_v23 = vpop.f32.mrb[93].mxu1 }
 0x280   :  { %v1307_v24 = vadd.f32 %v7610_v2, %v1306_v23  ;;  %v6201_v25 = vpop.f32.mrb[94].mxu1  ;;  %6260 = vmatprep.mubr.msk.bf16.mxu0 %vm470_vm2, %v1413_v15 }
 0x281   :  { %v1383_v26 = vmax.f32 %v1315_v22, 0.0  ;;  %v1318_v8 = vadd.f32 %v7610_v2, %v6201_v25  ;;  %v1309_v27 = vpop.f32.mrb[95].mxu1  ;;  %6261 = vmatmul.mubr.msk.bf16.gmra.mrb[88].mxu0 %vm470_vm2, %v1414_v14 }
 0x282   :  { %v1381_v28 = vmax.f32 %v1307_v24, 0.0  ;;  %v1310_v29 = vadd.f32 %v7610_v2, %v1309_v27 }
 0x283   :  { %v1384_v30 = vmax.f32 %v1318_v8, 0.0 }
 0x284   :  { %v1382_v31 = vmax.f32 %v1310_v29, 0.0 }
 0x285   :  { %v1416_v32 = vpack.c.bf16 %v1384_v30, %v1383_v26 }
 0x286   :  { %v1415_v35 = vpack.c.bf16 %v1382_v31, %v1381_v28 }
 0x288   :  { %6264 = vmatprep.mubr.msk.bf16.mxu0 %vm470_vm2, %v1415_v35 }
 0x289   :  { %6265 = vmatmul.mubr.msk.bf16.gmra.mrb[92].mxu0 %vm470_vm2, %v1416_v32 }
 0x28a   :  { %6340 = vmatprep.mubr.msk.bf16.mxu0 %vm1921_vm3, %v7463_v54 }
 0x291   :  { %6341 = vmatmul.mubr.msk.bf16.vlgmr.msra.gmra.mrb[96].mxu0 %vm1921_vm3, %v7461_v53 }
 0x292   :  { %6344 = vmatprep.mubr.msk.bf16.mxu0 %vm1921_vm3, %v7471_v5  ;;  %6373 = vmatpush3.bf16.msra.mxu0 %v7584_v9 }
 0x293   :  { %6374 = vmatprep.subr.bf16.mxu0 %v6818_v38 }
 0x296   :  { %6375 = vmatpush3.bf16.msra.mxu0 %v6818_v38 }
 0x299   :  { %6345 = vmatmul.mubr.msk.bf16.gmra.mrb[100].mxu0 %vm1921_vm3, %v7469_v3 }
 0x29a   :  { %6348 = vmatprep.mubr.msk.bf16.mxu0 %vm1921_vm3, %v7485_v19 }
 0x2a1   :  { %6349 = vmatmul.mubr.msk.bf16.gmra.mrb[104].mxu0 %vm1921_vm3, %v7483_v18 }
 0x2a2   :  { %6352 = vmatprep.mubr.msk.bf16.mxu0 %vm1921_vm3, %v7493_v34 }
 0x2a9   :  { %6353 = vmatmul.mubr.msk.bf16.gmra.mrb[108].mxu0 %vm1921_vm3, %v7491_v33 }
 0x2aa   :  { %6356 = vmatprep.mubr.msk.bf16.mxu0 %vm1921_vm3, %v7501_v49 }
 0x2b1   :  { %6357 = vmatmul.mubr.msk.bf16.gmra.mrb[112].mxu0 %vm1921_vm3, %v7499_v48 }
 0x2b2   :  { %6360 = vmatprep.mubr.msk.bf16.mxu0 %vm1921_vm3, %v7509_v1 }
 0x2b9   :  { %6361 = vmatmul.mubr.msk.bf16.gmra.mrb[116].mxu0 %vm1921_vm3, %v7507_v0 }
 0x2ba   :  { %6364 = vmatprep.mubr.msk.bf16.mxu0 %vm1921_vm3, %v7517_v20 }
 0x2c1   :  { %6365 = vmatmul.mubr.msk.bf16.gmra.mrb[120].mxu0 %vm1921_vm3, %v7515_v17 }
 0x2c2   :  { %6368 = vmatprep.mubr.msk.bf16.mxu0 %vm1921_vm3, %v7525_v37 }
 0x2c9   :  { %6369 = vmatmul.mubr.msk.bf16.gmra.mrb[124].mxu0 %vm1921_vm3, %v7523_v36 }
 0x2ca   :  { %6376 = vmatprep.mubr.msk.bf16.mxu0 %vm1921_vm3, %v7463_v54 }
 0x2d1   :  { %6377 = vmatmul.mubr.msk.bf16.vlgmr.msra.gmra.mrb[128].mxu0 %vm1921_vm3, %v7461_v53 }
 0x2d2   :  { %6380 = vmatprep.mubr.msk.bf16.mxu0 %vm1921_vm3, %v7471_v5 }
 0x2d9   :  { %6381 = vmatmul.mubr.msk.bf16.gmra.mrb[132].mxu0 %vm1921_vm3, %v7469_v3 }
 0x2da   :  { %6384 = vmatprep.mubr.msk.bf16.mxu0 %vm1921_vm3, %v7485_v19 }
 0x2e1   :  { %6385 = vmatmul.mubr.msk.bf16.gmra.mrb[136].mxu0 %vm1921_vm3, %v7483_v18 }
 0x2e2   :  { %6388 = vmatprep.mubr.msk.bf16.mxu0 %vm1921_vm3, %v7493_v34 }
 0x2e4   :  { %v6206_v9 = vpop.f32.mrb[32].mxu0 }
 0x2e5   :  { %v1556_v54 = vadd.f32 %v6206_v9, %v7455_v40  ;;  %v1547_v2 = vpop.f32.mrb[33].mxu0 }
 0x2e6   :  { %v1548_v53 = vadd.f32 %v7455_v40, %v1547_v2  ;;  %v6207_v39 = vpop.f32.mrb[34].mxu0 }
 0x2e7   :  { %v1559_v5 = vadd.f32 %v6207_v39, %v7455_v40  ;;  %v1550_v41 = vpop.f32.mrb[35].mxu0  ;;  %v1804_v42 = vmax.f32 %v1556_v54, 0.0 }
 0x2e8   :  { %v1551_v3 = vadd.f32 %v7455_v40, %v1550_v41  ;;  %v1802_v18 = vmax.f32 %v1548_v53, 0.0 }
 0x2e9   :  { %v1805_v19 = vmax.f32 %v1559_v5, 0.0  ;;  %6389 = vmatmul.mubr.msk.bf16.gmra.mrb[140].mxu0 %vm1921_vm3, %v7491_v33 }
 0x2ea   :  { %v1803_v43 = vmax.f32 %v1551_v3, 0.0  ;;  %6392 = vmatprep.mubr.msk.bf16.mxu0 %vm1921_vm3, %v7501_v49 }
 0x2eb   :  { %v1867_v34 = vpack.c.bf16 %v1805_v19, %v1804_v42  ;;  %v7743_v19 = vld [vmem:[%s9181_s5] ss:$0 sm:$0xff] }
 0x2ec   :  { %v1866_v44 = vpack.c.bf16 %v1803_v43, %v1802_v18  ;;  %v6210_v45 = vpop.f32.mrb[36].mxu0 }
 0x2ed   :  { %v1572_v46 = vadd.f32 %v6210_v45, %v7455_v40  ;;  %v1563_v47 = vpop.f32.mrb[37].mxu0 }
 0x2ee   :  { %v1564_v50 = vadd.f32 %v7455_v40, %v1563_v47  ;;  %v6211_v51 = vpop.f32.mrb[38].mxu0  ;;  %6272 = vmatprep.mubr.msk.bf16.mxu1 %vm1921_vm3, %v1866_v44 }
 0x2ef   :  { %v1575_v52 = vadd.f32 %v6211_v51, %v7455_v40  ;;  %v1566_v55 = vpop.f32.mrb[39].mxu0  ;;  %6273 = vmatmul.mubr.msk.bf16.vlgmr.msra.gmra.mrb[96].mxu1 %vm1921_vm3, %v1867_v34  ;;  %v1808_v56 = vmax.f32 %v1572_v46, 0.0 }
 0x2f0   :  { %v1567_v33 = vadd.f32 %v7455_v40, %v1566_v55  ;;  %v1806_v57 = vmax.f32 %v1564_v50, 0.0 }
 0x2f1   :  { %v1809_v49 = vmax.f32 %v1575_v52, 0.0  ;;  %6393 = vmatmul.mubr.msk.bf16.gmra.mrb[144].mxu0 %vm1921_vm3, %v7499_v48 }
 0x2f2   :  { %v1807_v58 = vmax.f32 %v1567_v33, 0.0  ;;  %6396 = vmatprep.mubr.msk.bf16.mxu0 %vm1921_vm3, %v7509_v1 }
 0x2f3   :  { %v1869_v59 = vpack.c.bf16 %v1809_v49, %v1808_v56 }
 0x2f4   :  { %v1868_v60 = vpack.c.bf16 %v1807_v58, %v1806_v57  ;;  %v6214_v61 = vpop.f32.mrb[40].mxu0 }
 0x2f5   :  { %v1588_v62 = vadd.f32 %v6214_v61, %v7455_v40  ;;  %v1579_v63 = vpop.f32.mrb[41].mxu0 }
 0x2f6   :  { %v1580_v6 = vadd.f32 %v7455_v40, %v1579_v63  ;;  %v6215_v7 = vpop.f32.mrb[42].mxu0  ;;  %6276 = vmatprep.mubr.msk.bf16.mxu1 %vm1921_vm3, %v1868_v60 }
 0x2f7   :  { %v1591_v4 = vadd.f32 %v6215_v7, %v7455_v40  ;;  %v1582_v10 = vpop.f32.mrb[43].mxu0  ;;  %6277 = vmatmul.mubr.msk.bf16.gmra.mrb[100].mxu1 %vm1921_vm3, %v1869_v59  ;;  %v1812_v11 = vmax.f32 %v1588_v62, 0.0 }
 0x2f8   :  { %v1583_v48 = vadd.f32 %v7455_v40, %v1582_v10  ;;  %v1810_v21 = vmax.f32 %v1580_v6, 0.0 }
 0x2f9   :  { %v1813_v1 = vmax.f32 %v1591_v4, 0.0  ;;  %6397 = vmatmul.mubr.msk.bf16.gmra.mrb[148].mxu0 %vm1921_vm3, %v7507_v0 }
 0x2fa   :  { %v1811_v12 = vmax.f32 %v1583_v48, 0.0  ;;  %6400 = vmatprep.mubr.msk.bf16.mxu0 %vm1921_vm3, %v7517_v20 }
 0x2fb   :  { %v1871_v13 = vpack.c.bf16 %v1813_v1, %v1812_v11 }
 0x2fc   :  { %v1870_v14 = vpack.c.bf16 %v1811_v12, %v1810_v21  ;;  %v6218_v15 = vpop.f32.mrb[44].mxu0 }
 0x2fd   :  { %v1604_v16 = vadd.f32 %v6218_v15, %v7455_v40  ;;  %v1595_v22 = vpop.f32.mrb[45].mxu0 }
 0x2fe   :  { %v1596_v23 = vadd.f32 %v7455_v40, %v1595_v22  ;;  %v6219_v24 = vpop.f32.mrb[46].mxu0  ;;  %6280 = vmatprep.mubr.msk.bf16.mxu1 %vm1921_vm3, %v1870_v14 }
 0x2ff   :  { %v1607_v25 = vadd.f32 %v6219_v24, %v7455_v40  ;;  %v1598_v26 = vpop.f32.mrb[47].mxu0  ;;  %6281 = vmatmul.mubr.msk.bf16.gmra.mrb[104].mxu1 %vm1921_vm3, %v1871_v13  ;;  %v1816_v8 = vmax.f32 %v1604_v16, 0.0 }
 0x300   :  { %v1599_v0 = vadd.f32 %v7455_v40, %v1598_v26  ;;  %v1814_v27 = vmax.f32 %v1596_v23, 0.0 }
 0x301   :  { %v1817_v20 = vmax.f32 %v1607_v25, 0.0  ;;  %6401 = vmatmul.mubr.msk.bf16.gmra.mrb[152].mxu0 %vm1921_vm3, %v7515_v17 }
 0x302   :  { %v1815_v28 = vmax.f32 %v1599_v0, 0.0  ;;  %6404 = vmatprep.mubr.msk.bf16.mxu0 %vm1921_vm3, %v7525_v37 }
 0x303   :  { %v1873_v29 = vpack.c.bf16 %v1817_v20, %v1816_v8 }
 0x304   :  { %v1872_v30 = vpack.c.bf16 %v1815_v28, %v1814_v27  ;;  %v6222_v31 = vpop.f32.mrb[48].mxu0 }
 0x305   :  { %v1620_v32 = vadd.f32 %v6222_v31, %v7455_v40  ;;  %v1611_v35 = vpop.f32.mrb[49].mxu0 }
 0x306   :  { %v1612_v38 = vadd.f32 %v7455_v40, %v1611_v35  ;;  %v6223_v9 = vpop.f32.mrb[50].mxu0  ;;  %6284 = vmatprep.mubr.msk.bf16.mxu1 %vm1921_vm3, %v1872_v30 }
 0x307   :  { %v1623_v54 = vadd.f32 %v6223_v9, %v7455_v40  ;;  %v1614_v2 = vpop.f32.mrb[51].mxu0  ;;  %6285 = vmatmul.mubr.msk.bf16.gmra.mrb[108].mxu1 %vm1921_vm3, %v1873_v29  ;;  %v1820_v53 = vmax.f32 %v1620_v32, 0.0 }
 0x308   :  { %v1615_v17 = vadd.f32 %v7455_v40, %v1614_v2  ;;  %v1818_v39 = vmax.f32 %v1612_v38, 0.0 }
 0x309   :  { %v1821_v37 = vmax.f32 %v1623_v54, 0.0  ;;  %6405 = vmatmul.mubr.msk.bf16.gmra.mrb[156].mxu0 %vm1921_vm3, %v7523_v36 }
 0x30a   :  { %v1819_v5 = vmax.f32 %v1615_v17, 0.0 }
 0x30b   :  { %v1875_v41 = vpack.c.bf16 %v1821_v37, %v1820_v53 }
 0x30c   :  { %v1874_v3 = vpack.c.bf16 %v1819_v5, %v1818_v39  ;;  %v6226_v42 = vpop.f32.mrb[52].mxu0 }
 0x30d   :  { %v1636_v18 = vadd.f32 %v7743_v19, %v6226_v42  ;;  %v1627_v43 = vpop.f32.mrb[53].mxu0 }
 0x30e   :  { %v1628_v40 = vadd.f32 %v7743_v19, %v1627_v43  ;;  %v6227_v34 = vpop.f32.mrb[54].mxu0  ;;  %6288 = vmatprep.mubr.msk.bf16.mxu1 %vm1921_vm3, %v1874_v3 }
 0x30f   :  { %v1639_v36 = vadd.f32 %v7743_v19, %v6227_v34  ;;  %v1630_v44 = vpop.f32.mrb[55].mxu0  ;;  %6289 = vmatmul.mubr.msk.bf16.gmra.mrb[112].mxu1 %vm1921_vm3, %v1875_v41  ;;  %v1824_v46 = vmax.f32 %v1636_v18, 0.0 }
 0x310   :  { %v1631_v45 = vadd.f32 %v7743_v19, %v1630_v44  ;;  %v1822_v50 = vmax.f32 %v1628_v40, 0.0 }
 0x311   :  { %v1825_v47 = vmax.f32 %v1639_v36, 0.0 }
 0x312   :  { %v1823_v51 = vmax.f32 %v1631_v45, 0.0 }
 0x313   :  { %v1877_v52 = vpack.c.bf16 %v1825_v47, %v1824_v46 }
 0x314   :  { %v1876_v55 = vpack.c.bf16 %v1823_v51, %v1822_v50  ;;  %v6230_v33 = vpop.f32.mrb[56].mxu0 }
 0x315   :  { %v1652_v56 = vadd.f32 %v7743_v19, %v6230_v33  ;;  %v1643_v49 = vpop.f32.mrb[57].mxu0 }
 0x316   :  { %v1644_v57 = vadd.f32 %v7743_v19, %v1643_v49  ;;  %v6231_v58 = vpop.f32.mrb[58].mxu0  ;;  %6292 = vmatprep.mubr.msk.bf16.mxu1 %vm1921_vm3, %v1876_v55 }
 0x317   :  { %v1655_v59 = vadd.f32 %v7743_v19, %v6231_v58  ;;  %v1646_v60 = vpop.f32.mrb[59].mxu0  ;;  %6293 = vmatmul.mubr.msk.bf16.gmra.mrb[116].mxu1 %vm1921_vm3, %v1877_v52  ;;  %v1828_v62 = vmax.f32 %v1652_v56, 0.0 }
 0x318   :  { %v1647_v61 = vadd.f32 %v7743_v19, %v1646_v60  ;;  %v1826_v6 = vmax.f32 %v1644_v57, 0.0 }
 0x319   :  { %v1829_v63 = vmax.f32 %v1655_v59, 0.0 }
 0x31a   :  { %v1827_v7 = vmax.f32 %v1647_v61, 0.0 }
 0x31b   :  { %v1879_v4 = vpack.c.bf16 %v1829_v63, %v1828_v62 }
 0x31c   :  { %v1878_v10 = vpack.c.bf16 %v1827_v7, %v1826_v6  ;;  %v6234_v48 = vpop.f32.mrb[60].mxu0 }
 0x31d   :  { %v1668_v11 = vadd.f32 %v7743_v19, %v6234_v48  ;;  %v1659_v1 = vpop.f32.mrb[61].mxu0 }
 0x31e   :  { %v1660_v21 = vadd.f32 %v7743_v19, %v1659_v1  ;;  %v6235_v12 = vpop.f32.mrb[62].mxu0  ;;  %6296 = vmatprep.mubr.msk.bf16.mxu1 %vm1921_vm3, %v1878_v10 }
 0x31f   :  { %v1671_v13 = vadd.f32 %v7743_v19, %v6235_v12  ;;  %v1662_v14 = vpop.f32.mrb[63].mxu0  ;;  %6297 = vmatmul.mubr.msk.bf16.gmra.mrb[120].mxu1 %vm1921_vm3, %v1879_v4  ;;  %v1832_v16 = vmax.f32 %v1668_v11, 0.0 }
 0x320   :  { %v1663_v15 = vadd.f32 %v7743_v19, %v1662_v14  ;;  %v1830_v23 = vmax.f32 %v1660_v21, 0.0 }
 0x321   :  { %v1833_v22 = vmax.f32 %v1671_v13, 0.0 }
 0x322   :  { %v1831_v24 = vmax.f32 %v1663_v15, 0.0 }
 0x323   :  { %v1881_v25 = vpack.c.bf16 %v1833_v22, %v1832_v16 }
 0x324   :  { %v1880_v26 = vpack.c.bf16 %v1831_v24, %v1830_v23  ;;  %v6238_v0 = vpop.f32.mrb[64].mxu0 }
 0x325   :  { %v1684_v8 = vadd.f32 %v7743_v19, %v6238_v0  ;;  %v1675_v20 = vpop.f32.mrb[65].mxu0 }
 0x326   :  { %v1676_v27 = vadd.f32 %v7743_v19, %v1675_v20  ;;  %v6239_v28 = vpop.f32.mrb[66].mxu0  ;;  %6300 = vmatprep.mubr.msk.bf16.mxu1 %vm1921_vm3, %v1880_v26 }
 0x327   :  { %v1836_v29 = vmax.f32 %v1684_v8, 0.0  ;;  %v1687_v30 = vadd.f32 %v7743_v19, %v6239_v28  ;;  %v1678_v31 = vpop.f32.mrb[67].mxu0  ;;  %6301 = vmatmul.mubr.msk.bf16.gmra.mrb[124].mxu1 %vm1921_vm3, %v1881_v25 }
 0x328   :  { %v1834_v32 = vmax.f32 %v1676_v27, 0.0  ;;  %v1679_v35 = vadd.f32 %v7743_v19, %v1678_v31 }
 0x329   :  { %v1837_v38 = vmax.f32 %v1687_v30, 0.0 }
 0x32a   :  { %v1835_v9 = vmax.f32 %v1679_v35, 0.0 }
 0x32b   :  { %v1883_v54 = vpack.c.bf16 %v1837_v38, %v1836_v29 }
 0x32c   :  { %v1882_v2 = vpack.c.bf16 %v1835_v9, %v1834_v32  ;;  %v6242_v17 = vpop.f32.mrb[68].mxu0 }
 0x32d   :  { %v1700_v53 = vadd.f32 %v7743_v19, %v6242_v17  ;;  %v1691_v37 = vpop.f32.mrb[69].mxu0 }
 0x32e   :  { %v1692_v39 = vadd.f32 %v7743_v19, %v1691_v37  ;;  %v6243_v5 = vpop.f32.mrb[70].mxu0  ;;  %6304 = vmatprep.mubr.msk.bf16.mxu1 %vm1921_vm3, %v1882_v2 }
 0x32f   :  { %v1840_v41 = vmax.f32 %v1700_v53, 0.0  ;;  %v1703_v3 = vadd.f32 %v7743_v19, %v6243_v5  ;;  %v1694_v42 = vpop.f32.mrb[71].mxu0  ;;  %6305 = vmatmul.mubr.msk.bf16.gmra.mrb[128].mxu1 %vm1921_vm3, %v1883_v54 }
 0x330   :  { %v1838_v18 = vmax.f32 %v1692_v39, 0.0  ;;  %v1695_v43 = vadd.f32 %v7743_v19, %v1694_v42 }
 0x331   :  { %v1841_v40 = vmax.f32 %v1703_v3, 0.0 }
 0x332   :  { %v1839_v34 = vmax.f32 %v1695_v43, 0.0 }
 0x333   :  { %v1885_v36 = vpack.c.bf16 %v1841_v40, %v1840_v41 }
 0x334   :  { %v1884_v44 = vpack.c.bf16 %v1839_v34, %v1838_v18  ;;  %v6246_v45 = vpop.f32.mrb[72].mxu0 }
 0x335   :  { %v1716_v46 = vadd.f32 %v7743_v19, %v6246_v45  ;;  %v1707_v47 = vpop.f32.mrb[73].mxu0 }
 0x336   :  { %v1708_v50 = vadd.f32 %v7743_v19, %v1707_v47  ;;  %v6247_v51 = vpop.f32.mrb[74].mxu0  ;;  %6308 = vmatprep.mubr.msk.bf16.mxu1 %vm1921_vm3, %v1884_v44 }
 0x337   :  { %v1844_v52 = vmax.f32 %v1716_v46, 0.0  ;;  %v1719_v55 = vadd.f32 %v7743_v19, %v6247_v51  ;;  %v1710_v33 = vpop.f32.mrb[75].mxu0  ;;  %6309 = vmatmul.mubr.msk.bf16.gmra.mrb[132].mxu1 %vm1921_vm3, %v1885_v36 }
 0x338   :  { %v1842_v56 = vmax.f32 %v1708_v50, 0.0  ;;  %v1711_v49 = vadd.f32 %v7743_v19, %v1710_v33 }
 0x339   :  { %v1845_v57 = vmax.f32 %v1719_v55, 0.0 }
 0x33a   :  { %v1843_v58 = vmax.f32 %v1711_v49, 0.0 }
 0x33b   :  { %v1887_v59 = vpack.c.bf16 %v1845_v57, %v1844_v52 }
 0x33c   :  { %v1886_v60 = vpack.c.bf16 %v1843_v58, %v1842_v56  ;;  %v6250_v61 = vpop.f32.mrb[76].mxu0 }
 0x33d   :  { %v1732_v62 = vadd.f32 %v7743_v19, %v6250_v61  ;;  %v1723_v63 = vpop.f32.mrb[77].mxu0 }
 0x33e   :  { %v1724_v6 = vadd.f32 %v7743_v19, %v1723_v63  ;;  %v6251_v7 = vpop.f32.mrb[78].mxu0  ;;  %6312 = vmatprep.mubr.msk.bf16.mxu1 %vm1921_vm3, %v1886_v60 }
 0x33f   :  { %v1848_v4 = vmax.f32 %v1732_v62, 0.0  ;;  %v1735_v10 = vadd.f32 %v7743_v19, %v6251_v7  ;;  %v1726_v48 = vpop.f32.mrb[79].mxu0  ;;  %6313 = vmatmul.mubr.msk.bf16.gmra.mrb[136].mxu1 %vm1921_vm3, %v1887_v59 }
 0x340   :  { %v1846_v11 = vmax.f32 %v1724_v6, 0.0  ;;  %v1727_v1 = vadd.f32 %v7743_v19, %v1726_v48 }
 0x341   :  { %v1849_v21 = vmax.f32 %v1735_v10, 0.0 }
 0x342   :  { %v1847_v12 = vmax.f32 %v1727_v1, 0.0 }
 0x343   :  { %v1889_v13 = vpack.c.bf16 %v1849_v21, %v1848_v4 }
 0x344   :  { %v1888_v14 = vpack.c.bf16 %v1847_v12, %v1846_v11  ;;  %v6254_v15 = vpop.f32.mrb[80].mxu0  ;;  %v7814_v11 = vld [vmem:[%s9186_s9] ss:$0 sm:$0xff] }
 0x345   :  { %v1748_v16 = vadd.f32 %v7743_v19, %v6254_v15  ;;  %v1739_v22 = vpop.f32.mrb[81].mxu0 }
 0x346   :  { %v1740_v23 = vadd.f32 %v7743_v19, %v1739_v22  ;;  %v6255_v24 = vpop.f32.mrb[82].mxu0  ;;  %6316 = vmatprep.mubr.msk.bf16.mxu1 %vm1921_vm3, %v1888_v14 }
 0x347   :  { %v1852_v25 = vmax.f32 %v1748_v16, 0.0  ;;  %v1751_v26 = vadd.f32 %v7743_v19, %v6255_v24  ;;  %v1742_v0 = vpop.f32.mrb[83].mxu0  ;;  %6317 = vmatmul.mubr.msk.bf16.gmra.mrb[140].mxu1 %vm1921_vm3, %v1889_v13 }
 0x348   :  { %v1850_v8 = vmax.f32 %v1740_v23, 0.0  ;;  %v1743_v20 = vadd.f32 %v7743_v19, %v1742_v0 }
 0x349   :  { %v1853_v27 = vmax.f32 %v1751_v26, 0.0 }
 0x34a   :  { %v1851_v28 = vmax.f32 %v1743_v20, 0.0 }
 0x34b   :  { %v1891_v29 = vpack.c.bf16 %v1853_v27, %v1852_v25 }
 0x34c   :  { %v1890_v30 = vpack.c.bf16 %v1851_v28, %v1850_v8  ;;  %v6258_v31 = vpop.f32.mrb[84].mxu0 }
 0x34d   :  { %v1764_v32 = vadd.f32 %v7743_v19, %v6258_v31  ;;  %v1755_v35 = vpop.f32.mrb[85].mxu0 }
 0x34e   :  { %v1756_v38 = vadd.f32 %v7743_v19, %v1755_v35  ;;  %v6259_v9 = vpop.f32.mrb[86].mxu0  ;;  %6320 = vmatprep.mubr.msk.bf16.mxu1 %vm1921_vm3, %v1890_v30 }
 0x34f   :  { %v1856_v54 = vmax.f32 %v1764_v32, 0.0  ;;  %v1767_v2 = vadd.f32 %v7743_v19, %v6259_v9  ;;  %v1758_v17 = vpop.f32.mrb[87].mxu0  ;;  %6321 = vmatmul.mubr.msk.bf16.gmra.mrb[144].mxu1 %vm1921_vm3, %v1891_v29 }
 0x350   :  { %v1854_v53 = vmax.f32 %v1756_v38, 0.0  ;;  %v1759_v37 = vadd.f32 %v7743_v19, %v1758_v17 }
 0x351   :  { %v1857_v39 = vmax.f32 %v1767_v2, 0.0 }
 0x352   :  { %v1855_v5 = vmax.f32 %v1759_v37, 0.0 }
 0x353   :  { %v1893_v41 = vpack.c.bf16 %v1857_v39, %v1856_v54 }
 0x354   :  { %v1892_v3 = vpack.c.bf16 %v1855_v5, %v1854_v53  ;;  %v6262_v42 = vpop.f32.mrb[88].mxu0 }
 0x355   :  { %v1780_v18 = vadd.f32 %v7743_v19, %v6262_v42  ;;  %v1771_v43 = vpop.f32.mrb[89].mxu0 }
 0x356   :  { %v1772_v40 = vadd.f32 %v7743_v19, %v1771_v43  ;;  %v6263_v34 = vpop.f32.mrb[90].mxu0  ;;  %6324 = vmatprep.mubr.msk.bf16.mxu1 %vm1921_vm3, %v1892_v3 }
 0x357   :  { %v1860_v36 = vmax.f32 %v1780_v18, 0.0  ;;  %v1783_v44 = vadd.f32 %v7743_v19, %v6263_v34  ;;  %v1774_v45 = vpop.f32.mrb[91].mxu0  ;;  %6325 = vmatmul.mubr.msk.bf16.gmra.mrb[148].mxu1 %vm1921_vm3, %v1893_v41 }
 0x358   :  { %v1858_v46 = vmax.f32 %v1772_v40, 0.0  ;;  %v1775_v47 = vadd.f32 %v7743_v19, %v1774_v45 }
 0x359   :  { %v1861_v50 = vmax.f32 %v1783_v44, 0.0 }
 0x35a   :  { %v1859_v51 = vmax.f32 %v1775_v47, 0.0 }
 0x35b   :  { %v1895_v52 = vpack.c.bf16 %v1861_v50, %v1860_v36 }
 0x35c   :  { %v1894_v55 = vpack.c.bf16 %v1859_v51, %v1858_v46  ;;  %v6266_v33 = vpop.f32.mrb[92].mxu0 }
 0x35d   :  { %v1796_v56 = vadd.f32 %v7743_v19, %v6266_v33  ;;  %v1787_v49 = vpop.f32.mrb[93].mxu0 }
 0x35e   :  { %v1788_v57 = vadd.f32 %v7743_v19, %v1787_v49  ;;  %v6267_v58 = vpop.f32.mrb[94].mxu0  ;;  %6328 = vmatprep.mubr.msk.bf16.mxu1 %vm1921_vm3, %v1894_v55 }
 0x35f   :  { %v1864_v59 = vmax.f32 %v1796_v56, 0.0  ;;  %v1799_v60 = vadd.f32 %v7743_v19, %v6267_v58  ;;  %v1790_v61 = vpop.f32.mrb[95].mxu0  ;;  %6329 = vmatmul.mubr.msk.bf16.gmra.mrb[152].mxu1 %vm1921_vm3, %v1895_v52 }
 0x360   :  { %v1862_v62 = vmax.f32 %v1788_v57, 0.0  ;;  %v1791_v63 = vadd.f32 %v7743_v19, %v1790_v61 }
 0x361   :  { %v1865_v6 = vmax.f32 %v1799_v60, 0.0 }
 0x362   :  { %v1863_v7 = vmax.f32 %v1791_v63, 0.0 }
 0x363   :  { %v1897_v4 = vpack.c.bf16 %v1865_v6, %v1864_v59 }
 0x364   :  { %v1896_v10 = vpack.c.bf16 %v1863_v7, %v1862_v62  ;;  %v6342_v48 = vpop.f32.mrb[96].mxu0 }
 0x365   :  { %v2460_v1 = vpop.f32.mrb[97].mxu0  ;;  %v2469_v12 = vadd.f32 %v6342_v48, %v7814_v11 }
 0x366   :  { %6332 = vmatprep.mubr.msk.bf16.mxu1 %vm1921_vm3, %v1896_v10  ;;  %v6343_v21 = vpop.f32.mrb[98].mxu0  ;;  %v2461_v14 = vadd.f32 %v7814_v11, %v2460_v1 }
 0x367   :  { %v2472_v13 = vadd.f32 %v6343_v21, %v7814_v11  ;;  %6333 = vmatmul.mubr.msk.bf16.gmra.mrb[156].mxu1 %vm1921_vm3, %v1897_v4  ;;  %v2463_v19 = vpop.f32.mrb[99].mxu0 }
 0x368   :  { %v2464_v15 = vadd.f32 %v7814_v11, %v2463_v19 }
 0x369   :  { %v2588_v16 = vpack.c.bf16 %v2472_v13, %v2469_v12 }
 0x36a   :  { %v2587_v22 = vpack.c.bf16 %v2464_v15, %v2461_v14 }
 0x36b   :  { %v2855_v32 = vsel %vm1921_vm3, %v2588_v16, 0 }
 0x36c   :  { %v6346_v23 = vpop.f32.mrb[100].mxu0  ;;  %6746 = vmatprep.subr.msk.bf16.mxu1 %vm1921_vm3, %v2587_v22  ;;  %v2852_v24 = vsel %vm1921_vm3, %v2587_v22, 0 }
 0x36d   :  { %v2476_v25 = vpop.f32.mrb[101].mxu0  ;;  %6409 = vmatpush3.bf16.xpose.msra.mxu1 %v2852_v24  ;;  %v2485_v0 = vadd.f32 %v6346_v23, %v7814_v11 }
 0x36e   :  { %v6347_v26 = vpop.f32.mrb[102].mxu0  ;;  %6747 = vmatprep.subr.msk.bf16.mxu1 %vm1921_vm3, %v2588_v16  ;;  %v2477_v27 = vadd.f32 %v7814_v11, %v2476_v25 }
 0x36f   :  { %v2488_v8 = vadd.f32 %v6347_v26, %v7814_v11  ;;  %v2479_v20 = vpop.f32.mrb[103].mxu0 }
 0x370   :  { %v2480_v28 = vadd.f32 %v7814_v11, %v2479_v20 }
 0x371   :  { %v2590_v29 = vpack.c.bf16 %v2488_v8, %v2485_v0 }
 0x372   :  { %v2589_v30 = vpack.c.bf16 %v2480_v28, %v2477_v27 }
 0x373   :  { %v2861_v47 = vsel %vm1921_vm3, %v2590_v29, 0 }
 0x374   :  { %v6350_v31 = vpop.f32.mrb[104].mxu0  ;;  %v2858_v41 = vsel %vm1921_vm3, %v2589_v30, 0 }
 0x375   :  { %v2492_v35 = vpop.f32.mrb[105].mxu0  ;;  %6411 = vmatpush3.bf16.xpose.msra.mxu1 %v2855_v32  ;;  %v2501_v9 = vadd.f32 %v6350_v31, %v7814_v11 }
 0x376   :  { %v6351_v38 = vpop.f32.mrb[106].mxu0  ;;  %6748 = vmatprep.subr.msk.bf16.mxu1 %vm1921_vm3, %v2589_v30  ;;  %v2493_v17 = vadd.f32 %v7814_v11, %v2492_v35 }
 0x377   :  { %v2504_v54 = vadd.f32 %v6351_v38, %v7814_v11  ;;  %v2495_v2 = vpop.f32.mrb[107].mxu0  ;;  %v7884_v38 = vld [vmem:[%s9185_s12] sm:$0xff]  }
 0x378   :  { %v2496_v53 = vadd.f32 %v7814_v11, %v2495_v2 }
 0x379   :  { %v2592_v37 = vpack.c.bf16 %v2504_v54, %v2501_v9  ;;  %v7889_v54 = vld [vmem:[%s9187_s11] ss:$0 sm:$0xff] }
 0x37a   :  { %v2591_v39 = vpack.c.bf16 %v2496_v53, %v2493_v17 }
 0x37b   :  { %v2867_v12 = vsel %vm1921_vm3, %v2592_v37, 0 }
 0x37c   :  { %v6354_v5 = vpop.f32.mrb[108].mxu0  ;;  %v2864_v60 = vsel %vm1921_vm3, %v2591_v39, 0 }
 0x37d   :  { %v2508_v3 = vpop.f32.mrb[109].mxu0  ;;  %6413 = vmatpush3.bf16.xpose.msra.mxu1 %v2858_v41  ;;  %v2517_v18 = vadd.f32 %v6354_v5, %v7814_v11 }
 0x37e   :  { %v6355_v42 = vpop.f32.mrb[110].mxu0  ;;  %6749 = vmatprep.subr.msk.bf16.mxu1 %vm1921_vm3, %v2590_v29  ;;  %v2509_v34 = vadd.f32 %v7814_v11, %v2508_v3 }
 0x37f   :  { %v2520_v43 = vadd.f32 %v6355_v42, %v7814_v11  ;;  %v2511_v40 = vpop.f32.mrb[111].mxu0 }
 0x380   :  { %v2512_v36 = vadd.f32 %v7814_v11, %v2511_v40 }
 0x381   :  { %v2594_v44 = vpack.c.bf16 %v2520_v43, %v2517_v18 }
 0x382   :  { %v2593_v45 = vpack.c.bf16 %v2512_v36, %v2509_v34 }
 0x383   :  { %v2873_v2 = vsel %vm1921_vm3, %v2594_v44, 0 }
 0x384   :  { %v6358_v46 = vpop.f32.mrb[112].mxu0  ;;  %v2870_v0 = vsel %vm1921_vm3, %v2593_v45, 0 }
 0x385   :  { %v2533_v50 = vadd.f32 %v6358_v46, %v7814_v11  ;;  %v2524_v51 = vpop.f32.mrb[113].mxu0  ;;  %6415 = vmatpush3.bf16.xpose.msra.mxu1 %v2861_v47 }
 0x386   :  { %v2525_v52 = vadd.f32 %v7814_v11, %v2524_v51  ;;  %v6359_v55 = vpop.f32.mrb[114].mxu0  ;;  %6750 = vmatprep.subr.msk.bf16.mxu1 %vm1921_vm3, %v2591_v39 }
 0x387   :  { %v2536_v33 = vadd.f32 %v6359_v55, %v7814_v11  ;;  %v2527_v56 = vpop.f32.mrb[115].mxu0 }
 0x388   :  { %v2528_v49 = vadd.f32 %v7814_v11, %v2527_v56 }
 0x389   :  { %v7847_v57 = vpack.c.bf16 %v2536_v33, %v2533_v50 }
 0x38a   :  { %v7849_v58 = vpack.c.bf16 %v2528_v49, %v2525_v52 }
 0x38c   :  { %v6362_v59 = vpop.f32.mrb[116].mxu0 }
 0x38d   :  { %v2549_v61 = vadd.f32 %v6362_v59, %v7814_v11  ;;  %v2540_v62 = vpop.f32.mrb[117].mxu0  ;;  %6417 = vmatpush3.bf16.xpose.msra.mxu1 %v2864_v60 }
 0x38e   :  { %v2541_v63 = vadd.f32 %v7814_v11, %v2540_v62  ;;  %v6363_v6 = vpop.f32.mrb[118].mxu0  ;;  %6751 = vmatprep.subr.msk.bf16.mxu1 %vm1921_vm3, %v2592_v37 }
 0x38f   :  { %v2552_v7 = vadd.f32 %v6363_v6, %v7814_v11  ;;  %v2543_v4 = vpop.f32.mrb[119].mxu0 }
 0x390   :  { %v2544_v10 = vadd.f32 %v7814_v11, %v2543_v4 }
 0x391   :  { %v7857_v48 = vpack.c.bf16 %v2552_v7, %v2549_v61 }
 0x392   :  { %v7859_v1 = vpack.c.bf16 %v2544_v10, %v2541_v63 }
 0x394   :  { %v6366_v21 = vpop.f32.mrb[120].mxu0 }
 0x395   :  { %v2565_v13 = vadd.f32 %v6366_v21, %v7814_v11  ;;  %v2556_v19 = vpop.f32.mrb[121].mxu0  ;;  %6419 = vmatpush3.bf16.xpose.msra.mxu1 %v2867_v12 }
 0x396   :  { %v2557_v14 = vadd.f32 %v7814_v11, %v2556_v19  ;;  %v6367_v15 = vpop.f32.mrb[122].mxu0  ;;  %6752 = vmatprep.subr.msk.bf16.mxu1 %vm1921_vm3, %v2593_v45 }
 0x397   :  { %v2568_v16 = vadd.f32 %v6367_v15, %v7814_v11  ;;  %v2559_v22 = vpop.f32.mrb[123].mxu0 }
 0x398   :  { %v2560_v23 = vadd.f32 %v7814_v11, %v2559_v22 }
 0x399   :  { %v7867_v24 = vpack.c.bf16 %v2568_v16, %v2565_v13  ;;  %v7912_v16 = vld [vmem:[%s9188_s7] ss:$0 sm:$0xff] }
 0x39a   :  { %v7869_v25 = vpack.c.bf16 %v2560_v23, %v2557_v14 }
 0x39c   :  { %v6370_v26 = vpop.f32.mrb[124].mxu0 }
 0x39d   :  { %v2581_v8 = vadd.f32 %v6370_v26, %v7814_v11  ;;  %v2572_v20 = vpop.f32.mrb[125].mxu0  ;;  %6421 = vmatpush3.bf16.xpose.msra.mxu1 %v2870_v0 }
 0x39e   :  { %v2573_v27 = vadd.f32 %v7814_v11, %v2572_v20  ;;  %v6371_v28 = vpop.f32.mrb[126].mxu0  ;;  %6753 = vmatprep.subr.msk.bf16.mxu1 %vm1921_vm3, %v2594_v44 }
 0x39f   :  { %v2584_v29 = vadd.f32 %v6371_v28, %v7814_v11  ;;  %v2575_v30 = vpop.f32.mrb[127].mxu0 }
 0x3a0   :  { %v2576_v31 = vadd.f32 %v7814_v11, %v2575_v30 }
 0x3a1   :  { %v7877_v32 = vpack.c.bf16 %v2584_v29, %v2581_v8 }
 0x3a2   :  { %v7879_v35 = vpack.c.bf16 %v2576_v31, %v2573_v27 }
 0x3a4   :  { %v6378_v9 = vpop.f32.mrb[128].mxu0 }
 0x3a5   :  { %v2660_v17 = vpop.f32.mrb[129].mxu0  ;;  %6423 = vmatpush3.bf16.xpose.msra.mxu1 %v2873_v2  ;;  %v2669_v53 = vadd.f32 %v6378_v9, %v7889_v54 }
 0x3a6   :  { %v6379_v11 = vpop.f32.mrb[130].mxu0  ;;  %6504 = vmatprep.subr.bf16.mxu1 %v7884_v38  ;;  %v2661_v5 = vadd.f32 %v7889_v54, %v2660_v17 }
 0x3a7   :  { %v2672_v37 = vadd.f32 %v6379_v11, %v7889_v54  ;;  %v2663_v39 = vpop.f32.mrb[131].mxu0 }
 0x3a8   :  { %v2664_v41 = vadd.f32 %v7889_v54, %v2663_v39 }
 0x3a9   :  { %v2788_v3 = vpack.c.bf16 %v2672_v37, %v2669_v53 }
 0x3aa   :  { %v2787_v42 = vpack.c.bf16 %v2664_v41, %v2661_v5  ;;  %v6821_v5 = vld [vmem:[%s9185_s12 + $0x8] sm:$0xff]  }
 0x3ac   :  { %v6382_v18 = vpop.f32.mrb[132].mxu0  ;;  %6456 = vmatprep.subr.bf16.mxu0 %v2787_v42 }
 0x3ad   :  { %v2676_v43 = vpop.f32.mrb[133].mxu0  ;;  %6457 = vmatpush3.bf16.msra.mxu0 %v2787_v42  ;;  %v2685_v34 = vadd.f32 %v6382_v18, %v7889_v54 }
 0x3ae   :  { %v6383_v40 = vpop.f32.mrb[134].mxu0  ;;  %6458 = vmatprep.subr.bf16.mxu0 %v2788_v3  ;;  %v2677_v45 = vadd.f32 %v7889_v54, %v2676_v43 }
 0x3af   :  { %v2688_v36 = vadd.f32 %v6383_v40, %v7889_v54  ;;  %v2679_v44 = vpop.f32.mrb[135].mxu0 }
 0x3b0   :  { %v2680_v46 = vadd.f32 %v7889_v54, %v2679_v44 }
 0x3b1   :  { %v2790_v47 = vpack.c.bf16 %v2688_v36, %v2685_v34  ;;  %6459 = vmatpush3.bf16.msra.mxu0 %v2788_v3 }
 0x3b2   :  { %v2789_v50 = vpack.c.bf16 %v2680_v46, %v2677_v45 }
 0x3b4   :  { %v6386_v51 = vpop.f32.mrb[136].mxu0  ;;  %6460 = vmatprep.subr.bf16.mxu0 %v2789_v50 }
 0x3b5   :  { %v2692_v52 = vpop.f32.mrb[137].mxu0  ;;  %6461 = vmatpush3.bf16.msra.mxu0 %v2789_v50  ;;  %v2701_v33 = vadd.f32 %v6386_v51, %v7889_v54 }
 0x3b6   :  { %v6387_v55 = vpop.f32.mrb[138].mxu0  ;;  %6462 = vmatprep.subr.bf16.mxu0 %v2790_v47  ;;  %v2693_v59 = vadd.f32 %v7889_v54, %v2692_v52 }
 0x3b7   :  { %v2704_v56 = vadd.f32 %v6387_v55, %v7889_v54  ;;  %v2695_v49 = vpop.f32.mrb[139].mxu0 }
 0x3b8   :  { %v2696_v60 = vadd.f32 %v7889_v54, %v2695_v49 }
 0x3b9   :  { %v2792_v61 = vpack.c.bf16 %v2704_v56, %v2701_v33  ;;  %6463 = vmatpush3.bf16.msra.mxu0 %v2790_v47 }
 0x3ba   :  { %v2791_v62 = vpack.c.bf16 %v2696_v60, %v2693_v59 }
 0x3bc   :  { %v6390_v63 = vpop.f32.mrb[140].mxu0  ;;  %6464 = vmatprep.subr.bf16.mxu0 %v2791_v62 }
 0x3bd   :  { %v2708_v6 = vpop.f32.mrb[141].mxu0  ;;  %6465 = vmatpush3.bf16.msra.mxu0 %v2791_v62  ;;  %v2717_v4 = vadd.f32 %v6390_v63, %v7889_v54 }
 0x3be   :  { %v6391_v7 = vpop.f32.mrb[142].mxu0  ;;  %6466 = vmatprep.subr.bf16.mxu0 %v2792_v61  ;;  %v2709_v12 = vadd.f32 %v7889_v54, %v2708_v6 }
 0x3bf   :  { %v2720_v10 = vadd.f32 %v6391_v7, %v7889_v54  ;;  %v2711_v21 = vpop.f32.mrb[143].mxu0 }
 0x3c0   :  { %v2712_v13 = vadd.f32 %v7889_v54, %v2711_v21 }
 0x3c1   :  { %v2794_v19 = vpack.c.bf16 %v2720_v10, %v2717_v4  ;;  %6467 = vmatpush3.bf16.msra.mxu0 %v2792_v61 }
 0x3c2   :  { %v2793_v14 = vpack.c.bf16 %v2712_v13, %v2709_v12  ;;  %v6274_v15 = vpop.f32.mrb[96].mxu1 }
 0x3c3   :  { %v2052_v22 = vpop.f32.mrb[97].mxu1  ;;  %v2061_v0 = vadd.f32 %v6274_v15, %v7912_v16 }
 0x3c4   :  { %v6275_v23 = vpop.f32.mrb[98].mxu1  ;;  %v6394_v26 = vpop.f32.mrb[144].mxu0  ;;  %6468 = vmatprep.subr.bf16.mxu0 %v2793_v14  ;;  %v2053_v29 = vadd.f32 %v7912_v16, %v2052_v22 }
 0x3c5   :  { %v2064_v8 = vadd.f32 %v6275_v23, %v7912_v16  ;;  %v2733_v20 = vadd.f32 %v6394_v26, %v7889_v54  ;;  %v2055_v27 = vpop.f32.mrb[99].mxu1  ;;  %v2724_v28 = vpop.f32.mrb[145].mxu0  ;;  %6469 = vmatpush3.bf16.msra.mxu0 %v2793_v14 }
 0x3c6   :  { %v2056_v30 = vadd.f32 %v7912_v16, %v2055_v27  ;;  %v2725_v31 = vadd.f32 %v7889_v54, %v2724_v28  ;;  %v6395_v9 = vpop.f32.mrb[146].mxu0  ;;  %6470 = vmatprep.subr.bf16.mxu0 %v2794_v19 }
 0x3c7   :  { %v2308_v2 = vpack.c.bf16 %v2064_v8, %v2061_v0  ;;  %v2736_v17 = vadd.f32 %v6395_v9, %v7889_v54  ;;  %v2727_v11 = vpop.f32.mrb[147].mxu0 }
 0x3c8   :  { %v2307_v53 = vpack.c.bf16 %v2056_v30, %v2053_v29  ;;  %v2728_v37 = vadd.f32 %v7889_v54, %v2727_v11 }
 0x3c9   :  { %v7922_v39 = vpack.c.bf16 %v2736_v17, %v2733_v20  ;;  %6471 = vmatpush3.bf16.msra.mxu0 %v2794_v19 }
 0x3ca   :  { %v7927_v41 = vpack.c.bf16 %v2728_v37, %v2725_v31  ;;  %v6278_v3 = vpop.f32.mrb[100].mxu1  ;;  %6424 = vmatprep.mubr.msk.bf16.mxu1 %vm1921_vm3, %v2307_v53 }
 0x3cb   :  { %9228 = vst [vmem:[#allocation2_spill] sm:$0xff] %v7922_v39  ;;  %v2068_v42 = vpop.f32.mrb[101].mxu1  ;;  %6425 = vmatmul.mubr.msk.bf16.vlgmr.msra.gmra.mrb[160].mxu1 %vm1921_vm3, %v2308_v2  ;;  %v2077_v40 = vadd.f32 %v6278_v3, %v7912_v16 }
 0x3cc   :  { %6505 = vmatpush3.bf16.msra.mxu1 %v7884_v38  ;;  %v6279_v18 = vpop.f32.mrb[102].mxu1  ;;  %v6398_v43 = vpop.f32.mrb[148].mxu0  ;;  %v2069_v46 = vadd.f32 %v7912_v16, %v2068_v42 }
 0x3cd   :  { %v2080_v34 = vadd.f32 %v6279_v18, %v7912_v16  ;;  %v2749_v36 = vadd.f32 %v6398_v43, %v7889_v54  ;;  %v2071_v44 = vpop.f32.mrb[103].mxu1  ;;  %v2740_v45 = vpop.f32.mrb[149].mxu0  ;;  %6506 = vmatprep.subr.bf16.mxu1 %v6821_v5 }
 0x3ce   :  { %v2072_v47 = vadd.f32 %v7912_v16, %v2071_v44  ;;  %v2741_v50 = vadd.f32 %v7889_v54, %v2740_v45  ;;  %v6399_v51 = vpop.f32.mrb[150].mxu0 }
 0x3cf   :  { %v2310_v52 = vpack.c.bf16 %v2080_v34, %v2077_v40  ;;  %v2752_v38 = vadd.f32 %v6399_v51, %v7889_v54  ;;  %v2743_v55 = vpop.f32.mrb[151].mxu0 }
 0x3d0   :  { %v2309_v33 = vpack.c.bf16 %v2072_v47, %v2069_v46  ;;  %v2744_v56 = vadd.f32 %v7889_v54, %v2743_v55  ;;  %6507 = vmatpush3.bf16.msra.mxu1 %v6821_v5 }
 0x3d1   :  { %v7940_v49 = vpack.c.bf16 %v2752_v38, %v2749_v36  ;;  %6754 = vmatprep.subr.msk.bf16.mxu1 %vm1921_vm3, %v7849_v58 }
 0x3d2   :  { %v7944_v59 = vpack.c.bf16 %v2744_v56, %v2741_v50  ;;  %v6282_v60 = vpop.f32.mrb[104].mxu1  ;;  %6428 = vmatprep.mubr.msk.bf16.mxu1 %vm1921_vm3, %v2309_v33 }
 0x3d3   :  { %9229 = vst [vmem:[#allocation3_spill] sm:$0xff] %v7940_v49  ;;  %v2084_v61 = vpop.f32.mrb[105].mxu1  ;;  %6429 = vmatmul.mubr.msk.bf16.gmra.mrb[164].mxu1 %vm1921_vm3, %v2310_v52  ;;  %v2093_v6 = vadd.f32 %v6282_v60, %v7912_v16 }
 0x3d4   :  { %9230 = vst [vmem:[#allocation4_spill] sm:$0xff] %v7944_v59  ;;  %v6283_v62 = vpop.f32.mrb[106].mxu1  ;;  %v6402_v63 = vpop.f32.mrb[152].mxu0  ;;  %v2085_v12 = vadd.f32 %v7912_v16, %v2084_v61 }
 0x3d5   :  { %v2096_v7 = vadd.f32 %v6283_v62, %v7912_v16  ;;  %v2765_v4 = vadd.f32 %v6402_v63, %v7889_v54  ;;  %v2087_v10 = vpop.f32.mrb[107].mxu1  ;;  %v2756_v21 = vpop.f32.mrb[153].mxu0 }
 0x3d6   :  { %v2088_v13 = vadd.f32 %v7912_v16, %v2087_v10  ;;  %v2757_v19 = vadd.f32 %v7889_v54, %v2756_v21  ;;  %v6403_v14 = vpop.f32.mrb[154].mxu0 }
 0x3d7   :  { %v2312_v15 = vpack.c.bf16 %v2096_v7, %v2093_v6  ;;  %v2768_v22 = vadd.f32 %v6403_v14, %v7889_v54  ;;  %v2759_v23 = vpop.f32.mrb[155].mxu0 }
 0x3d8   :  { %v2311_v26 = vpack.c.bf16 %v2088_v13, %v2085_v12  ;;  %v2760_v0 = vadd.f32 %v7889_v54, %v2759_v23 }
 0x3d9   :  { %v7956_v8 = vpack.c.bf16 %v2768_v22, %v2765_v4 }
 0x3da   :  { %v7958_v20 = vpack.c.bf16 %v2760_v0, %v2757_v19  ;;  %v6286_v27 = vpop.f32.mrb[108].mxu1  ;;  %6432 = vmatprep.mubr.msk.bf16.mxu1 %vm1921_vm3, %v2311_v26 }
 0x3db   :  { %9231 = vst [vmem:[#allocation5_spill] sm:$0xff] %v7956_v8  ;;  %v2100_v28 = vpop.f32.mrb[109].mxu1  ;;  %6433 = vmatmul.mubr.msk.bf16.gmra.mrb[168].mxu1 %vm1921_vm3, %v2312_v15  ;;  %v2109_v31 = vadd.f32 %v6286_v27, %v7912_v16 }
 0x3dc   :  { %9232 = vst [vmem:[#allocation6_spill] sm:$0xff] %v7958_v20  ;;  %v6287_v29 = vpop.f32.mrb[110].mxu1  ;;  %v6406_v30 = vpop.f32.mrb[156].mxu0  ;;  %v2101_v53 = vadd.f32 %v7912_v16, %v2100_v28 }
 0x3dd   :  { %v2112_v9 = vadd.f32 %v6287_v29, %v7912_v16  ;;  %v2781_v2 = vadd.f32 %v6406_v30, %v7889_v54  ;;  %v2103_v17 = vpop.f32.mrb[111].mxu1  ;;  %v2772_v11 = vpop.f32.mrb[157].mxu0 }
 0x3de   :  { %v2104_v37 = vadd.f32 %v7912_v16, %v2103_v17  ;;  %v2773_v5 = vadd.f32 %v7889_v54, %v2772_v11  ;;  %v6407_v3 = vpop.f32.mrb[158].mxu0 }
 0x3df   :  { %v2314_v42 = vpack.c.bf16 %v2112_v9, %v2109_v31  ;;  %v2784_v18 = vadd.f32 %v6407_v3, %v7889_v54  ;;  %v2775_v43 = vpop.f32.mrb[159].mxu0 }
 0x3e0   :  { %v2313_v40 = vpack.c.bf16 %v2104_v37, %v2101_v53  ;;  %v2776_v34 = vadd.f32 %v7889_v54, %v2775_v43 }
 0x3e1   :  { %v7970_v36 = vpack.c.bf16 %v2784_v18, %v2781_v2 }
 0x3e2   :  { %v7972_v44 = vpack.c.bf16 %v2776_v34, %v2773_v5  ;;  %v6290_v45 = vpop.f32.mrb[112].mxu1  ;;  %6436 = vmatprep.mubr.msk.bf16.mxu1 %vm1921_vm3, %v2313_v40 }
 0x3e3   :  { %9233 = vst [vmem:[#allocation7_spill] sm:$0xff] %v7970_v36  ;;  %v2116_v46 = vpop.f32.mrb[113].mxu1  ;;  %6437 = vmatmul.mubr.msk.bf16.gmra.mrb[172].mxu1 %vm1921_vm3, %v2314_v42  ;;  %v2125_v50 = vadd.f32 %v6290_v45, %v7912_v16 }
 0x3e4   :  { %9234 = vst [vmem:[#allocation8_spill] sm:$0xff] %v7972_v44  ;;  %v6291_v47 = vpop.f32.mrb[114].mxu1  ;;  %v2117_v38 = vadd.f32 %v7912_v16, %v2116_v46 }
 0x3e5   :  { %v2128_v51 = vadd.f32 %v6291_v47, %v7912_v16  ;;  %v2119_v52 = vpop.f32.mrb[115].mxu1 }
 0x3e6   :  { %v2120_v54 = vadd.f32 %v7912_v16, %v2119_v52 }
 0x3e7   :  { %v2316_v55 = vpack.c.bf16 %v2128_v51, %v2125_v50 }
 0x3e8   :  { %v2315_v33 = vpack.c.bf16 %v2120_v54, %v2117_v38 }
 0x3ea   :  { %v6294_v56 = vpop.f32.mrb[116].mxu1  ;;  %6440 = vmatprep.mubr.msk.bf16.mxu1 %vm1921_vm3, %v2315_v33 }
 0x3eb   :  { %v2132_v60 = vpop.f32.mrb[117].mxu1  ;;  %6441 = vmatmul.mubr.msk.bf16.gmra.mrb[176].mxu1 %vm1921_vm3, %v2316_v55  ;;  %v2141_v62 = vadd.f32 %v6294_v56, %v7912_v16 }
 0x3ec   :  { %v6295_v61 = vpop.f32.mrb[118].mxu1  ;;  %v2133_v7 = vadd.f32 %v7912_v16, %v2132_v60 }
 0x3ed   :  { %v2144_v63 = vadd.f32 %v6295_v61, %v7912_v16  ;;  %v2135_v6 = vpop.f32.mrb[119].mxu1 }
 0x3ee   :  { %v2136_v4 = vadd.f32 %v7912_v16, %v2135_v6 }
 0x3ef   :  { %v2318_v10 = vpack.c.bf16 %v2144_v63, %v2141_v62 }
 0x3f0   :  { %v2317_v21 = vpack.c.bf16 %v2136_v4, %v2133_v7 }
 0x3f2   :  { %v6298_v12 = vpop.f32.mrb[120].mxu1  ;;  %6444 = vmatprep.mubr.msk.bf16.mxu1 %vm1921_vm3, %v2317_v21 }
 0x3f3   :  { %v2148_v13 = vpop.f32.mrb[121].mxu1  ;;  %6445 = vmatmul.mubr.msk.bf16.gmra.mrb[180].mxu1 %vm1921_vm3, %v2318_v10  ;;  %v2157_v14 = vadd.f32 %v6298_v12, %v7912_v16 }
 0x3f4   :  { %v6299_v19 = vpop.f32.mrb[122].mxu1  ;;  %v2149_v23 = vadd.f32 %v7912_v16, %v2148_v13 }
 0x3f5   :  { %v2160_v15 = vadd.f32 %v6299_v19, %v7912_v16  ;;  %v2151_v22 = vpop.f32.mrb[123].mxu1 }
 0x3f6   :  { %v2152_v26 = vadd.f32 %v7912_v16, %v2151_v22 }
 0x3f7   :  { %v2320_v0 = vpack.c.bf16 %v2160_v15, %v2157_v14 }
 0x3f8   :  { %v2319_v27 = vpack.c.bf16 %v2152_v26, %v2149_v23 }
 0x3fa   :  { %v6302_v28 = vpop.f32.mrb[124].mxu1  ;;  %6448 = vmatprep.mubr.msk.bf16.mxu1 %vm1921_vm3, %v2319_v27 }
 0x3fb   :  { %v2164_v29 = vpop.f32.mrb[125].mxu1  ;;  %6449 = vmatmul.mubr.msk.bf16.gmra.mrb[184].mxu1 %vm1921_vm3, %v2320_v0  ;;  %v2173_v31 = vadd.f32 %v6302_v28, %v7912_v16 }
 0x3fc   :  { %v6303_v30 = vpop.f32.mrb[126].mxu1  ;;  %v2165_v17 = vadd.f32 %v7912_v16, %v2164_v29 }
 0x3fd   :  { %v2176_v9 = vadd.f32 %v6303_v30, %v7912_v16  ;;  %v2167_v2 = vpop.f32.mrb[127].mxu1 }
 0x3fe   :  { %v2168_v11 = vadd.f32 %v7912_v16, %v2167_v2 }
 0x3ff   :  { %v2322_v53 = vpack.c.bf16 %v2176_v9, %v2173_v31 }
 0x400   :  { %v2321_v37 = vpack.c.bf16 %v2168_v11, %v2165_v17 }
 0x402   :  { %v6306_v5 = vpop.f32.mrb[128].mxu1  ;;  %6452 = vmatprep.mubr.msk.bf16.mxu1 %vm1921_vm3, %v2321_v37 }
 0x403   :  { %v8000_v3 = vadd.f32 %v6306_v5, %v7912_v16  ;;  %v2180_v42 = vpop.f32.mrb[129].mxu1  ;;  %6453 = vmatmul.mubr.msk.bf16.gmra.mrb[188].mxu1 %vm1921_vm3, %v2322_v53 }
 0x404   :  { %v8004_v18 = vadd.f32 %v7912_v16, %v2180_v42  ;;  %v6307_v43 = vpop.f32.mrb[130].mxu1 }
 0x405   :  { %v8007_v40 = vadd.f32 %v6307_v43, %v7912_v16  ;;  %v2183_v34 = vpop.f32.mrb[131].mxu1 }
 0x406   :  { %v8010_v45 = vadd.f32 %v7912_v16, %v2183_v34 }
 0x40a   :  { %v6310_v50 = vpop.f32.mrb[132].mxu1 }
 0x40b   :  { %v8017_v51 = vadd.f32 %v6310_v50, %v7912_v16  ;;  %v2196_v52 = vpop.f32.mrb[133].mxu1 }
 0x40c   :  { %v8020_v38 = vadd.f32 %v7912_v16, %v2196_v52  ;;  %v6311_v54 = vpop.f32.mrb[134].mxu1 }
 0x40d   :  { %9235 = vst [vmem:[#allocation9_spill] sm:$0xff] %v8017_v51  ;;  %v8023_v55 = vadd.f32 %v6311_v54, %v7912_v16  ;;  %v2199_v33 = vpop.f32.mrb[135].mxu1 }
 0x40e   :  { %v8026_v56 = vadd.f32 %v7912_v16, %v2199_v33 }
 0x412   :  { %v6314_v62 = vpop.f32.mrb[136].mxu1 }
 0x413   :  { %v8033_v63 = vadd.f32 %v6314_v62, %v7912_v16  ;;  %v2212_v6 = vpop.f32.mrb[137].mxu1 }
 0x414   :  { %v8036_v7 = vadd.f32 %v7912_v16, %v2212_v6  ;;  %v6315_v4 = vpop.f32.mrb[138].mxu1 }
 0x415   :  { %9236 = vst [vmem:[#allocation10_spill] sm:$0xff] %v8033_v63  ;;  %v8039_v10 = vadd.f32 %v6315_v4, %v7912_v16  ;;  %v2215_v21 = vpop.f32.mrb[139].mxu1 }
 0x416   :  { %9237 = vst [vmem:[#allocation11_spill] sm:$0xff] %v8036_v7  ;;  %v8042_v12 = vadd.f32 %v7912_v16, %v2215_v21 }
 0x417   :  { %9238 = vst [vmem:[#allocation12_spill] sm:$0xff] %v8039_v10 }
 0x418   :  { %9239 = vst [vmem:[#allocation13_spill] sm:$0xff] %v8042_v12 }
 0x41a   :  { %v6318_v14 = vpop.f32.mrb[140].mxu1 }
 0x41b   :  { %v8049_v15 = vadd.f32 %v6318_v14, %v7912_v16  ;;  %v2228_v22 = vpop.f32.mrb[141].mxu1 }
 0x41c   :  { %v8052_v23 = vadd.f32 %v7912_v16, %v2228_v22  ;;  %v6319_v26 = vpop.f32.mrb[142].mxu1 }
 0x41d   :  { %9240 = vst [vmem:[#allocation14_spill] sm:$0xff] %v8049_v15  ;;  %v8055_v0 = vadd.f32 %v6319_v26, %v7912_v16  ;;  %v2231_v27 = vpop.f32.mrb[143].mxu1 }
 0x41e   :  { %9241 = vst [vmem:[#allocation15_spill] sm:$0xff] %v8052_v23  ;;  %v8058_v28 = vadd.f32 %v7912_v16, %v2231_v27 }
 0x41f   :  { %9242 = vst [vmem:[#allocation16_spill] sm:$0xff] %v8055_v0 }
 0x420   :  { %9243 = vst [vmem:[#allocation17_spill] sm:$0xff] %v8058_v28 }
 0x422   :  { %v6322_v31 = vpop.f32.mrb[144].mxu1 }
 0x423   :  { %v8065_v9 = vadd.f32 %v6322_v31, %v7912_v16  ;;  %v2244_v2 = vpop.f32.mrb[145].mxu1 }
 0x424   :  { %v8068_v17 = vadd.f32 %v7912_v16, %v2244_v2  ;;  %v6323_v11 = vpop.f32.mrb[146].mxu1 }
 0x425   :  { %9244 = vst [vmem:[#allocation18_spill] sm:$0xff] %v8065_v9  ;;  %v8071_v53 = vadd.f32 %v6323_v11, %v7912_v16  ;;  %v2247_v37 = vpop.f32.mrb[147].mxu1 }
 0x426   :  { %9245 = vst [vmem:[#allocation19_spill] sm:$0xff] %v8068_v17  ;;  %v8074_v5 = vadd.f32 %v7912_v16, %v2247_v37 }
 0x427   :  { %9246 = vst [vmem:[#allocation20_spill] sm:$0xff] %v8071_v53 }
 0x428   :  { %9247 = vst [vmem:[#allocation21_spill] sm:$0xff] %v8074_v5 }
 0x42a   :  { %v6326_v34 = vpop.f32.mrb[148].mxu1 }
 0x42b   :  { %v8081_v50 = vadd.f32 %v6326_v34, %v7912_v16  ;;  %v2260_v52 = vpop.f32.mrb[149].mxu1 }
 0x42c   :  { %v8084_v54 = vadd.f32 %v7912_v16, %v2260_v52  ;;  %v6327_v33 = vpop.f32.mrb[150].mxu1 }
 0x42d   :  { %9248 = vst [vmem:[#allocation22_spill] sm:$0xff] %v8081_v50  ;;  %v8087_v62 = vadd.f32 %v6327_v33, %v7912_v16  ;;  %v2263_v6 = vpop.f32.mrb[151].mxu1 }
 0x42e   :  { %9249 = vst [vmem:[#allocation23_spill] sm:$0xff] %v8084_v54  ;;  %v8090_v4 = vadd.f32 %v7912_v16, %v2263_v6 }
 0x42f   :  { %9250 = vst [vmem:[#allocation24_spill] sm:$0xff] %v8087_v62 }
 0x430   :  { %9251 = vst [vmem:[#allocation25_spill] sm:$0xff] %v8090_v4 }
 0x432   :  { %v6330_v22 = vpop.f32.mrb[152].mxu1 }
 0x433   :  { %v8097_v26 = vadd.f32 %v6330_v22, %v7912_v16  ;;  %v2276_v27 = vpop.f32.mrb[153].mxu1 }
 0x434   :  { %v8100_v31 = vadd.f32 %v7912_v16, %v2276_v27  ;;  %v6331_v2 = vpop.f32.mrb[154].mxu1 }
 0x435   :  { %9252 = vst [vmem:[#allocation26_spill] sm:$0xff] %v8097_v26  ;;  %v8103_v11 = vadd.f32 %v6331_v2, %v7912_v16  ;;  %v2279_v37 = vpop.f32.mrb[155].mxu1 }
 0x436   :  { %9253 = vst [vmem:[#allocation27_spill] sm:$0xff] %v8100_v31  ;;  %v8106_v34 = vadd.f32 %v7912_v16, %v2279_v37 }
 0x437   :  { %9254 = vst [vmem:[#allocation28_spill] sm:$0xff] %v8103_v11 }
 0x438   :  { %9255 = vst [vmem:[#allocation29_spill] sm:$0xff] %v8106_v34 }
 0x43a   :  { %v6334_v6 = vpop.f32.mrb[156].mxu1 }
 0x43b   :  { %v8113_v22 = vadd.f32 %v6334_v6, %v7912_v16  ;;  %v2292_v27 = vpop.f32.mrb[157].mxu1 }
 0x43c   :  { %v8116_v21 = vadd.f32 %v7912_v16, %v2292_v27  ;;  %v6335_v2 = vpop.f32.mrb[158].mxu1 }
 0x43d   :  { %9256 = vst [vmem:[#allocation30_spill] sm:$0xff] %v8113_v22  ;;  %v8119_v14 = vadd.f32 %v6335_v2, %v7912_v16  ;;  %v2295_v37 = vpop.f32.mrb[159].mxu1 }
 0x43e   :  { %9257 = vst [vmem:[#allocation31_spill] sm:$0xff] %v8116_v21  ;;  %v8122_v42 = vadd.f32 %v7912_v16, %v2295_v37 }
 0x43f   :  { %9258 = vst [vmem:[#allocation32_spill] sm:$0xff] %v8119_v14 }
 0x440   :  { %9259 = vst [vmem:[#allocation33_spill] sm:$0xff] %v8122_v42 }
 0x49e   :  { %v6426_v6 = vpop.f32.mrb[160].mxu1 }
 0x49f   :  { %v8128_v43 = vmul.f32 0.17677669, %v6426_v6  ;;  %v2909_v29 = vpop.f32.mrb[161].mxu1 }
 0x4a0   :  { %v8130_v27 = vmul.f32 0.17677669, %v2909_v29  ;;  %v6427_v30 = vpop.f32.mrb[162].mxu1 }
 0x4a1   :  { %3072 = vmax.xlane.f32.xlu1 %v8128_v43  ;;  %v2912_v2 = vpop.f32.mrb[163].mxu1  ;;  %v8134_v16 = vmul.f32 0.17677669, %v6427_v30 }
 0x4a2   :  { %3068 = vmax.xlane.f32.xlu0 %v8130_v27  ;;  %v8136_v37 = vmul.f32 0.17677669, %v2912_v2 }
 0x4a5   :  { %3074 = vmax.xlane.f32.xlu1 %v8134_v16 }
 0x4a6   :  { %3070 = vmax.xlane.f32.xlu0 %v8136_v37  ;;  %v6430_v52 = vpop.f32.mrb[164].mxu1 }
 0x4a7   :  { %v2925_v6 = vpop.f32.mrb[165].mxu1  ;;  %v8145_v60 = vmul.f32 0.17677669, %v6430_v52 }
 0x4a8   :  { %v8140_v33 = vmul.f32 0.17677669, %v2925_v6  ;;  %v6431_v29 = vpop.f32.mrb[166].mxu1 }
 0x4a9   :  { %v2928_v13 = vpop.f32.mrb[167].mxu1  ;;  %v8148_v30 = vmul.f32 0.17677669, %v6431_v29 }
 0x4aa   :  { %v8142_v19 = vmul.f32 0.17677669, %v2928_v13  ;;  %3076 = vmax.xlane.f32.xlu0 %v8140_v33 }
 0x4ac   :  { %3078 = vmax.xlane.f32.xlu1 %v8142_v19 }
 0x4ae   :  { %3080 = vmax.xlane.f32.xlu0 %v8145_v60  ;;  %v6434_v2 = vpop.f32.mrb[168].mxu1 }
 0x4af   :  { %v2941_v61 = vpop.f32.mrb[169].mxu1  ;;  %v8157_v52 = vmul.f32 0.17677669, %v6434_v2 }
 0x4b0   :  { %v8151_v46 = vmul.f32 0.17677669, %v2941_v61  ;;  %3082 = vmax.xlane.f32.xlu1 %v8148_v30  ;;  %v6435_v6 = vpop.f32.mrb[170].mxu1 }
 0x4b1   :  { %v2944_v47 = vpop.f32.mrb[171].mxu1  ;;  %v8160_v29 = vmul.f32 0.17677669, %v6435_v6 }
 0x4b2   :  { %v8154_v13 = vmul.f32 0.17677669, %v2944_v47  ;;  %3084 = vmax.xlane.f32.xlu0 %v8151_v46 }
 0x4b4   :  { %3086 = vmax.xlane.f32.xlu1 %v8154_v13 }
 0x4b6   :  { %3088 = vmax.xlane.f32.xlu0 %v8157_v52  ;;  %v6438_v36 = vpop.f32.mrb[172].mxu1 }
 0x4b7   :  { %v2957_v44 = vpop.f32.mrb[173].mxu1  ;;  %v8169_v2 = vmul.f32 0.17677669, %v6438_v36 }
 0x4b8   :  { %v8163_v61 = vmul.f32 0.17677669, %v2957_v44  ;;  %3090 = vmax.xlane.f32.xlu1 %v8160_v29  ;;  %v6439_v8 = vpop.f32.mrb[174].mxu1 }
 0x4b9   :  { %v2960_v20 = vpop.f32.mrb[175].mxu1  ;;  %v8172_v6 = vmul.f32 0.17677669, %v6439_v8 }
 0x4ba   :  { %v8166_v47 = vmul.f32 0.17677669, %v2960_v20  ;;  %3092 = vmax.xlane.f32.xlu0 %v8163_v61 }
 0x4bc   :  { %3094 = vmax.xlane.f32.xlu1 %v8166_v47 }
 0x4be   :  { %3096 = vmax.xlane.f32.xlu0 %v8169_v2  ;;  %v6442_v49 = vpop.f32.mrb[176].mxu1 }
 0x4bf   :  { %v2973_v59 = vpop.f32.mrb[177].mxu1  ;;  %v8181_v36 = vmul.f32 0.17677669, %v6442_v49 }
 0x4c0   :  { %v8175_v44 = vmul.f32 0.17677669, %v2973_v59  ;;  %3098 = vmax.xlane.f32.xlu1 %v8172_v6  ;;  %v6443_v39 = vpop.f32.mrb[178].mxu1 }
 0x4c1   :  { %v2976_v22 = vpop.f32.mrb[179].mxu1  ;;  %v8184_v8 = vmul.f32 0.17677669, %v6443_v39 }
 0x4c2   :  { %v8178_v20 = vmul.f32 0.17677669, %v2976_v22  ;;  %3100 = vmax.xlane.f32.xlu0 %v8175_v44 }
 0x4c4   :  { %3102 = vmax.xlane.f32.xlu1 %v8178_v20 }
 0x4c6   :  { %3104 = vmax.xlane.f32.xlu0 %v8181_v36  ;;  %v6446_v14 = vpop.f32.mrb[180].mxu1 }
 0x4c7   :  { %v2989_v21 = vpop.f32.mrb[181].mxu1  ;;  %v8193_v49 = vmul.f32 0.17677669, %v6446_v14 }
 0x4c8   :  { %v8187_v59 = vmul.f32 0.17677669, %v2989_v21  ;;  %3106 = vmax.xlane.f32.xlu1 %v8184_v8  ;;  %v6447_v42 = vpop.f32.mrb[182].mxu1 }
 0x4c9   :  { %v2992_v26 = vpop.f32.mrb[183].mxu1  ;;  %v8196_v39 = vmul.f32 0.17677669, %v6447_v42 }
 0x4ca   :  { %v8190_v22 = vmul.f32 0.17677669, %v2992_v26  ;;  %3108 = vmax.xlane.f32.xlu0 %v8187_v59 }
 0x4cc   :  { %3110 = vmax.xlane.f32.xlu1 %v8190_v22 }
 0x4ce   :  { %3112 = vmax.xlane.f32.xlu0 %v8193_v49  ;;  %v6450_v11 = vpop.f32.mrb[184].mxu1 }
 0x4cf   :  { %v3005_v31 = vpop.f32.mrb[185].mxu1  ;;  %v8205_v14 = vmul.f32 0.17677669, %v6450_v11 }
 0x4d0   :  { %v8199_v21 = vmul.f32 0.17677669, %v3005_v31  ;;  %3114 = vmax.xlane.f32.xlu1 %v8196_v39  ;;  %v6451_v34 = vpop.f32.mrb[186].mxu1 }
 0x4d1   :  { %v3008_v50 = vpop.f32.mrb[187].mxu1  ;;  %v8208_v42 = vmul.f32 0.17677669, %v6451_v34 }
 0x4d2   :  { %v8202_v26 = vmul.f32 0.17677669, %v3008_v50  ;;  %3116 = vmax.xlane.f32.xlu0 %v8199_v21 }
 0x4d4   :  { %3118 = vmax.xlane.f32.xlu1 %v8202_v26 }
 0x4d6   :  { %3120 = vmax.xlane.f32.xlu0 %v8205_v14  ;;  %v6454_v62 = vpop.f32.mrb[188].mxu1 }
 0x4d7   :  { %v3021_v54 = vpop.f32.mrb[189].mxu1  ;;  %v8217_v11 = vmul.f32 0.17677669, %v6454_v62 }
 0x4d8   :  { %v8211_v31 = vmul.f32 0.17677669, %v3021_v54  ;;  %3122 = vmax.xlane.f32.xlu1 %v8208_v42  ;;  %v6455_v4 = vpop.f32.mrb[190].mxu1 }
 0x4d9   :  { %v3024_v9 = vpop.f32.mrb[191].mxu1  ;;  %v8220_v34 = vmul.f32 0.17677669, %v6455_v4 }
 0x4da   :  { %v8214_v50 = vmul.f32 0.17677669, %v3024_v9  ;;  %3124 = vmax.xlane.f32.xlu0 %v8211_v31 }
 0x4dc   :  { %3126 = vmax.xlane.f32.xlu1 %v8214_v50 }
 0x4de   :  { %3128 = vmax.xlane.f32.xlu0 %v8217_v11 }
 0x4e0   :  { %3130 = vmax.xlane.f32.xlu1 %v8220_v34 }
 0x52e   :  { %v3073_v54 = vpop.xlane.xlu1 %3072 }
 0x52f   :  { %v3134_v53 = vsub.f32 %v8128_v43, %v3073_v54  ;;  %v3069_v17 = vpop.xlane.xlu0 %3068 }
 0x530   :  { %v3132_v5 = vsub.f32 %v8130_v27, %v3069_v17 }
 0x531   :  { %v3168_v0 = vmul.f32 1.442695, %v3134_v53 }
 0x532   :  { %v3164_v9 = vmul.f32 1.442695, %v3132_v5  ;;  %v3075_v15 = vpop.xlane.xlu1 %3074 }
 0x533   :  { %v3135_v62 = vsub.f32 %v8134_v16, %v3075_v15  ;;  %v3071_v23 = vpop.xlane.xlu0 %3070 }
 0x534   :  { %6828 = vpow2.f32 %v3164_v9  ;;  %v3133_v4 = vsub.f32 %v8136_v37, %v3071_v23 }
 0x535   :  { %6830 = vpow2.f32 %v3168_v0  ;;  %v3170_v63 = vmul.f32 1.442695, %v3135_v62 }
 0x536   :  { %v3166_v28 = vmul.f32 1.442695, %v3133_v4 }
 0x537   :  { %v3077_v10 = vpop.xlane.xlu0 %3076 }
 0x538   :  { %6832 = vpow2.f32 %v3166_v28  ;;  %v3136_v7 = vsub.f32 %v8140_v33, %v3077_v10 }
 0x539   :  { %v3079_v43 = vpop.xlane.xlu1 %3078  ;;  %6834 = vpow2.f32 %v3170_v63 }
 0x53a   :  { %v3172_v54 = vmul.f32 1.442695, %v3136_v7  ;;  %v3137_v17 = vsub.f32 %v8142_v19, %v3079_v43 }
 0x53b   :  { %v3081_v5 = vpop.xlane.xlu0 %3080 }
 0x53c   :  { %6836 = vpow2.f32 %v3172_v54  ;;  %v3174_v53 = vmul.f32 1.442695, %v3137_v17  ;;  %v3138_v15 = vsub.f32 %v8145_v60, %v3081_v5 }
 0x53d   :  { %v3083_v27 = vpop.xlane.xlu1 %3082 }
 0x53e   :  { %v8231_v16 = vpop.eup %6828  ;;  %v3176_v23 = vmul.f32 1.442695, %v3138_v15  ;;  %v3139_v0 = vsub.f32 %v8148_v30, %v3083_v27  ;;  %6838 = vpow2.f32 %v3174_v53 }
 0x53f   :  { %v3085_v28 = vpop.xlane.xlu0 %3084  ;;  %3228 = vadd.xlane.f32.xlu0 %v8231_v16  ;;  %v8236_v63 = vpop.eup %6830 }
 0x540   :  { %6840 = vpow2.f32 %v3176_v23  ;;  %v3178_v7 = vmul.f32 1.442695, %v3139_v0  ;;  %v3140_v10 = vsub.f32 %v8151_v46, %v3085_v28 }
 0x541   :  { %v3087_v19 = vpop.xlane.xlu1 %3086 }
 0x542   :  { %v8238_v33 = vpop.eup %6832  ;;  %v3180_v60 = vmul.f32 1.442695, %v3140_v10  ;;  %v3141_v37 = vsub.f32 %v8154_v13, %v3087_v19  ;;  %6842 = vpow2.f32 %v3178_v7 }
 0x543   :  { %v3089_v9 = vpop.xlane.xlu0 %3088  ;;  %3232 = vadd.xlane.f32.xlu0 %v8236_v63  ;;  %3230 = vadd.xlane.f32.xlu1 %v8238_v33  ;;  %v8244_v4 = vpop.eup %6834 }
 0x544   :  { %6844 = vpow2.f32 %v3180_v60  ;;  %v3182_v30 = vmul.f32 1.442695, %v3141_v37  ;;  %v3142_v62 = vsub.f32 %v8157_v52, %v3089_v9 }
 0x545   :  { %v3091_v46 = vpop.xlane.xlu1 %3090 }
 0x546   :  { %v8246_v43 = vpop.eup %6836  ;;  %v3184_v54 = vmul.f32 1.442695, %v3142_v62  ;;  %v3143_v17 = vsub.f32 %v8160_v29, %v3091_v46  ;;  %6846 = vpow2.f32 %v3182_v30 }
 0x547   :  { %v3093_v13 = vpop.xlane.xlu0 %3092  ;;  %3236 = vadd.xlane.f32.xlu0 %v8246_v43  ;;  %3234 = vadd.xlane.f32.xlu1 %v8244_v4 }
 0x548   :  { %6848 = vpow2.f32 %v3184_v54  ;;  %v3186_v5 = vmul.f32 1.442695, %v3143_v17  ;;  %v3144_v53 = vsub.f32 %v8163_v61, %v3093_v13  ;;  %v8252_v15 = vpop.eup %6838 }
 0x549   :  { %v3095_v52 = vpop.xlane.xlu1 %3094 }
 0x54a   :  { %v8254_v27 = vpop.eup %6840  ;;  %v3188_v23 = vmul.f32 1.442695, %v3144_v53  ;;  %v3145_v0 = vsub.f32 %v8166_v47, %v3095_v52  ;;  %6850 = vpow2.f32 %v3186_v5 }
 0x54b   :  { %v3097_v29 = vpop.xlane.xlu0 %3096  ;;  %3240 = vadd.xlane.f32.xlu0 %v8254_v27  ;;  %3238 = vadd.xlane.f32.xlu1 %v8252_v15 }
 0x54c   :  { %6852 = vpow2.f32 %v3188_v23  ;;  %v3190_v28 = vmul.f32 1.442695, %v3145_v0  ;;  %v3146_v7 = vsub.f32 %v8169_v2, %v3097_v29  ;;  %v8260_v10 = vpop.eup %6842 }
 0x54d   :  { %v3099_v61 = vpop.xlane.xlu1 %3098 }
 0x54e   :  { %v8262_v19 = vpop.eup %6844  ;;  %v3192_v60 = vmul.f32 1.442695, %v3146_v7  ;;  %v3147_v37 = vsub.f32 %v8172_v6, %v3099_v61  ;;  %6854 = vpow2.f32 %v3190_v28 }
 0x54f   :  { %v3101_v47 = vpop.xlane.xlu0 %3100  ;;  %3244 = vadd.xlane.f32.xlu0 %v8262_v19  ;;  %3242 = vadd.xlane.f32.xlu1 %v8260_v10 }
 0x550   :  { %6856 = vpow2.f32 %v3192_v60  ;;  %v3194_v9 = vmul.f32 1.442695, %v3147_v37  ;;  %v3148_v30 = vsub.f32 %v8175_v44, %v3101_v47  ;;  %v8268_v62 = vpop.eup %6846 }
 0x551   :  { %v3103_v2 = vpop.xlane.xlu1 %3102 }
 0x552   :  { %v8270_v46 = vpop.eup %6848  ;;  %v3196_v54 = vmul.f32 1.442695, %v3148_v30  ;;  %v3149_v17 = vsub.f32 %v8178_v20, %v3103_v2  ;;  %6858 = vpow2.f32 %v3194_v9 }
 0x553   :  { %v3105_v6 = vpop.xlane.xlu0 %3104  ;;  %3248 = vadd.xlane.f32.xlu0 %v8270_v46  ;;  %3246 = vadd.xlane.f32.xlu1 %v8268_v62 }
 0x554   :  { %6860 = vpow2.f32 %v3196_v54  ;;  %v3198_v13 = vmul.f32 1.442695, %v3149_v17  ;;  %v3150_v5 = vsub.f32 %v8181_v36, %v3105_v6  ;;  %v8276_v53 = vpop.eup %6850 }
 0x555   :  { %v3107_v44 = vpop.xlane.xlu1 %3106 }
 0x556   :  { %v8278_v52 = vpop.eup %6852  ;;  %v3200_v23 = vmul.f32 1.442695, %v3150_v5  ;;  %v3151_v0 = vsub.f32 %v8184_v8, %v3107_v44  ;;  %6862 = vpow2.f32 %v3198_v13 }
 0x557   :  { %v3109_v20 = vpop.xlane.xlu0 %3108  ;;  %3252 = vadd.xlane.f32.xlu0 %v8278_v52  ;;  %3250 = vadd.xlane.f32.xlu1 %v8276_v53 }
 0x558   :  { %6864 = vpow2.f32 %v3200_v23  ;;  %v3202_v29 = vmul.f32 1.442695, %v3151_v0  ;;  %v3152_v28 = vsub.f32 %v8187_v59, %v3109_v20  ;;  %v8284_v7 = vpop.eup %6854  ;;  %v8310_v20 = vld [vmem:[%s9189_s14] sm:$0xff]  }
 0x559   :  { %v3111_v36 = vpop.xlane.xlu1 %3110  ;;  %6540 = vmatprep.subr.bf16.mxu0 %v8310_v20 }
 0x55a   :  { %v8286_v61 = vpop.eup %6856  ;;  %v3204_v60 = vmul.f32 1.442695, %v3152_v28  ;;  %v3153_v37 = vsub.f32 %v8190_v22, %v3111_v36  ;;  %6866 = vpow2.f32 %v3202_v29 }
 0x55b   :  { %v3113_v8 = vpop.xlane.xlu0 %3112  ;;  %3256 = vadd.xlane.f32.xlu0 %v8286_v61  ;;  %3254 = vadd.xlane.f32.xlu1 %v8284_v7 }
 0x55c   :  { %6868 = vpow2.f32 %v3204_v60  ;;  %v3206_v47 = vmul.f32 1.442695, %v3153_v37  ;;  %v3154_v9 = vsub.f32 %v8193_v49, %v3113_v8  ;;  %v8292_v30 = vpop.eup %6858 }
 0x55d   :  { %v3115_v59 = vpop.xlane.xlu1 %3114 }
 0x55e   :  { %v8294_v2 = vpop.eup %6860  ;;  %v3208_v54 = vmul.f32 1.442695, %v3154_v9  ;;  %v3155_v17 = vsub.f32 %v8196_v39, %v3115_v59  ;;  %6870 = vpow2.f32 %v3206_v47 }
 0x55f   :  { %v3117_v22 = vpop.xlane.xlu0 %3116  ;;  %3260 = vadd.xlane.f32.xlu0 %v8294_v2  ;;  %3258 = vadd.xlane.f32.xlu1 %v8292_v30 }
 0x560   :  { %6872 = vpow2.f32 %v3208_v54  ;;  %v3210_v6 = vmul.f32 1.442695, %v3155_v17  ;;  %v3156_v13 = vsub.f32 %v8199_v21, %v3117_v22  ;;  %v8300_v5 = vpop.eup %6862 }
 0x561   :  { %v3119_v49 = vpop.xlane.xlu1 %3118 }
 0x562   :  { %v8302_v44 = vpop.eup %6864  ;;  %v3212_v23 = vmul.f32 1.442695, %v3156_v13  ;;  %v3157_v0 = vsub.f32 %v8202_v26, %v3119_v49  ;;  %6874 = vpow2.f32 %v3210_v6 }
 0x563   :  { %v3121_v39 = vpop.xlane.xlu0 %3120  ;;  %3264 = vadd.xlane.f32.xlu0 %v8302_v44  ;;  %3262 = vadd.xlane.f32.xlu1 %v8300_v5 }
 0x564   :  { %6876 = vpow2.f32 %v3212_v23  ;;  %v3214_v21 = vmul.f32 1.442695, %v3157_v0  ;;  %v3158_v29 = vsub.f32 %v8205_v14, %v3121_v39  ;;  %v8313_v28 = vpop.eup %6866 }
 0x565   :  { %v3123_v36 = vpop.xlane.xlu1 %3122 }
 0x566   :  { %v8316_v26 = vpop.eup %6868  ;;  %v3216_v60 = vmul.f32 1.442695, %v3158_v29  ;;  %v3159_v37 = vsub.f32 %v8208_v42, %v3123_v36  ;;  %6878 = vpow2.f32 %v3214_v21 }
 0x567   :  { %3268 = vadd.xlane.f32.xlu0 %v8316_v26  ;;  %v3125_v8 = vpop.xlane.xlu0 %3124  ;;  %3266 = vadd.xlane.f32.xlu1 %v8313_v28 }
 0x568   :  { %6880 = vpow2.f32 %v3216_v60  ;;  %v3218_v47 = vmul.f32 1.442695, %v3159_v37  ;;  %v3160_v14 = vsub.f32 %v8211_v31, %v3125_v8  ;;  %v8322_v9 = vpop.eup %6870 }
 0x569   :  { %v3127_v59 = vpop.xlane.xlu1 %3126 }
 0x56a   :  { %v8324_v54 = vpop.eup %6872  ;;  %v3220_v17 = vmul.f32 1.442695, %v3160_v14  ;;  %v3161_v22 = vsub.f32 %v8214_v50, %v3127_v59  ;;  %6882 = vpow2.f32 %v3218_v47 }
 0x56b   :  { %3272 = vadd.xlane.f32.xlu0 %v8324_v54  ;;  %v3129_v42 = vpop.xlane.xlu0 %3128  ;;  %3270 = vadd.xlane.f32.xlu1 %v8322_v9 }
 0x56c   :  { %6884 = vpow2.f32 %v3220_v17  ;;  %v3222_v6 = vmul.f32 1.442695, %v3161_v22  ;;  %v3162_v13 = vsub.f32 %v8217_v11, %v3129_v42  ;;  %v8330_v49 = vpop.eup %6874 }
 0x56d   :  { %v3131_v31 = vpop.xlane.xlu1 %3130 }
 0x56e   :  { %v8332_v23 = vpop.eup %6876  ;;  %v3224_v0 = vmul.f32 1.442695, %v3162_v13  ;;  %v3163_v39 = vsub.f32 %v8220_v34, %v3131_v31  ;;  %6886 = vpow2.f32 %v3222_v6 }
 0x56f   :  { %3276 = vadd.xlane.f32.xlu0 %v8332_v23  ;;  %3274 = vadd.xlane.f32.xlu1 %v8330_v49 }
 0x570   :  { %6888 = vpow2.f32 %v3224_v0  ;;  %v3226_v50 = vmul.f32 1.442695, %v3163_v39  ;;  %v8337_v21 = vpop.eup %6878 }
 0x572   :  { %v8339_v29 = vpop.eup %6880  ;;  %6890 = vpow2.f32 %v3226_v50 }
 0x573   :  { %3280 = vadd.xlane.f32.xlu0 %v8339_v29  ;;  %3278 = vadd.xlane.f32.xlu1 %v8337_v21 }
 0x574   :  { %v8343_v11 = vpop.eup %6882 }
 0x576   :  { %v8345_v36 = vpop.eup %6884 }
 0x577   :  { %3284 = vadd.xlane.f32.xlu0 %v8345_v36  ;;  %3282 = vadd.xlane.f32.xlu1 %v8343_v11 }
 0x578   :  { %v8349_v34 = vpop.eup %6886 }
 0x57a   :  { %v8351_v60 = vpop.eup %6888 }
 0x57b   :  { %3288 = vadd.xlane.f32.xlu0 %v8351_v60  ;;  %3286 = vadd.xlane.f32.xlu1 %v8349_v34 }
 0x57c   :  { %v8355_v37 = vpop.eup %6890 }
 0x57f   :  { %3290 = vadd.xlane.f32.xlu1 %v8355_v37 }
 0x5cc   :  { %v3229_v8 = vpop.xlane.xlu0 %3228 }
 0x5cd   :  { %6892 = vrcp.f32 %v3229_v8 }
 0x5d0   :  { %v3233_v47 = vpop.xlane.xlu0 %3232  ;;  %v3231_v14 = vpop.xlane.xlu1 %3230 }
 0x5d1   :  { %6894 = vrcp.f32 %v3231_v14 }
 0x5d2   :  { %6896 = vrcp.f32 %v3233_v47 }
 0x5d4   :  { %v3237_v59 = vpop.xlane.xlu0 %3236  ;;  %v3235_v17 = vpop.xlane.xlu1 %3234 }
 0x5d5   :  { %6898 = vrcp.f32 %v3235_v17 }
 0x5d6   :  { %6900 = vrcp.f32 %v3237_v59 }
 0x5d7   :  { %v6893_v6 = vpop.eup %6892 }
 0x5d8   :  { %v3241_v22 = vpop.xlane.xlu0 %3240  ;;  %v3239_v42 = vpop.xlane.xlu1 %3238  ;;  %v3324_v39 = vmul.f32 %v6893_v6, %v8231_v16  ;;  %v6823_v16 = vld [vmem:[%s9189_s14 + $0x8] sm:$0xff]  }
 0x5d9   :  { %6902 = vrcp.f32 %v3239_v42 }
 0x5da   :  { %6904 = vrcp.f32 %v3241_v22 }
 0x5db   :  { %v6895_v13 = vpop.eup %6894 }
 0x5dc   :  { %v3245_v31 = vpop.xlane.xlu0 %3244  ;;  %v3243_v0 = vpop.xlane.xlu1 %3242  ;;  %v3325_v50 = vmul.f32 %v6895_v13, %v8238_v33 }
 0x5dd   :  { %v6897_v8 = vpop.eup %6896  ;;  %6906 = vrcp.f32 %v3243_v0 }
 0x5de   :  { %v3356_v14 = vpack.c.bf16 %v3325_v50, %v3324_v39  ;;  %6908 = vrcp.f32 %v3245_v31  ;;  %v3326_v59 = vmul.f32 %v6897_v8, %v8236_v63 }
 0x5df   :  { %v6899_v47 = vpop.eup %6898 }
 0x5e0   :  { %v3249_v12 = vpop.xlane.xlu0 %3248  ;;  %v3247_v17 = vpop.xlane.xlu1 %3246  ;;  %v3327_v51 = vmul.f32 %v6899_v47, %v8244_v4  ;;  %6472 = vmatprep.mubr.bf16.mxu0 %v3356_v14 }
 0x5e1   :  { %v6901_v42 = vpop.eup %6900  ;;  %6910 = vrcp.f32 %v3247_v17 }
 0x5e2   :  { %v3357_v22 = vpack.c.bf16 %v3327_v51, %v3326_v59  ;;  %6912 = vrcp.f32 %v3249_v12  ;;  %v3328_v31 = vmul.f32 %v6901_v42, %v8246_v43 }
 0x5e3   :  { %v6903_v33 = vpop.eup %6902 }
 0x5e4   :  { %v3253_v6 = vpop.xlane.xlu0 %3252  ;;  %v3251_v13 = vpop.xlane.xlu1 %3250  ;;  %6473 = vmatmul.mubr.bf16.vlgmr.msra.gmra.mrb[160].mxu0 %v3357_v22  ;;  %v3329_v0 = vmul.f32 %v6903_v33, %v8252_v15 }
 0x5e5   :  { %v6905_v63 = vpop.eup %6904  ;;  %6541 = vmatpush3.bf16.msra.mxu0 %v8310_v20  ;;  %6914 = vrcp.f32 %v3251_v13 }
 0x5e6   :  { %6542 = vmatprep.subr.bf16.mxu0 %v6823_v16  ;;  %v3358_v4 = vpack.c.bf16 %v3329_v0, %v3328_v31  ;;  %6916 = vrcp.f32 %v3253_v6  ;;  %v3330_v12 = vmul.f32 %v6905_v63, %v8254_v27 }
 0x5e7   :  { %v6907_v51 = vpop.eup %6906 }
 0x5e8   :  { %v3257_v39 = vpop.xlane.xlu0 %3256  ;;  %v3255_v50 = vpop.xlane.xlu1 %3254  ;;  %6476 = vmatprep.mubr.bf16.mxu0 %v3358_v4  ;;  %v3331_v8 = vmul.f32 %v6907_v51, %v8260_v10 }
 0x5e9   :  { %v6909_v14 = vpop.eup %6908  ;;  %6543 = vmatpush3.bf16.msra.mxu0 %v6823_v16  ;;  %6918 = vrcp.f32 %v3255_v50 }
 0x5ea   :  { %6624 = vmatprep.subr.bf16.mxu0 %v7927_v41  ;;  %v3359_v43 = vpack.c.bf16 %v3331_v8, %v3330_v12  ;;  %6920 = vrcp.f32 %v3257_v39  ;;  %v3332_v17 = vmul.f32 %v6909_v14, %v8262_v19 }
 0x5eb   :  { %v6911_v15 = vpop.eup %6910 }
 0x5ec   :  { %v3261_v20 = vpop.xlane.xlu0 %3260  ;;  %v3259_v47 = vpop.xlane.xlu1 %3258  ;;  %6477 = vmatmul.mubr.bf16.gmra.mrb[164].mxu0 %v3359_v43  ;;  %v3333_v59 = vmul.f32 %v6911_v15, %v8268_v62 }
 0x5ed   :  { %v6913_v42 = vpop.eup %6912  ;;  %6922 = vrcp.f32 %v3259_v47 }
 0x5ee   :  { %v3360_v27 = vpack.c.bf16 %v3333_v59, %v3332_v17  ;;  %6924 = vrcp.f32 %v3261_v20  ;;  %v3334_v33 = vmul.f32 %v6913_v42, %v8270_v46 }
 0x5ef   :  { %v6915_v22 = vpop.eup %6914 }
 0x5f0   :  { %v3265_v10 = vpop.xlane.xlu0 %3264  ;;  %v3263_v16 = vpop.xlane.xlu1 %3262  ;;  %6480 = vmatprep.mubr.bf16.mxu0 %v3360_v27  ;;  %v3335_v6 = vmul.f32 %v6915_v22, %v8276_v53 }
 0x5f1   :  { %v6917_v13 = vpop.eup %6916  ;;  %6926 = vrcp.f32 %v3263_v16 }
 0x5f2   :  { %v3361_v31 = vpack.c.bf16 %v3335_v6, %v3334_v33  ;;  %6928 = vrcp.f32 %v3265_v10  ;;  %v3336_v62 = vmul.f32 %v6917_v13, %v8278_v52 }
 0x5f3   :  { %v6919_v0 = vpop.eup %6918 }
 0x5f4   :  { %v3269_v19 = vpop.xlane.xlu0 %3268  ;;  %v3267_v63 = vpop.xlane.xlu1 %3266  ;;  %6481 = vmatmul.mubr.bf16.gmra.mrb[168].mxu0 %v3361_v31  ;;  %v3337_v4 = vmul.f32 %v6919_v0, %v8284_v7 }
 0x5f5   :  { %v6921_v51 = vpop.eup %6920  ;;  %6930 = vrcp.f32 %v3267_v63 }
 0x5f6   :  { %v3362_v39 = vpack.c.bf16 %v3337_v4, %v3336_v62  ;;  %6932 = vrcp.f32 %v3269_v19  ;;  %v3338_v53 = vmul.f32 %v6921_v51, %v8286_v61 }
 0x5f7   :  { %v6923_v50 = vpop.eup %6922 }
 0x5f8   :  { %v3273_v46 = vpop.xlane.xlu0 %3272  ;;  %v3271_v12 = vpop.xlane.xlu1 %3270  ;;  %6484 = vmatprep.mubr.bf16.mxu0 %v3362_v39  ;;  %v3339_v8 = vmul.f32 %v6923_v50, %v8292_v30 }
 0x5f9   :  { %v6925_v14 = vpop.eup %6924  ;;  %6934 = vrcp.f32 %v3271_v12 }
 0x5fa   :  { %v3363_v43 = vpack.c.bf16 %v3339_v8, %v3338_v53  ;;  %6936 = vrcp.f32 %v3273_v46  ;;  %v3340_v7 = vmul.f32 %v6925_v14, %v8294_v2 }
 0x5fb   :  { %v6927_v15 = vpop.eup %6926 }
 0x5fc   :  { %v3277_v52 = vpop.xlane.xlu0 %3276  ;;  %v3275_v20 = vpop.xlane.xlu1 %3274  ;;  %6485 = vmatmul.mubr.bf16.gmra.mrb[172].mxu0 %v3363_v43  ;;  %v3341_v47 = vmul.f32 %v6927_v15, %v8300_v5 }
 0x5fd   :  { %v6929_v17 = vpop.eup %6928  ;;  %6938 = vrcp.f32 %v3275_v20 }
 0x5fe   :  { %v3364_v59 = vpack.c.bf16 %v3341_v47, %v3340_v7  ;;  %6940 = vrcp.f32 %v3277_v52  ;;  %v3342_v30 = vmul.f32 %v6929_v17, %v8302_v44 }
 0x5ff   :  { %v6931_v42 = vpop.eup %6930 }
 0x600   :  { %v3281_v61 = vpop.xlane.xlu0 %3280  ;;  %v3279_v27 = vpop.xlane.xlu1 %3278  ;;  %6488 = vmatprep.mubr.bf16.mxu0 %v3364_v59  ;;  %v3343_v22 = vmul.f32 %v6931_v42, %v8313_v28 }
 0x601   :  { %v6933_v10 = vpop.eup %6932  ;;  %6942 = vrcp.f32 %v3279_v27 }
 0x602   :  { %v3365_v16 = vpack.c.bf16 %v3343_v22, %v3342_v30  ;;  %6944 = vrcp.f32 %v3281_v61  ;;  %v3344_v5 = vmul.f32 %v6933_v10, %v8316_v26 }
 0x603   :  { %v6935_v33 = vpop.eup %6934 }
 0x604   :  { %v3285_v2 = vpop.xlane.xlu0 %3284  ;;  %v3283_v6 = vpop.xlane.xlu1 %3282  ;;  %6489 = vmatmul.mubr.bf16.gmra.mrb[176].mxu0 %v3365_v16  ;;  %v3345_v13 = vmul.f32 %v6935_v33, %v8322_v9  ;;  %v4145_v16 = vsel %vm1921_vm3, %v7847_v57, 0 }
 0x605   :  { %v6937_v31 = vpop.eup %6936  ;;  %6946 = vrcp.f32 %v3283_v6 }
 0x606   :  { %v3366_v0 = vpack.c.bf16 %v3345_v13, %v3344_v5  ;;  %6948 = vrcp.f32 %v3285_v2  ;;  %v3346_v28 = vmul.f32 %v6937_v31, %v8324_v54  ;;  %v4148_v31 = vsel %vm1921_vm3, %v7859_v1, 0 }
 0x607   :  { %v6939_v19 = vpop.eup %6938 }
 0x608   :  { %v3289_v44 = vpop.xlane.xlu0 %3288  ;;  %v3287_v63 = vpop.xlane.xlu1 %3286  ;;  %6492 = vmatprep.mubr.bf16.mxu0 %v3366_v0  ;;  %v3347_v62 = vmul.f32 %v6939_v19, %v8330_v49 }
 0x609   :  { %v6941_v4 = vpop.eup %6940  ;;  %6950 = vrcp.f32 %v3287_v63 }
 0x60a   :  { %6952 = vrcp.f32 %v3289_v44  ;;  %v3367_v51 = vpack.c.bf16 %v3347_v62, %v3346_v28  ;;  %v3348_v9 = vmul.f32 %v6941_v4, %v8332_v23  ;;  %v4151_v62 = vsel %vm1921_vm3, %v7857_v48, 0 }
 0x60b   :  { %v6943_v39 = vpop.eup %6942 }
 0x60c   :  { %v3291_v26 = vpop.xlane.xlu1 %3290  ;;  %6493 = vmatmul.mubr.bf16.gmra.mrb[180].mxu0 %v3367_v51  ;;  %v3349_v50 = vmul.f32 %v6943_v39, %v8337_v21  ;;  %v6945_v46 = vpop.eup %6944 }
 0x60d   :  { %6954 = vrcp.f32 %v3291_v26  ;;  %v3350_v54 = vmul.f32 %v6945_v46, %v8339_v29 }
 0x60e   :  { %v3368_v12 = vpack.c.bf16 %v3349_v50, %v3348_v9  ;;  %v4154_v50 = vsel %vm1921_vm3, %v7869_v25, 0 }
 0x60f   :  { %v6947_v53 = vpop.eup %6946 }
 0x610   :  { %6496 = vmatprep.mubr.bf16.mxu0 %v3368_v12  ;;  %v3351_v49 = vmul.f32 %v6947_v53, %v8343_v11  ;;  %v6949_v8 = vpop.eup %6948 }
 0x611   :  { %v3352_v52 = vmul.f32 %v6949_v8, %v8345_v36  ;;  %v4142_v36 = vsel %vm1921_vm3, %v7849_v58, 0  ;;  %v4157_v8 = vsel %vm1921_vm3, %v7867_v24, 0 }
 0x612   :  { %v3369_v14 = vpack.c.bf16 %v3351_v49, %v3350_v54 }
 0x613   :  { %v6951_v43 = vpop.eup %6950 }
 0x614   :  { %v6953_v15 = vpop.eup %6952  ;;  %6497 = vmatmul.mubr.bf16.gmra.mrb[184].mxu0 %v3369_v14  ;;  %v3353_v20 = vmul.f32 %v6951_v43, %v8349_v34 }
 0x615   :  { %v3354_v21 = vmul.f32 %v6953_v15, %v8351_v60 }
 0x616   :  { %v3370_v7 = vpack.c.bf16 %v3353_v20, %v3352_v52 }
 0x617   :  { %v6955_v23 = vpop.eup %6954 }
 0x618   :  { %v3355_v47 = vmul.f32 %v6955_v23, %v8355_v37  ;;  %6500 = vmatprep.mubr.bf16.mxu0 %v3370_v7  ;;  %v4160_v23 = vsel %vm1921_vm3, %v7879_v35, 0 }
 0x61a   :  { %v3371_v17 = vpack.c.bf16 %v3355_v47, %v3354_v21 }
 0x61c   :  { %6501 = vmatmul.mubr.bf16.gmra.mrb[188].mxu0 %v3371_v17 }
 0x6b7   :  { %v6474_v29 = vpop.f32.mrb[160].mxu0 }
 0x6b8   :  { %v3406_v11 = vpop.f32.mrb[161].mxu0 }
 0x6b9   :  { %v6475_v59 = vpop.f32.mrb[162].mxu0 }
 0x6ba   :  { %v3534_v42 = vpack.c.bf16 %v6475_v59, %v6474_v29  ;;  %v3409_v61 = vpop.f32.mrb[163].mxu0  ;;  %v9261_v59 = vpack.c.bf16 %v8007_v40, %v8000_v3  ;;  %v9271_v40 = vld [vmem:[#allocation17_spill] sm:$0xff] }
 0x6bb   :  { %v3533_v27 = vpack.c.bf16 %v3409_v61, %v3406_v11  ;;  %v4163_v11 = vsel %vm1921_vm3, %v7877_v32, 0  ;;  %v9263_v61 = vld [vmem:[#allocation9_spill] sm:$0xff] }
 0x6bd   :  { %6508 = vmatprep.mubr.msk.bf16.mxu1 %vm1921_vm3, %v3533_v27  ;;  %v9264_v27 = vpack.c.bf16 %v8023_v55, %v9263_v61  ;;  %v9301_v61 = vld [vmem:[#allocation2_spill] sm:$0xff] }
 0x6be   :  { %6509 = vmatmul.mubr.msk.bf16.vlgmr.msra.gmra.mrb[192].mxu1 %vm1921_vm3, %v3534_v42  ;;  %v9262_v42 = vpack.c.bf16 %v8026_v56, %v8020_v38  ;;  %v9274_v56 = vld [vmem:[#allocation16_spill] sm:$0xff] }
 0x6bf   :  { %6577 = vmatpush3.bf16.xpose.msra.mxu1 %v4142_v36  ;;  %v6478_v34 = vpop.f32.mrb[164].mxu0  ;;  %v9266_v36 = vld [vmem:[#allocation11_spill] sm:$0xff] }
 0x6c0   :  { %6755 = vmatprep.subr.msk.bf16.mxu1 %vm1921_vm3, %v7847_v57  ;;  %v3422_v60 = vpop.f32.mrb[165].mxu0 }
 0x6c1   :  { %v6479_v37 = vpop.f32.mrb[166].mxu0 }
 0x6c2   :  { %v3536_v30 = vpack.c.bf16 %v6479_v37, %v6478_v34  ;;  %v3425_v22 = vpop.f32.mrb[167].mxu0  ;;  %v9269_v34 = vld [vmem:[#allocation10_spill] sm:$0xff] }
 0x6c3   :  { %v3535_v10 = vpack.c.bf16 %v3425_v22, %v3422_v60  ;;  %v9272_v60 = vld [vmem:[#allocation15_spill] sm:$0xff]  ;;  %v9275_v37 = vld [vmem:[#allocation14_spill] sm:$0xff] }
 0x6c4   :  { %v9273_v38 = vpack.c.bf16 %v9271_v40, %v9272_v60  ;;  %v9276_v55 = vpack.c.bf16 %v9274_v56, %v9275_v37  ;;  %v9278_v22 = vld [vmem:[#allocation19_spill] sm:$0xff] }
 0x6c5   :  { %6512 = vmatprep.mubr.msk.bf16.mxu1 %vm1921_vm3, %v3535_v10 }
 0x6c6   :  { %6513 = vmatmul.mubr.msk.bf16.gmra.mrb[196].mxu1 %vm1921_vm3, %v3536_v30  ;;  %v9277_v30 = vld [vmem:[#allocation21_spill] sm:$0xff] }
 0x6c7   :  { %6579 = vmatpush3.bf16.xpose.msra.mxu1 %v4145_v16  ;;  %v6482_v33 = vpop.f32.mrb[168].mxu0  ;;  %v9279_v10 = vpack.c.bf16 %v9277_v30, %v9278_v22  ;;  %v9280_v16 = vld [vmem:[#allocation20_spill] sm:$0xff]  ;;  %v9303_v22 = vld [vmem:[#allocation3_spill] sm:$0xff] }
 0x6c8   :  { %6756 = vmatprep.subr.msk.bf16.mxu1 %vm1921_vm3, %v7859_v1  ;;  %v3438_v58 = vpop.f32.mrb[169].mxu0 }
 0x6c9   :  { %v6483_v2 = vpop.f32.mrb[170].mxu0 }
 0x6ca   :  { %v3538_v6 = vpack.c.bf16 %v6483_v2, %v6482_v33  ;;  %v3441_v5 = vpop.f32.mrb[171].mxu0  ;;  %v9281_v33 = vld [vmem:[#allocation18_spill] sm:$0xff]  ;;  %v9283_v2 = vld [vmem:[#allocation25_spill] sm:$0xff] }
 0x6cb   :  { %v3537_v13 = vpack.c.bf16 %v3441_v5, %v3438_v58  ;;  %v9282_v58 = vpack.c.bf16 %v9280_v16, %v9281_v33 }
 0x6cd   :  { %6516 = vmatprep.mubr.msk.bf16.mxu1 %vm1921_vm3, %v3537_v13  ;;  %v9286_v13 = vld [vmem:[#allocation24_spill] sm:$0xff] }
 0x6ce   :  { %6517 = vmatmul.mubr.msk.bf16.gmra.mrb[200].mxu1 %vm1921_vm3, %v3538_v6  ;;  %v9284_v6 = vld [vmem:[#allocation23_spill] sm:$0xff] }
 0x6cf   :  { %6581 = vmatpush3.bf16.xpose.msra.mxu1 %v4148_v31  ;;  %v6486_v0 = vpop.f32.mrb[172].mxu0  ;;  %v9285_v5 = vpack.c.bf16 %v9283_v2, %v9284_v6  ;;  %v9287_v31 = vld [vmem:[#allocation22_spill] sm:$0xff] }
 0x6d0   :  { %6757 = vmatprep.subr.msk.bf16.mxu1 %vm1921_vm3, %v7857_v48  ;;  %v3454_v57 = vpop.f32.mrb[173].mxu0 }
 0x6d1   :  { %v6487_v19 = vpop.f32.mrb[174].mxu0 }
 0x6d2   :  { %v3540_v44 = vpack.c.bf16 %v6487_v19, %v6486_v0  ;;  %v3457_v63 = vpop.f32.mrb[175].mxu0  ;;  %v9288_v0 = vpack.c.bf16 %v9286_v13, %v9287_v31  ;;  %v9290_v19 = vld [vmem:[#allocation27_spill] sm:$0xff] }
 0x6d3   :  { %v3539_v28 = vpack.c.bf16 %v3457_v63, %v3454_v57  ;;  %v9289_v57 = vld [vmem:[#allocation29_spill] sm:$0xff]  ;;  %v9292_v63 = vld [vmem:[#allocation28_spill] sm:$0xff] }
 0x6d5   :  { %6520 = vmatprep.mubr.msk.bf16.mxu1 %vm1921_vm3, %v3539_v28  ;;  %v9293_v28 = vld [vmem:[#allocation26_spill] sm:$0xff] }
 0x6d6   :  { %6521 = vmatmul.mubr.msk.bf16.gmra.mrb[204].mxu1 %vm1921_vm3, %v3540_v44  ;;  %v9291_v44 = vpack.c.bf16 %v9289_v57, %v9290_v19 }
 0x6d7   :  { %6583 = vmatpush3.bf16.xpose.msra.mxu1 %v4151_v62  ;;  %v6490_v4 = vpop.f32.mrb[176].mxu0  ;;  %v9294_v62 = vpack.c.bf16 %v9292_v63, %v9293_v28 }
 0x6d8   :  { %6758 = vmatprep.subr.msk.bf16.mxu1 %vm1921_vm3, %v7869_v25  ;;  %v3470_v1 = vpop.f32.mrb[177].mxu0 }
 0x6d9   :  { %v6491_v51 = vpop.f32.mrb[178].mxu0 }
 0x6da   :  { %v3542_v39 = vpack.c.bf16 %v6491_v51, %v6490_v4  ;;  %v3473_v26 = vpop.f32.mrb[179].mxu0  ;;  %v9295_v4 = vld [vmem:[#allocation33_spill] sm:$0xff] }
 0x6db   :  { %v3541_v9 = vpack.c.bf16 %v3473_v26, %v3470_v1  ;;  %v9296_v1 = vld [vmem:[#allocation31_spill] sm:$0xff]  ;;  %v9299_v26 = vld [vmem:[#allocation30_spill] sm:$0xff] }
 0x6dc   :  { %v9297_v51 = vpack.c.bf16 %v9295_v4, %v9296_v1 }
 0x6dd   :  { %6524 = vmatprep.mubr.msk.bf16.mxu1 %vm1921_vm3, %v3541_v9 }
 0x6de   :  { %6525 = vmatmul.mubr.msk.bf16.gmra.mrb[208].mxu1 %vm1921_vm3, %v3542_v39  ;;  %v9298_v39 = vld [vmem:[#allocation32_spill] sm:$0xff] }
 0x6df   :  { %6585 = vmatpush3.bf16.xpose.msra.mxu1 %v4154_v50  ;;  %v6494_v46 = vpop.f32.mrb[180].mxu0  ;;  %v9300_v9 = vpack.c.bf16 %v9298_v39, %v9299_v26  ;;  %v8508_v50 = vld [vmem:[%s9190_s13] ss:$0 sm:$0xff] }
 0x6e0   :  { %6759 = vmatprep.subr.msk.bf16.mxu1 %vm1921_vm3, %v7867_v24  ;;  %v3486_v48 = vpop.f32.mrb[181].mxu0 }
 0x6e1   :  { %v6495_v12 = vpop.f32.mrb[182].mxu0 }
 0x6e2   :  { %v3544_v53 = vpack.c.bf16 %v6495_v12, %v6494_v46  ;;  %v3489_v54 = vpop.f32.mrb[183].mxu0 }
 0x6e3   :  { %v3543_v49 = vpack.c.bf16 %v3489_v54, %v3486_v48 }
 0x6e5   :  { %6528 = vmatprep.mubr.msk.bf16.mxu1 %vm1921_vm3, %v3543_v49 }
 0x6e6   :  { %6529 = vmatmul.mubr.msk.bf16.gmra.mrb[212].mxu1 %vm1921_vm3, %v3544_v53 }
 0x6e7   :  { %6587 = vmatpush3.bf16.xpose.msra.mxu1 %v4157_v8  ;;  %v6498_v14 = vpop.f32.mrb[184].mxu0 }
 0x6e8   :  { %6760 = vmatprep.subr.msk.bf16.mxu1 %vm1921_vm3, %v7879_v35  ;;  %v3502_v25 = vpop.f32.mrb[185].mxu0  ;;  %v9260_v35 = vpack.c.bf16 %v8010_v45, %v8004_v18  ;;  %v9268_v45 = vld [vmem:[#allocation12_spill] sm:$0xff] }
 0x6e9   :  { %v6499_v43 = vpop.f32.mrb[186].mxu0  ;;  %v9270_v3 = vpack.c.bf16 %v9268_v45, %v9269_v34 }
 0x6ea   :  { %v3546_v15 = vpack.c.bf16 %v6499_v43, %v6498_v14  ;;  %v3505_v52 = vpop.f32.mrb[187].mxu0 }
 0x6eb   :  { %v3545_v20 = vpack.c.bf16 %v3505_v52, %v3502_v25 }
 0x6ed   :  { %6532 = vmatprep.mubr.msk.bf16.mxu1 %vm1921_vm3, %v3545_v20 }
 0x6ee   :  { %6533 = vmatmul.mubr.msk.bf16.gmra.mrb[216].mxu1 %vm1921_vm3, %v3546_v15 }
 0x6ef   :  { %6589 = vmatpush3.bf16.xpose.msra.mxu1 %v4160_v23  ;;  %v6502_v7 = vpop.f32.mrb[188].mxu0 }
 0x6f0   :  { %6761 = vmatprep.subr.msk.bf16.mxu1 %vm1921_vm3, %v7877_v32  ;;  %v3518_v24 = vpop.f32.mrb[189].mxu0  ;;  %v9265_v32 = vld [vmem:[#allocation13_spill] sm:$0xff] }
 0x6f1   :  { %v6503_v21 = vpop.f32.mrb[190].mxu0  ;;  %v9267_v18 = vpack.c.bf16 %v9265_v32, %v9266_v36 }
 0x6f2   :  { %v3548_v47 = vpack.c.bf16 %v6503_v21, %v6502_v7  ;;  %v3521_v17 = vpop.f32.mrb[191].mxu0 }
 0x6f3   :  { %v3547_v29 = vpack.c.bf16 %v3521_v17, %v3518_v24 }
 0x6f5   :  { %6536 = vmatprep.mubr.msk.bf16.mxu1 %vm1921_vm3, %v3547_v29 }
 0x6f6   :  { %6537 = vmatmul.mubr.msk.bf16.gmra.mrb[220].mxu1 %vm1921_vm3, %v3548_v47 }
 0x6f7   :  { %6591 = vmatpush3.bf16.xpose.msra.mxu1 %v4163_v11  ;;  %6592 = vmatprep.mubr.msk.bf16.mxu1 %vm1921_vm3, %v9260_v35 }
 0x6fe   :  { %6593 = vmatmul.mubr.msk.bf16.vlgmr.msra.gmra.mrb[224].mxu1 %vm1921_vm3, %v9261_v59 }
 0x6ff   :  { %6596 = vmatprep.mubr.msk.bf16.mxu1 %vm1921_vm3, %v9262_v42 }
 0x706   :  { %6597 = vmatmul.mubr.msk.bf16.gmra.mrb[228].mxu1 %vm1921_vm3, %v9264_v27 }
 0x707   :  { %6600 = vmatprep.mubr.msk.bf16.mxu1 %vm1921_vm3, %v9267_v18 }
 0x70e   :  { %6601 = vmatmul.mubr.msk.bf16.gmra.mrb[232].mxu1 %vm1921_vm3, %v9270_v3  ;;  %v9302_v3 = vld [vmem:[#allocation4_spill] sm:$0xff] }
 0x70f   :  { %6604 = vmatprep.mubr.msk.bf16.mxu1 %vm1921_vm3, %v9273_v38 }
 0x716   :  { %6605 = vmatmul.mubr.msk.bf16.gmra.mrb[236].mxu1 %vm1921_vm3, %v9276_v55 }
 0x717   :  { %6608 = vmatprep.mubr.msk.bf16.mxu1 %vm1921_vm3, %v9279_v10 }
 0x71e   :  { %6609 = vmatmul.mubr.msk.bf16.gmra.mrb[240].mxu1 %vm1921_vm3, %v9282_v58 }
 0x71f   :  { %6612 = vmatprep.mubr.msk.bf16.mxu1 %vm1921_vm3, %v9285_v5  ;;  %v9304_v5 = vld [vmem:[#allocation6_spill] sm:$0xff] }
 0x726   :  { %6613 = vmatmul.mubr.msk.bf16.gmra.mrb[244].mxu1 %vm1921_vm3, %v9288_v0 }
 0x727   :  { %6616 = vmatprep.mubr.msk.bf16.mxu1 %vm1921_vm3, %v9291_v44 }
 0x72e   :  { %6617 = vmatmul.mubr.msk.bf16.gmra.mrb[248].mxu1 %vm1921_vm3, %v9294_v62  ;;  %v9305_v62 = vld [vmem:[#allocation5_spill] sm:$0xff] }
 0x72f   :  { %6620 = vmatprep.mubr.msk.bf16.mxu1 %vm1921_vm3, %v9297_v51 }
 0x736   :  { %6621 = vmatmul.mubr.msk.bf16.gmra.mrb[252].mxu1 %vm1921_vm3, %v9300_v9 }
 0x791   :  { %v6510_v46 = vpop.f32.mrb[192].mxu1 }
 0x792   :  { %v3663_v48 = vadd.f32 %v6510_v46, %v8508_v50  ;;  %v3654_v12 = vpop.f32.mrb[193].mxu1  ;;  %v9306_v46 = vld [vmem:[#allocation8_spill] sm:$0xff] }
 0x793   :  { %v3655_v53 = vadd.f32 %v8508_v50, %v3654_v12  ;;  %v6511_v54 = vpop.f32.mrb[194].mxu1 }
 0x794   :  { %v3666_v49 = vadd.f32 %v6511_v54, %v8508_v50  ;;  %v3657_v8 = vpop.f32.mrb[195].mxu1  ;;  %v3783_v25 = vmax.f32 %v3663_v48, 0.0 }
 0x795   :  { %v3658_v14 = vadd.f32 %v8508_v50, %v3657_v8  ;;  %v3781_v15 = vmax.f32 %v3655_v53, 0.0 }
 0x796   :  { %v3784_v43 = vmax.f32 %v3666_v49, 0.0 }
 0x797   :  { %v3782_v52 = vmax.f32 %v3658_v14, 0.0 }
 0x798   :  { %v3814_v20 = vpack.c.bf16 %v3784_v43, %v3783_v25  ;;  %v9307_v43 = vld [vmem:[#allocation7_spill] sm:$0xff] }
 0x799   :  { %v3813_v23 = vpack.c.bf16 %v3782_v52, %v3781_v15  ;;  %v6514_v7 = vpop.f32.mrb[196].mxu1 }
 0x79a   :  { %v3679_v24 = vadd.f32 %v6514_v7, %v8508_v50  ;;  %v3670_v21 = vpop.f32.mrb[197].mxu1 }
 0x79b   :  { %v3671_v47 = vadd.f32 %v8508_v50, %v3670_v21  ;;  %v6515_v17 = vpop.f32.mrb[198].mxu1  ;;  %6544 = vmatprep.mubr.msk.bf16.mxu0 %vm1921_vm3, %v3813_v23 }
 0x79c   :  { %v3682_v29 = vadd.f32 %v6515_v17, %v8508_v50  ;;  %v3673_v11 = vpop.f32.mrb[199].mxu1  ;;  %6545 = vmatmul.mubr.msk.bf16.vlgmr.msra.gmra.mrb[192].mxu0 %vm1921_vm3, %v3814_v20  ;;  %v3787_v59 = vmax.f32 %v3679_v24, 0.0 }
 0x79d   :  { %v3674_v35 = vadd.f32 %v8508_v50, %v3673_v11  ;;  %6625 = vmatpush3.bf16.msra.mxu0 %v7927_v41  ;;  %v3785_v27 = vmax.f32 %v3671_v47, 0.0 }
 0x79e   :  { %v3788_v42 = vmax.f32 %v3682_v29, 0.0  ;;  %6626 = vmatprep.subr.bf16.mxu0 %v9301_v61 }
 0x79f   :  { %v3786_v32 = vmax.f32 %v3674_v35, 0.0 }
 0x7a0   :  { %v3816_v36 = vpack.c.bf16 %v3788_v42, %v3787_v59 }
 0x7a1   :  { %v3815_v18 = vpack.c.bf16 %v3786_v32, %v3785_v27  ;;  %6627 = vmatpush3.bf16.msra.mxu0 %v9301_v61  ;;  %v6518_v45 = vpop.f32.mrb[200].mxu1 }
 0x7a2   :  { %v3695_v34 = vadd.f32 %v6518_v45, %v8508_v50  ;;  %6628 = vmatprep.subr.bf16.mxu0 %v9302_v3  ;;  %v3686_v40 = vpop.f32.mrb[201].mxu1 }
 0x7a3   :  { %v3687_v60 = vadd.f32 %v8508_v50, %v3686_v40  ;;  %v6519_v38 = vpop.f32.mrb[202].mxu1  ;;  %6548 = vmatprep.mubr.msk.bf16.mxu0 %vm1921_vm3, %v3815_v18 }
 0x7a4   :  { %v3698_v41 = vadd.f32 %v6519_v38, %v8508_v50  ;;  %v3689_v56 = vpop.f32.mrb[203].mxu1  ;;  %6549 = vmatmul.mubr.msk.bf16.gmra.mrb[196].mxu0 %vm1921_vm3, %v3816_v36  ;;  %v3791_v55 = vmax.f32 %v3695_v34, 0.0 }
 0x7a5   :  { %v3690_v37 = vadd.f32 %v8508_v50, %v3689_v56  ;;  %6629 = vmatpush3.bf16.msra.mxu0 %v9302_v3  ;;  %v3789_v10 = vmax.f32 %v3687_v60, 0.0 }
 0x7a6   :  { %v3792_v30 = vmax.f32 %v3698_v41, 0.0  ;;  %6630 = vmatprep.subr.bf16.mxu0 %v9303_v22 }
 0x7a7   :  { %v3790_v16 = vmax.f32 %v3690_v37, 0.0 }
 0x7a8   :  { %v3818_v33 = vpack.c.bf16 %v3792_v30, %v3791_v55 }
 0x7a9   :  { %v3817_v58 = vpack.c.bf16 %v3790_v16, %v3789_v10  ;;  %6631 = vmatpush3.bf16.msra.mxu0 %v9303_v22  ;;  %v6522_v2 = vpop.f32.mrb[204].mxu1 }
 0x7aa   :  { %v3711_v6 = vadd.f32 %v6522_v2, %v8508_v50  ;;  %6632 = vmatprep.subr.bf16.mxu0 %v9304_v5  ;;  %v3702_v13 = vpop.f32.mrb[205].mxu1 }
 0x7ab   :  { %v3703_v31 = vadd.f32 %v8508_v50, %v3702_v13  ;;  %v6523_v0 = vpop.f32.mrb[206].mxu1  ;;  %6552 = vmatprep.mubr.msk.bf16.mxu0 %vm1921_vm3, %v3817_v58 }
 0x7ac   :  { %v3714_v57 = vadd.f32 %v6523_v0, %v8508_v50  ;;  %v3705_v19 = vpop.f32.mrb[207].mxu1  ;;  %6553 = vmatmul.mubr.msk.bf16.gmra.mrb[200].mxu0 %vm1921_vm3, %v3818_v33  ;;  %v3795_v63 = vmax.f32 %v3711_v6, 0.0 }
 0x7ad   :  { %v3706_v44 = vadd.f32 %v8508_v50, %v3705_v19  ;;  %6633 = vmatpush3.bf16.msra.mxu0 %v9304_v5  ;;  %v3793_v4 = vmax.f32 %v3703_v31, 0.0 }
 0x7ae   :  { %v3796_v28 = vmax.f32 %v3714_v57, 0.0  ;;  %6634 = vmatprep.subr.bf16.mxu0 %v9305_v62 }
 0x7af   :  { %v3794_v1 = vmax.f32 %v3706_v44, 0.0 }
 0x7b0   :  { %v3820_v51 = vpack.c.bf16 %v3796_v28, %v3795_v63 }
 0x7b1   :  { %v3819_v39 = vpack.c.bf16 %v3794_v1, %v3793_v4  ;;  %6635 = vmatpush3.bf16.msra.mxu0 %v9305_v62  ;;  %v6526_v26 = vpop.f32.mrb[208].mxu1 }
 0x7b2   :  { %v3727_v9 = vadd.f32 %v6526_v26, %v8508_v50  ;;  %6636 = vmatprep.subr.bf16.mxu0 %v9306_v46  ;;  %v3718_v48 = vpop.f32.mrb[209].mxu1 }
 0x7b3   :  { %v3719_v12 = vadd.f32 %v8508_v50, %v3718_v48  ;;  %v6527_v53 = vpop.f32.mrb[210].mxu1  ;;  %6556 = vmatprep.mubr.msk.bf16.mxu0 %vm1921_vm3, %v3819_v39 }
 0x7b4   :  { %v3730_v54 = vadd.f32 %v6527_v53, %v8508_v50  ;;  %v3721_v49 = vpop.f32.mrb[211].mxu1  ;;  %6557 = vmatmul.mubr.msk.bf16.gmra.mrb[204].mxu0 %vm1921_vm3, %v3820_v51  ;;  %v3799_v14 = vmax.f32 %v3727_v9, 0.0 }
 0x7b5   :  { %v3722_v8 = vadd.f32 %v8508_v50, %v3721_v49  ;;  %6637 = vmatpush3.bf16.msra.mxu0 %v9306_v46  ;;  %v3797_v15 = vmax.f32 %v3719_v12, 0.0 }
 0x7b6   :  { %v3800_v25 = vmax.f32 %v3730_v54, 0.0  ;;  %6638 = vmatprep.subr.bf16.mxu0 %v9307_v43 }
 0x7b7   :  { %v3798_v52 = vmax.f32 %v3722_v8, 0.0 }
 0x7b8   :  { %v3822_v20 = vpack.c.bf16 %v3800_v25, %v3799_v14 }
 0x7b9   :  { %v3821_v23 = vpack.c.bf16 %v3798_v52, %v3797_v15  ;;  %6639 = vmatpush3.bf16.msra.mxu0 %v9307_v43  ;;  %v6530_v7 = vpop.f32.mrb[212].mxu1 }
 0x7ba   :  { %v3743_v24 = vadd.f32 %v6530_v7, %v8508_v50  ;;  %v3734_v21 = vpop.f32.mrb[213].mxu1 }
 0x7bb   :  { %v3735_v47 = vadd.f32 %v8508_v50, %v3734_v21  ;;  %v6531_v17 = vpop.f32.mrb[214].mxu1  ;;  %6560 = vmatprep.mubr.msk.bf16.mxu0 %vm1921_vm3, %v3821_v23 }
 0x7bc   :  { %v3746_v29 = vadd.f32 %v6531_v17, %v8508_v50  ;;  %v3737_v11 = vpop.f32.mrb[215].mxu1  ;;  %6561 = vmatmul.mubr.msk.bf16.gmra.mrb[208].mxu0 %vm1921_vm3, %v3822_v20  ;;  %v3803_v59 = vmax.f32 %v3743_v24, 0.0 }
 0x7bd   :  { %v3738_v35 = vadd.f32 %v8508_v50, %v3737_v11  ;;  %v3801_v61 = vmax.f32 %v3735_v47, 0.0 }
 0x7be   :  { %v3804_v42 = vmax.f32 %v3746_v29, 0.0 }
 0x7bf   :  { %v3802_v27 = vmax.f32 %v3738_v35, 0.0 }
 0x7c0   :  { %v3824_v32 = vpack.c.bf16 %v3804_v42, %v3803_v59 }
 0x7c1   :  { %v3823_v36 = vpack.c.bf16 %v3802_v27, %v3801_v61  ;;  %v6534_v18 = vpop.f32.mrb[216].mxu1 }
 0x7c2   :  { %v3759_v45 = vadd.f32 %v6534_v18, %v8508_v50  ;;  %v3750_v34 = vpop.f32.mrb[217].mxu1 }
 0x7c3   :  { %v3751_v3 = vadd.f32 %v8508_v50, %v3750_v34  ;;  %v6535_v40 = vpop.f32.mrb[218].mxu1  ;;  %6564 = vmatprep.mubr.msk.bf16.mxu0 %vm1921_vm3, %v3823_v36 }
 0x7c4   :  { %v3762_v60 = vadd.f32 %v6535_v40, %v8508_v50  ;;  %v3753_v38 = vpop.f32.mrb[219].mxu1  ;;  %6565 = vmatmul.mubr.msk.bf16.gmra.mrb[212].mxu0 %vm1921_vm3, %v3824_v32  ;;  %v3807_v56 = vmax.f32 %v3759_v45, 0.0 }
 0x7c5   :  { %v3754_v41 = vadd.f32 %v8508_v50, %v3753_v38  ;;  %v3805_v55 = vmax.f32 %v3751_v3, 0.0 }
 0x7c6   :  { %v3808_v37 = vmax.f32 %v3762_v60, 0.0 }
 0x7c7   :  { %v3806_v30 = vmax.f32 %v3754_v41, 0.0 }
 0x7c8   :  { %v3826_v22 = vpack.c.bf16 %v3808_v37, %v3807_v56 }
 0x7c9   :  { %v3825_v10 = vpack.c.bf16 %v3806_v30, %v3805_v55  ;;  %v6538_v16 = vpop.f32.mrb[220].mxu1 }
 0x7ca   :  { %v3775_v33 = vadd.f32 %v6538_v16, %v8508_v50  ;;  %v3766_v58 = vpop.f32.mrb[221].mxu1 }
 0x7cb   :  { %v3767_v2 = vadd.f32 %v8508_v50, %v3766_v58  ;;  %v6539_v6 = vpop.f32.mrb[222].mxu1  ;;  %6568 = vmatprep.mubr.msk.bf16.mxu0 %vm1921_vm3, %v3825_v10 }
 0x7cc   :  { %v3778_v5 = vadd.f32 %v6539_v6, %v8508_v50  ;;  %v3769_v13 = vpop.f32.mrb[223].mxu1  ;;  %6569 = vmatmul.mubr.msk.bf16.gmra.mrb[216].mxu0 %vm1921_vm3, %v3826_v22  ;;  %v3811_v0 = vmax.f32 %v3775_v33, 0.0 }
 0x7cd   :  { %v3770_v31 = vadd.f32 %v8508_v50, %v3769_v13  ;;  %v3809_v19 = vmax.f32 %v3767_v2, 0.0 }
 0x7ce   :  { %v3812_v57 = vmax.f32 %v3778_v5, 0.0 }
 0x7cf   :  { %v3810_v44 = vmax.f32 %v3770_v31, 0.0 }
 0x7d0   :  { %v3828_v63 = vpack.c.bf16 %v3812_v57, %v3811_v0 }
 0x7d1   :  { %v3827_v28 = vpack.c.bf16 %v3810_v44, %v3809_v19  ;;  %v6594_v62 = vpop.f32.mrb[224].mxu1 }
 0x7d2   :  { %v4199_v4 = vpop.f32.mrb[225].mxu1  ;;  %v8578_v50 = vmul.f32 0.17677669, %v6594_v62 }
 0x7d3   :  { %v8571_v1 = vmul.f32 0.17677669, %v4199_v4  ;;  %6572 = vmatprep.mubr.msk.bf16.mxu0 %vm1921_vm3, %v3827_v28  ;;  %v6595_v51 = vpop.f32.mrb[226].mxu1 }
 0x7d4   :  { %6573 = vmatmul.mubr.msk.bf16.gmra.mrb[220].mxu0 %vm1921_vm3, %v3828_v63  ;;  %v4202_v39 = vpop.f32.mrb[227].mxu1  ;;  %v8581_v9 = vmul.f32 0.17677669, %v6595_v51 }
 0x7d5   :  { %v8575_v26 = vmul.f32 0.17677669, %v4202_v39  ;;  %4358 = vmax.xlane.f32.xlu0 %v8571_v1 }
 0x7d7   :  { %4360 = vmax.xlane.f32.xlu1 %v8575_v26 }
 0x7d9   :  { %4362 = vmax.xlane.f32.xlu0 %v8578_v50  ;;  %v6598_v46 = vpop.f32.mrb[228].mxu1 }
 0x7da   :  { %v4215_v48 = vpop.f32.mrb[229].mxu1  ;;  %v8590_v8 = vmul.f32 0.17677669, %v6598_v46 }
 0x7db   :  { %v8584_v12 = vmul.f32 0.17677669, %v4215_v48  ;;  %4364 = vmax.xlane.f32.xlu1 %v8581_v9  ;;  %v6599_v53 = vpop.f32.mrb[230].mxu1 }
 0x7dc   :  { %v4218_v54 = vpop.f32.mrb[231].mxu1  ;;  %v8593_v14 = vmul.f32 0.17677669, %v6599_v53 }
 0x7dd   :  { %v8587_v49 = vmul.f32 0.17677669, %v4218_v54  ;;  %4366 = vmax.xlane.f32.xlu0 %v8584_v12 }
 0x7df   :  { %4368 = vmax.xlane.f32.xlu1 %v8587_v49 }
 0x7e1   :  { %4370 = vmax.xlane.f32.xlu0 %v8590_v8  ;;  %v6602_v25 = vpop.f32.mrb[232].mxu1 }
 0x7e2   :  { %v4231_v43 = vpop.f32.mrb[233].mxu1  ;;  %v8602_v7 = vmul.f32 0.17677669, %v6602_v25 }
 0x7e3   :  { %v8596_v15 = vmul.f32 0.17677669, %v4231_v43  ;;  %4372 = vmax.xlane.f32.xlu1 %v8593_v14  ;;  %v6603_v52 = vpop.f32.mrb[234].mxu1 }
 0x7e4   :  { %v4234_v20 = vpop.f32.mrb[235].mxu1  ;;  %v8605_v24 = vmul.f32 0.17677669, %v6603_v52 }
 0x7e5   :  { %v8599_v23 = vmul.f32 0.17677669, %v4234_v20  ;;  %4374 = vmax.xlane.f32.xlu0 %v8596_v15 }
 0x7e7   :  { %4376 = vmax.xlane.f32.xlu1 %v8599_v23 }
 0x7e9   :  { %4378 = vmax.xlane.f32.xlu0 %v8602_v7  ;;  %v6606_v21 = vpop.f32.mrb[236].mxu1 }
 0x7ea   :  { %v4247_v47 = vpop.f32.mrb[237].mxu1  ;;  %v8614_v59 = vmul.f32 0.17677669, %v6606_v21 }
 0x7eb   :  { %v8608_v17 = vmul.f32 0.17677669, %v4247_v47  ;;  %4380 = vmax.xlane.f32.xlu1 %v8605_v24  ;;  %v6607_v29 = vpop.f32.mrb[238].mxu1 }
 0x7ec   :  { %v4250_v11 = vpop.f32.mrb[239].mxu1  ;;  %v8617_v42 = vmul.f32 0.17677669, %v6607_v29 }
 0x7ed   :  { %v8611_v35 = vmul.f32 0.17677669, %v4250_v11  ;;  %4382 = vmax.xlane.f32.xlu0 %v8608_v17  ;;  %v8678_v11 = vld [vmem:[%s9191_s15] ss:$0 sm:$0xff] }
 0x7ef   :  { %4384 = vmax.xlane.f32.xlu1 %v8611_v35 }
 0x7f1   :  { %4386 = vmax.xlane.f32.xlu0 %v8614_v59  ;;  %v6610_v61 = vpop.f32.mrb[240].mxu1 }
 0x7f2   :  { %v4263_v27 = vpop.f32.mrb[241].mxu1  ;;  %v8626_v34 = vmul.f32 0.17677669, %v6610_v61 }
 0x7f3   :  { %v8620_v32 = vmul.f32 0.17677669, %v4263_v27  ;;  %4388 = vmax.xlane.f32.xlu1 %v8617_v42  ;;  %v6611_v36 = vpop.f32.mrb[242].mxu1 }
 0x7f4   :  { %v4266_v18 = vpop.f32.mrb[243].mxu1  ;;  %v8629_v3 = vmul.f32 0.17677669, %v6611_v36 }
 0x7f5   :  { %v8623_v45 = vmul.f32 0.17677669, %v4266_v18  ;;  %4390 = vmax.xlane.f32.xlu0 %v8620_v32 }
 0x7f7   :  { %4392 = vmax.xlane.f32.xlu1 %v8623_v45 }
 0x7f9   :  { %4394 = vmax.xlane.f32.xlu0 %v8626_v34  ;;  %v6614_v40 = vpop.f32.mrb[244].mxu1 }
 0x7fa   :  { %v4279_v60 = vpop.f32.mrb[245].mxu1  ;;  %v8638_v55 = vmul.f32 0.17677669, %v6614_v40 }
 0x7fb   :  { %v8632_v38 = vmul.f32 0.17677669, %v4279_v60  ;;  %4396 = vmax.xlane.f32.xlu1 %v8629_v3  ;;  %v6615_v41 = vpop.f32.mrb[246].mxu1 }
 0x7fc   :  { %v4282_v56 = vpop.f32.mrb[247].mxu1  ;;  %v8641_v30 = vmul.f32 0.17677669, %v6615_v41 }
 0x7fd   :  { %v8635_v37 = vmul.f32 0.17677669, %v4282_v56  ;;  %4398 = vmax.xlane.f32.xlu0 %v8632_v38 }
 0x7ff   :  { %4400 = vmax.xlane.f32.xlu1 %v8635_v37 }
 0x801   :  { %4402 = vmax.xlane.f32.xlu0 %v8638_v55  ;;  %v6618_v22 = vpop.f32.mrb[248].mxu1 }
 0x802   :  { %v4295_v10 = vpop.f32.mrb[249].mxu1  ;;  %v8650_v6 = vmul.f32 0.17677669, %v6618_v22 }
 0x803   :  { %v8644_v16 = vmul.f32 0.17677669, %v4295_v10  ;;  %4404 = vmax.xlane.f32.xlu1 %v8641_v30  ;;  %v6619_v33 = vpop.f32.mrb[250].mxu1 }
 0x804   :  { %v4298_v58 = vpop.f32.mrb[251].mxu1  ;;  %v8653_v5 = vmul.f32 0.17677669, %v6619_v33 }
 0x805   :  { %v8647_v2 = vmul.f32 0.17677669, %v4298_v58  ;;  %4406 = vmax.xlane.f32.xlu0 %v8644_v16 }
 0x807   :  { %4408 = vmax.xlane.f32.xlu1 %v8647_v2 }
 0x809   :  { %4410 = vmax.xlane.f32.xlu0 %v8650_v6  ;;  %v6622_v13 = vpop.f32.mrb[252].mxu1 }
 0x80a   :  { %v4311_v31 = vpop.f32.mrb[253].mxu1  ;;  %v8662_v63 = vmul.f32 0.17677669, %v6622_v13 }
 0x80b   :  { %v8656_v0 = vmul.f32 0.17677669, %v4311_v31  ;;  %4412 = vmax.xlane.f32.xlu1 %v8653_v5  ;;  %v6623_v57 = vpop.f32.mrb[254].mxu1 }
 0x80c   :  { %v4314_v19 = vpop.f32.mrb[255].mxu1  ;;  %v8665_v28 = vmul.f32 0.17677669, %v6623_v57 }
 0x80d   :  { %v8659_v44 = vmul.f32 0.17677669, %v4314_v19  ;;  %4414 = vmax.xlane.f32.xlu0 %v8656_v0 }
 0x80f   :  { %4416 = vmax.xlane.f32.xlu1 %v8659_v44 }
 0x811   :  { %4418 = vmax.xlane.f32.xlu0 %v8662_v63 }
 0x813   :  { %4420 = vmax.xlane.f32.xlu1 %v8665_v28 }
 0x862   :  { %v4359_v62 = vpop.xlane.xlu0 %4358 }
 0x863   :  { %v4422_v4 = vsub.f32 %v8571_v1, %v4359_v62 }
 0x864   :  { %v4361_v51 = vpop.xlane.xlu1 %4360 }
 0x865   :  { %v4454_v39 = vmul.f32 1.442695, %v4422_v4  ;;  %v4423_v46 = vsub.f32 %v8575_v26, %v4361_v51 }
 0x866   :  { %v4363_v48 = vpop.xlane.xlu0 %4362 }
 0x867   :  { %6956 = vpow2.f32 %v4454_v39  ;;  %v4456_v53 = vmul.f32 1.442695, %v4423_v46  ;;  %v4424_v54 = vsub.f32 %v8578_v50, %v4363_v48 }
 0x868   :  { %v4365_v25 = vpop.xlane.xlu1 %4364 }
 0x869   :  { %6958 = vpow2.f32 %v4456_v53  ;;  %v4458_v43 = vmul.f32 1.442695, %v4424_v54  ;;  %v4425_v52 = vsub.f32 %v8581_v9, %v4365_v25 }
 0x86a   :  { %v4367_v20 = vpop.xlane.xlu0 %4366 }
 0x86b   :  { %6960 = vpow2.f32 %v4458_v43  ;;  %v4460_v21 = vmul.f32 1.442695, %v4425_v52  ;;  %v4426_v47 = vsub.f32 %v8584_v12, %v4367_v20 }
 0x86c   :  { %v4369_v1 = vpop.xlane.xlu1 %4368 }
 0x86d   :  { %6962 = vpow2.f32 %v4460_v21  ;;  %v4462_v29 = vmul.f32 1.442695, %v4426_v47  ;;  %v4427_v26 = vsub.f32 %v8587_v49, %v4369_v1 }
 0x86e   :  { %v4371_v50 = vpop.xlane.xlu0 %4370 }
 0x86f   :  { %6964 = vpow2.f32 %v4462_v29  ;;  %v4464_v61 = vmul.f32 1.442695, %v4427_v26  ;;  %v4428_v9 = vsub.f32 %v8590_v8, %v4371_v50  ;;  %v6546_v27 = vpop.f32.mrb[192].mxu0 }
 0x870   :  { %v3943_v36 = vadd.f32 %v6546_v27, %v8678_v11  ;;  %v3934_v18 = vpop.f32.mrb[193].mxu0  ;;  %v4373_v12 = vpop.xlane.xlu1 %4372 }
 0x871   :  { %v8682_v40 = vpop.eup %6956  ;;  %6966 = vpow2.f32 %v4464_v61  ;;  %v4466_v60 = vmul.f32 1.442695, %v4428_v9  ;;  %v3935_v49 = vadd.f32 %v8678_v11, %v3934_v18  ;;  %v4429_v41 = vsub.f32 %v8593_v14, %v4373_v12  ;;  %v6547_v56 = vpop.f32.mrb[194].mxu0 }
 0x872   :  { %4063 = vst [vmem:[%s9192_s16 + $0x10] sm:$0xff] %v3943_v36  ;;  %v3946_v8 = vadd.f32 %v6547_v56, %v8678_v11  ;;  %v3937_v22 = vpop.f32.mrb[195].mxu0  ;;  %v4375_v10 = vpop.xlane.xlu0 %4374  ;;  %4518 = vadd.xlane.f32.xlu0 %v8682_v40 }
 0x873   :  { %v8691_v33 = vpop.eup %6958  ;;  %6968 = vpow2.f32 %v4466_v60  ;;  %4061 = vst [vmem:[%s9192_s16] sm:$0xff] %v3935_v49  ;;  %v4468_v58 = vmul.f32 1.442695, %v4429_v41  ;;  %v3938_v14 = vadd.f32 %v8678_v11, %v3937_v22  ;;  %v4430_v13 = vsub.f32 %v8596_v15, %v4375_v10 }
 0x874   :  { %4064 = vst [vmem:[%s9192_s16 + $0x18] sm:$0xff] %v3946_v8  ;;  %v4377_v31 = vpop.xlane.xlu1 %4376  ;;  %4520 = vadd.xlane.f32.xlu1 %v8691_v33 }
 0x875   :  { %v8702_v57 = vpop.eup %6960  ;;  %6970 = vpow2.f32 %v4468_v58  ;;  %4062 = vst [vmem:[%s9192_s16 + $0x8] sm:$0xff] %v3938_v14  ;;  %v4470_v19 = vmul.f32 1.442695, %v4430_v13  ;;  %v4431_v62 = vsub.f32 %v8599_v23, %v4377_v31 }
 0x876   :  { %v4379_v4 = vpop.xlane.xlu0 %4378  ;;  %4522 = vadd.xlane.f32.xlu0 %v8702_v57 }
 0x877   :  { %v8709_v15 = vpop.eup %6962  ;;  %6972 = vpow2.f32 %v4470_v19  ;;  %v4472_v51 = vmul.f32 1.442695, %v4431_v62  ;;  %v4432_v39 = vsub.f32 %v8602_v7, %v4379_v4  ;;  %v6550_v46 = vpop.f32.mrb[196].mxu0 }
 0x878   :  { %v3959_v48 = vadd.f32 %v6550_v46, %v8678_v11  ;;  %v3950_v53 = vpop.f32.mrb[197].mxu0  ;;  %v4381_v54 = vpop.xlane.xlu1 %4380  ;;  %4524 = vadd.xlane.f32.xlu1 %v8709_v15 }
 0x879   :  { %v8714_v25 = vpop.eup %6964  ;;  %6974 = vpow2.f32 %v4472_v51  ;;  %v4474_v23 = vmul.f32 1.442695, %v4432_v39  ;;  %v3951_v43 = vadd.f32 %v8678_v11, %v3950_v53  ;;  %v4433_v52 = vsub.f32 %v8605_v24, %v4381_v54  ;;  %v6551_v20 = vpop.f32.mrb[198].mxu0 }
 0x87a   :  { %4067 = vst [vmem:[%s9192_s16 + $0x30] sm:$0xff] %v3959_v48  ;;  %v3962_v7 = vadd.f32 %v6551_v20, %v8678_v11  ;;  %v3953_v21 = vpop.f32.mrb[199].mxu0  ;;  %v4383_v47 = vpop.xlane.xlu0 %4382  ;;  %4526 = vadd.xlane.f32.xlu0 %v8714_v25 }
 0x87b   :  { %v8723_v1 = vpop.eup %6966  ;;  %6976 = vpow2.f32 %v4474_v23  ;;  %4065 = vst [vmem:[%s9192_s16 + $0x20] sm:$0xff] %v3951_v43  ;;  %v4476_v29 = vmul.f32 1.442695, %v4433_v52  ;;  %v3954_v24 = vadd.f32 %v8678_v11, %v3953_v21  ;;  %v4434_v26 = vsub.f32 %v8608_v17, %v4383_v47 }
 0x87c   :  { %4068 = vst [vmem:[%s9192_s16 + $0x38] sm:$0xff] %v3962_v7  ;;  %v4385_v50 = vpop.xlane.xlu1 %4384  ;;  %4528 = vadd.xlane.f32.xlu1 %v8723_v1 }
 0x87d   :  { %v8734_v61 = vpop.eup %6968  ;;  %6978 = vpow2.f32 %v4476_v29  ;;  %4066 = vst [vmem:[%s9192_s16 + $0x28] sm:$0xff] %v3954_v24  ;;  %v4478_v9 = vmul.f32 1.442695, %v4434_v26  ;;  %v4435_v27 = vsub.f32 %v8611_v35, %v4385_v50 }
 0x87e   :  { %v4387_v36 = vpop.xlane.xlu0 %4386  ;;  %4530 = vadd.xlane.f32.xlu0 %v8734_v61 }
 0x87f   :  { %v8741_v17 = vpop.eup %6970  ;;  %6980 = vpow2.f32 %v4478_v9  ;;  %v4480_v18 = vmul.f32 1.442695, %v4435_v27  ;;  %v4436_v12 = vsub.f32 %v8614_v59, %v4387_v36  ;;  %v6554_v60 = vpop.f32.mrb[200].mxu0 }
 0x880   :  { %v3975_v49 = vadd.f32 %v6554_v60, %v8678_v11  ;;  %v3966_v41 = vpop.f32.mrb[201].mxu0  ;;  %v4389_v56 = vpop.xlane.xlu1 %4388  ;;  %4532 = vadd.xlane.f32.xlu1 %v8741_v17 }
 0x881   :  { %v8746_v8 = vpop.eup %6972  ;;  %6982 = vpow2.f32 %v4480_v18  ;;  %v4482_v35 = vmul.f32 1.442695, %v4436_v12  ;;  %v3967_v22 = vadd.f32 %v8678_v11, %v3966_v41  ;;  %v4437_v10 = vsub.f32 %v8617_v42, %v4389_v56  ;;  %v6555_v58 = vpop.f32.mrb[202].mxu0 }
 0x882   :  { %4071 = vst [vmem:[%s9192_s16 + $0x50] sm:$0xff] %v3975_v49  ;;  %v3978_v59 = vadd.f32 %v6555_v58, %v8678_v11  ;;  %v3969_v14 = vpop.f32.mrb[203].mxu0  ;;  %v4391_v13 = vpop.xlane.xlu0 %4390  ;;  %4534 = vadd.xlane.f32.xlu0 %v8746_v8 }
 0x883   :  { %v8755_v31 = vpop.eup %6974  ;;  %6984 = vpow2.f32 %v4482_v35  ;;  %4069 = vst [vmem:[%s9192_s16 + $0x40] sm:$0xff] %v3967_v22  ;;  %v4484_v19 = vmul.f32 1.442695, %v4437_v10  ;;  %v3970_v42 = vadd.f32 %v8678_v11, %v3969_v14  ;;  %v4438_v62 = vsub.f32 %v8620_v32, %v4391_v13 }
 0x884   :  { %4072 = vst [vmem:[%s9192_s16 + $0x58] sm:$0xff] %v3978_v59  ;;  %v4393_v4 = vpop.xlane.xlu1 %4392  ;;  %4536 = vadd.xlane.f32.xlu1 %v8755_v31 }
 0x885   :  { %v8766_v51 = vpop.eup %6976  ;;  %6986 = vpow2.f32 %v4484_v19  ;;  %4070 = vst [vmem:[%s9192_s16 + $0x48] sm:$0xff] %v3970_v42  ;;  %v4486_v39 = vmul.f32 1.442695, %v4438_v62  ;;  %v4439_v46 = vsub.f32 %v8623_v45, %v4393_v4 }
 0x886   :  { %v4395_v48 = vpop.xlane.xlu0 %4394  ;;  %4538 = vadd.xlane.f32.xlu0 %v8766_v51 }
 0x887   :  { %v8773_v32 = vpop.eup %6978  ;;  %6988 = vpow2.f32 %v4486_v39  ;;  %v4488_v53 = vmul.f32 1.442695, %v4439_v46  ;;  %v4440_v54 = vsub.f32 %v8626_v34, %v4395_v48  ;;  %v6558_v23 = vpop.f32.mrb[204].mxu0 }
 0x888   :  { %v3991_v43 = vadd.f32 %v6558_v23, %v8678_v11  ;;  %v3982_v52 = vpop.f32.mrb[205].mxu0  ;;  %v4397_v20 = vpop.xlane.xlu1 %4396  ;;  %4540 = vadd.xlane.f32.xlu1 %v8773_v32 }
 0x889   :  { %v8778_v7 = vpop.eup %6980  ;;  %6990 = vpow2.f32 %v4488_v53  ;;  %v4490_v45 = vmul.f32 1.442695, %v4440_v54  ;;  %v3983_v21 = vadd.f32 %v8678_v11, %v3982_v52  ;;  %v4441_v47 = vsub.f32 %v8629_v3, %v4397_v20  ;;  %v6559_v29 = vpop.f32.mrb[206].mxu0 }
 0x88a   :  { %4075 = vst [vmem:[%s9192_s16 + $0x70] sm:$0xff] %v3991_v43  ;;  %v3994_v34 = vadd.f32 %v6559_v29, %v8678_v11  ;;  %v3985_v24 = vpop.f32.mrb[207].mxu0  ;;  %v4399_v26 = vpop.xlane.xlu0 %4398  ;;  %4542 = vadd.xlane.f32.xlu0 %v8778_v7 }
 0x88b   :  { %v8787_v50 = vpop.eup %6982  ;;  %6992 = vpow2.f32 %v4490_v45  ;;  %4073 = vst [vmem:[%s9192_s16 + $0x60] sm:$0xff] %v3983_v21  ;;  %v4492_v9 = vmul.f32 1.442695, %v4441_v47  ;;  %v3986_v3 = vadd.f32 %v8678_v11, %v3985_v24  ;;  %v4442_v27 = vsub.f32 %v8632_v38, %v4399_v26 }
 0x88c   :  { %4076 = vst [vmem:[%s9192_s16 + $0x78] sm:$0xff] %v3994_v34  ;;  %v4401_v36 = vpop.xlane.xlu1 %4400  ;;  %4544 = vadd.xlane.f32.xlu1 %v8787_v50 }
 0x88d   :  { %v8798_v18 = vpop.eup %6984  ;;  %6994 = vpow2.f32 %v4492_v9  ;;  %4074 = vst [vmem:[%s9192_s16 + $0x68] sm:$0xff] %v3986_v3  ;;  %v4494_v12 = vmul.f32 1.442695, %v4442_v27  ;;  %v4443_v60 = vsub.f32 %v8635_v37, %v4401_v36 }
 0x88e   :  { %v4403_v49 = vpop.xlane.xlu0 %4402  ;;  %4546 = vadd.xlane.f32.xlu0 %v8798_v18 }
 0x88f   :  { %v8805_v38 = vpop.eup %6986  ;;  %6996 = vpow2.f32 %v4494_v12  ;;  %v4496_v41 = vmul.f32 1.442695, %v4443_v60  ;;  %v4444_v56 = vsub.f32 %v8638_v55, %v4403_v49  ;;  %v6562_v35 = vpop.f32.mrb[208].mxu0 }
 0x890   :  { %v4007_v22 = vadd.f32 %v6562_v35, %v8678_v11  ;;  %v3998_v10 = vpop.f32.mrb[209].mxu0  ;;  %v4405_v58 = vpop.xlane.xlu1 %4404  ;;  %4548 = vadd.xlane.f32.xlu1 %v8805_v38 }
 0x891   :  { %v8810_v59 = vpop.eup %6988  ;;  %6998 = vpow2.f32 %v4496_v41  ;;  %v4498_v37 = vmul.f32 1.442695, %v4444_v56  ;;  %v3999_v14 = vadd.f32 %v8678_v11, %v3998_v10  ;;  %v4445_v13 = vsub.f32 %v8641_v30, %v4405_v58  ;;  %v6563_v19 = vpop.f32.mrb[210].mxu0 }
 0x892   :  { %4079 = vst [vmem:[%s9192_s16 + $0x90] sm:$0xff] %v4007_v22  ;;  %v4010_v55 = vadd.f32 %v6563_v19, %v8678_v11  ;;  %v4001_v42 = vpop.f32.mrb[211].mxu0  ;;  %v4407_v62 = vpop.xlane.xlu0 %4406  ;;  %4550 = vadd.xlane.f32.xlu0 %v8810_v59 }
 0x893   :  { %v8819_v4 = vpop.eup %6990  ;;  %7000 = vpow2.f32 %v4498_v37  ;;  %4077 = vst [vmem:[%s9192_s16 + $0x80] sm:$0xff] %v3999_v14  ;;  %v4500_v39 = vmul.f32 1.442695, %v4445_v13  ;;  %v4002_v30 = vadd.f32 %v8678_v11, %v4001_v42  ;;  %v4446_v46 = vsub.f32 %v8644_v16, %v4407_v62 }
 0x894   :  { %4080 = vst [vmem:[%s9192_s16 + $0x98] sm:$0xff] %v4010_v55  ;;  %v4409_v48 = vpop.xlane.xlu1 %4408  ;;  %4552 = vadd.xlane.f32.xlu1 %v8819_v4 }
 0x895   :  { %v8830_v53 = vpop.eup %6992  ;;  %7002 = vpow2.f32 %v4500_v39  ;;  %4078 = vst [vmem:[%s9192_s16 + $0x88] sm:$0xff] %v4002_v30  ;;  %v4502_v54 = vmul.f32 1.442695, %v4446_v46  ;;  %v4447_v23 = vsub.f32 %v8647_v2, %v4409_v48 }
 0x896   :  { %v4411_v43 = vpop.xlane.xlu0 %4410  ;;  %4554 = vadd.xlane.f32.xlu0 %v8830_v53 }
 0x897   :  { %v8837_v16 = vpop.eup %6994  ;;  %7004 = vpow2.f32 %v4502_v54  ;;  %v4504_v52 = vmul.f32 1.442695, %v4447_v23  ;;  %v4448_v20 = vsub.f32 %v8650_v6, %v4411_v43  ;;  %v6566_v45 = vpop.f32.mrb[212].mxu0 }
 0x898   :  { %v4023_v21 = vadd.f32 %v6566_v45, %v8678_v11  ;;  %v4014_v47 = vpop.f32.mrb[213].mxu0  ;;  %v4413_v29 = vpop.xlane.xlu1 %4412  ;;  %4556 = vadd.xlane.f32.xlu1 %v8837_v16 }
 0x899   :  { %v8842_v34 = vpop.eup %6996  ;;  %7006 = vpow2.f32 %v4504_v52  ;;  %v4506_v2 = vmul.f32 1.442695, %v4448_v20  ;;  %v4015_v24 = vadd.f32 %v8678_v11, %v4014_v47  ;;  %v4449_v26 = vsub.f32 %v8653_v5, %v4413_v29  ;;  %v6567_v9 = vpop.f32.mrb[214].mxu0 }
 0x89a   :  { %4083 = vst [vmem:[%s9192_s16 + $0xb0] sm:$0xff] %v4023_v21  ;;  %v4026_v6 = vadd.f32 %v6567_v9, %v8678_v11  ;;  %v4017_v3 = vpop.f32.mrb[215].mxu0  ;;  %4558 = vadd.xlane.f32.xlu0 %v8842_v34  ;;  %v4415_v27 = vpop.xlane.xlu0 %4414 }
 0x89b   :  { %v8851_v36 = vpop.eup %6998  ;;  %7008 = vpow2.f32 %v4506_v2  ;;  %4081 = vst [vmem:[%s9192_s16 + $0xa0] sm:$0xff] %v4015_v24  ;;  %v4508_v12 = vmul.f32 1.442695, %v4449_v26  ;;  %v4018_v5 = vadd.f32 %v8678_v11, %v4017_v3  ;;  %v4450_v60 = vsub.f32 %v8656_v0, %v4415_v27 }
 0x89c   :  { %4084 = vst [vmem:[%s9192_s16 + $0xb8] sm:$0xff] %v4026_v6  ;;  %4560 = vadd.xlane.f32.xlu1 %v8851_v36  ;;  %v4417_v49 = vpop.xlane.xlu1 %4416 }
 0x89d   :  { %v8862_v41 = vpop.eup %7000  ;;  %7010 = vpow2.f32 %v4508_v12  ;;  %4082 = vst [vmem:[%s9192_s16 + $0xa8] sm:$0xff] %v4018_v5  ;;  %v4510_v56 = vmul.f32 1.442695, %v4450_v60  ;;  %v4451_v35 = vsub.f32 %v8659_v44, %v4417_v49 }
 0x89e   :  { %4562 = vadd.xlane.f32.xlu0 %v8862_v41  ;;  %v4419_v0 = vpop.xlane.xlu0 %4418 }
 0x89f   :  { %v8869_v22 = vpop.eup %7002  ;;  %7012 = vpow2.f32 %v4510_v56  ;;  %v4512_v10 = vmul.f32 1.442695, %v4451_v35  ;;  %v4452_v58 = vsub.f32 %v8662_v63, %v4419_v0  ;;  %v6570_v37 = vpop.f32.mrb[216].mxu0 }
 0x8a0   :  { %v4039_v14 = vadd.f32 %v6570_v37, %v8678_v11  ;;  %v4030_v13 = vpop.f32.mrb[217].mxu0  ;;  %4564 = vadd.xlane.f32.xlu1 %v8869_v22  ;;  %v4421_v19 = vpop.xlane.xlu1 %4420 }
 0x8a1   :  { %v8874_v55 = vpop.eup %7004  ;;  %7014 = vpow2.f32 %v4512_v10  ;;  %v4514_v44 = vmul.f32 1.442695, %v4452_v58  ;;  %v4031_v42 = vadd.f32 %v8678_v11, %v4030_v13  ;;  %v4453_v62 = vsub.f32 %v8665_v28, %v4421_v19  ;;  %v6571_v39 = vpop.f32.mrb[218].mxu0 }
 0x8a2   :  { %4087 = vst [vmem:[%s9192_s16 + $0xd0] sm:$0xff] %v4039_v14  ;;  %v4042_v63 = vadd.f32 %v6571_v39, %v8678_v11  ;;  %v4033_v30 = vpop.f32.mrb[219].mxu0  ;;  %4566 = vadd.xlane.f32.xlu0 %v8874_v55 }
 0x8a3   :  { %v8883_v46 = vpop.eup %7006  ;;  %7016 = vpow2.f32 %v4514_v44  ;;  %4085 = vst [vmem:[%s9192_s16 + $0xc0] sm:$0xff] %v4031_v42  ;;  %v4516_v48 = vmul.f32 1.442695, %v4453_v62  ;;  %v4034_v28 = vadd.f32 %v8678_v11, %v4033_v30 }
 0x8a4   :  { %4088 = vst [vmem:[%s9192_s16 + $0xd8] sm:$0xff] %v4042_v63  ;;  %4568 = vadd.xlane.f32.xlu1 %v8883_v46 }
 0x8a5   :  { %v8893_v54 = vpop.eup %7008  ;;  %7018 = vpow2.f32 %v4516_v48  ;;  %4086 = vst [vmem:[%s9192_s16 + $0xc8] sm:$0xff] %v4034_v28 }
 0x8a6   :  { %4570 = vadd.xlane.f32.xlu0 %v8893_v54 }
 0x8a7   :  { %v8899_v23 = vpop.eup %7010  ;;  %v6574_v43 = vpop.f32.mrb[220].mxu0 }
 0x8a8   :  { %v4055_v52 = vadd.f32 %v6574_v43, %v8678_v11  ;;  %4572 = vadd.xlane.f32.xlu1 %v8899_v23  ;;  %v4046_v20 = vpop.f32.mrb[221].mxu0 }
 0x8a9   :  { %v8903_v45 = vpop.eup %7012  ;;  %v4047_v21 = vadd.f32 %v8678_v11, %v4046_v20  ;;  %v6575_v47 = vpop.f32.mrb[222].mxu0 }
 0x8aa   :  { %4091 = vst [vmem:[%s9192_s16 + $0xf0] sm:$0xff] %v4055_v52  ;;  %v4058_v29 = vadd.f32 %v6575_v47, %v8678_v11  ;;  %4574 = vadd.xlane.f32.xlu0 %v8903_v45  ;;  %v4049_v2 = vpop.f32.mrb[223].mxu0 }
 0x8ab   :  { %v8911_v24 = vpop.eup %7014  ;;  %4089 = vst [vmem:[%s9192_s16 + $0xe0] sm:$0xff] %v4047_v21  ;;  %v4050_v26 = vadd.f32 %v8678_v11, %v4049_v2  ;;  %v6824_v11 = vld [vmem:[%s9185_s12] sm:$0xff]  }
 0x8ac   :  { %4092 = vst [vmem:[%s9192_s16 + $0xf8] sm:$0xff] %v4058_v29  ;;  %4576 = vadd.xlane.f32.xlu1 %v8911_v24  ;;  %6672 = vmatprep.subr.bf16.mxu1 %v6824_v11 }
 0x8ad   :  { %v8921_v9 = vpop.eup %7016  ;;  %4090 = vst [vmem:[%s9192_s16 + $0xe8] sm:$0xff] %v4050_v26  ;;  %6673 = vmatpush3.bf16.msra.mxu1 %v6824_v11 }
 0x8ae   :  { %4578 = vadd.xlane.f32.xlu0 %v8921_v9 }
 0x8af   :  { %v8927_v6 = vpop.eup %7018 }
 0x8b0   :  { %4580 = vadd.xlane.f32.xlu1 %v8927_v6 }
 0x8ff   :  { %v4519_v3 = vpop.xlane.xlu0 %4518 }
 0x900   :  { %7020 = vrcp.f32 %v4519_v3 }
 0x901   :  { %v4521_v27 = vpop.xlane.xlu1 %4520 }
 0x902   :  { %7022 = vrcp.f32 %v4521_v27 }
 0x903   :  { %v4523_v12 = vpop.xlane.xlu0 %4522 }
 0x904   :  { %7024 = vrcp.f32 %v4523_v12 }
 0x905   :  { %v4525_v5 = vpop.xlane.xlu1 %4524 }
 0x906   :  { %7026 = vrcp.f32 %v4525_v5 }
 0x907   :  { %v4527_v60 = vpop.xlane.xlu0 %4526 }
 0x908   :  { %7028 = vrcp.f32 %v4527_v60 }
 0x909   :  { %v4529_v49 = vpop.xlane.xlu1 %4528 }
 0x90a   :  { %v7021_v56 = vpop.eup %7020  ;;  %7030 = vrcp.f32 %v4529_v49 }
 0x90b   :  { %v4531_v35 = vpop.xlane.xlu0 %4530  ;;  %v4614_v58 = vmul.f32 %v7021_v56, %v8682_v40 }
 0x90c   :  { %v7023_v0 = vpop.eup %7022  ;;  %7032 = vrcp.f32 %v4531_v35 }
 0x90d   :  { %v4533_v10 = vpop.xlane.xlu1 %4532  ;;  %v4615_v37 = vmul.f32 %v7023_v0, %v8691_v33 }
 0x90e   :  { %v7025_v14 = vpop.eup %7024  ;;  %7034 = vrcp.f32 %v4533_v10 }
 0x90f   :  { %v4535_v13 = vpop.xlane.xlu0 %4534  ;;  %v4646_v19 = vpack.c.bf16 %v4615_v37, %v4614_v58  ;;  %v4616_v42 = vmul.f32 %v7025_v14, %v8702_v57 }
 0x910   :  { %v7027_v44 = vpop.eup %7026  ;;  %7036 = vrcp.f32 %v4535_v13 }
 0x911   :  { %v4617_v62 = vmul.f32 %v7027_v44, %v8709_v15  ;;  %v4537_v39 = vpop.xlane.xlu1 %4536  ;;  %6640 = vmatprep.mubr.bf16.mxu0 %v4646_v19 }
 0x912   :  { %v7029_v63 = vpop.eup %7028  ;;  %7038 = vrcp.f32 %v4537_v39 }
 0x913   :  { %v4539_v30 = vpop.xlane.xlu0 %4538  ;;  %v4647_v48 = vpack.c.bf16 %v4617_v62, %v4616_v42  ;;  %v4618_v33 = vmul.f32 %v7029_v63, %v8714_v25 }
 0x914   :  { %v7031_v28 = vpop.eup %7030  ;;  %7040 = vrcp.f32 %v4539_v30 }
 0x915   :  { %v4541_v40 = vpop.xlane.xlu1 %4540  ;;  %6641 = vmatmul.mubr.bf16.vlgmr.msra.gmra.mrb[224].mxu0 %v4647_v48  ;;  %v4619_v43 = vmul.f32 %v7031_v28, %v8723_v1 }
 0x916   :  { %v7033_v52 = vpop.eup %7032  ;;  %7042 = vrcp.f32 %v4541_v40 }
 0x917   :  { %v4543_v20 = vpop.xlane.xlu0 %4542  ;;  %v4648_v57 = vpack.c.bf16 %v4619_v43, %v4618_v33  ;;  %v4620_v47 = vmul.f32 %v7033_v52, %v8734_v61 }
 0x918   :  { %v7035_v21 = vpop.eup %7034  ;;  %7044 = vrcp.f32 %v4543_v20 }
 0x919   :  { %v4545_v15 = vpop.xlane.xlu1 %4544  ;;  %6644 = vmatprep.mubr.bf16.mxu0 %v4648_v57  ;;  %v4621_v29 = vmul.f32 %v7035_v21, %v8741_v17 }
 0x91a   :  { %v7037_v2 = vpop.eup %7036  ;;  %7046 = vrcp.f32 %v4545_v15 }
 0x91b   :  { %v4547_v26 = vpop.xlane.xlu0 %4546  ;;  %v4649_v11 = vpack.c.bf16 %v4621_v29, %v4620_v47  ;;  %v4622_v1 = vmul.f32 %v7037_v2, %v8746_v8 }
 0x91c   :  { %v7039_v3 = vpop.eup %7038  ;;  %7048 = vrcp.f32 %v4547_v26 }
 0x91d   :  { %v4549_v25 = vpop.xlane.xlu1 %4548  ;;  %6645 = vmatmul.mubr.bf16.gmra.mrb[228].mxu0 %v4649_v11  ;;  %v4623_v27 = vmul.f32 %v7039_v3, %v8755_v31 }
 0x91e   :  { %v7041_v12 = vpop.eup %7040  ;;  %7050 = vrcp.f32 %v4549_v25 }
 0x91f   :  { %v4551_v5 = vpop.xlane.xlu0 %4550  ;;  %v4650_v60 = vpack.c.bf16 %v4623_v27, %v4622_v1  ;;  %v4624_v17 = vmul.f32 %v7041_v12, %v8766_v51 }
 0x920   :  { %v7043_v49 = vpop.eup %7042  ;;  %7052 = vrcp.f32 %v4551_v5 }
 0x921   :  { %v4553_v61 = vpop.xlane.xlu1 %4552  ;;  %6648 = vmatprep.mubr.bf16.mxu0 %v4650_v60  ;;  %v4625_v56 = vmul.f32 %v7043_v49, %v8773_v32 }
 0x922   :  { %v7045_v35 = vpop.eup %7044  ;;  %7054 = vrcp.f32 %v4553_v61 }
 0x923   :  { %v4555_v0 = vpop.xlane.xlu0 %4554  ;;  %v4651_v10 = vpack.c.bf16 %v4625_v56, %v4624_v17  ;;  %v4626_v31 = vmul.f32 %v7045_v35, %v8778_v7 }
 0x924   :  { %v7047_v58 = vpop.eup %7046  ;;  %7056 = vrcp.f32 %v4555_v0 }
 0x925   :  { %v4557_v8 = vpop.xlane.xlu1 %4556  ;;  %6649 = vmatmul.mubr.bf16.gmra.mrb[232].mxu0 %v4651_v10  ;;  %v4627_v37 = vmul.f32 %v7047_v58, %v8787_v50 }
 0x926   :  { %v7049_v14 = vpop.eup %7048  ;;  %7058 = vrcp.f32 %v4557_v8 }
 0x927   :  { %v4559_v13 = vpop.xlane.xlu0 %4558  ;;  %v4652_v19 = vpack.c.bf16 %v4627_v37, %v4626_v31  ;;  %v4628_v32 = vmul.f32 %v7049_v14, %v8798_v18 }
 0x928   :  { %v7051_v44 = vpop.eup %7050  ;;  %7060 = vrcp.f32 %v4559_v13 }
 0x929   :  { %v4561_v51 = vpop.xlane.xlu1 %4560  ;;  %6652 = vmatprep.mubr.bf16.mxu0 %v4652_v19  ;;  %v4629_v42 = vmul.f32 %v7051_v44, %v8805_v38 }
 0x92a   :  { %v7053_v62 = vpop.eup %7052  ;;  %7062 = vrcp.f32 %v4561_v51 }
 0x92b   :  { %v4563_v39 = vpop.xlane.xlu0 %4562  ;;  %v4653_v63 = vpack.c.bf16 %v4629_v42, %v4628_v32  ;;  %v4630_v50 = vmul.f32 %v7053_v62, %v8810_v59 }
 0x92c   :  { %v7055_v30 = vpop.eup %7054  ;;  %7064 = vrcp.f32 %v4563_v39 }
 0x92d   :  { %v4565_v7 = vpop.xlane.xlu1 %4564  ;;  %6653 = vmatmul.mubr.bf16.gmra.mrb[236].mxu0 %v4653_v63  ;;  %v4631_v48 = vmul.f32 %v7055_v30, %v8819_v4 }
 0x92e   :  { %v7057_v28 = vpop.eup %7056  ;;  %7066 = vrcp.f32 %v4565_v7 }
 0x92f   :  { %v4567_v40 = vpop.xlane.xlu0 %4566  ;;  %v4654_v33 = vpack.c.bf16 %v4631_v48, %v4630_v50  ;;  %v4632_v38 = vmul.f32 %v7057_v28, %v8830_v53 }
 0x930   :  { %v7059_v43 = vpop.eup %7058  ;;  %7068 = vrcp.f32 %v4567_v40 }
 0x931   :  { %v4569_v18 = vpop.xlane.xlu1 %4568  ;;  %6656 = vmatprep.mubr.bf16.mxu0 %v4654_v33  ;;  %v4633_v52 = vmul.f32 %v7059_v43, %v8837_v16 }
 0x932   :  { %v7061_v20 = vpop.eup %7060  ;;  %7070 = vrcp.f32 %v4569_v18 }
 0x933   :  { %v4571_v57 = vpop.xlane.xlu0 %4570  ;;  %v4655_v21 = vpack.c.bf16 %v4633_v52, %v4632_v38  ;;  %v4634_v4 = vmul.f32 %v7061_v20, %v8842_v34 }
 0x934   :  { %v7063_v15 = vpop.eup %7062  ;;  %7072 = vrcp.f32 %v4571_v57 }
 0x935   :  { %v4573_v59 = vpop.xlane.xlu1 %4572  ;;  %6657 = vmatmul.mubr.bf16.gmra.mrb[240].mxu0 %v4655_v21  ;;  %v4635_v47 = vmul.f32 %v7063_v15, %v8851_v36 }
 0x936   :  { %v7065_v29 = vpop.eup %7064  ;;  %7074 = vrcp.f32 %v4573_v59 }
 0x937   :  { %v4575_v2 = vpop.xlane.xlu0 %4574  ;;  %v4656_v26 = vpack.c.bf16 %v4635_v47, %v4634_v4  ;;  %v4636_v16 = vmul.f32 %v7065_v29, %v8862_v41 }
 0x938   :  { %v7067_v11 = vpop.eup %7066  ;;  %7076 = vrcp.f32 %v4575_v2 }
 0x939   :  { %v4577_v53 = vpop.xlane.xlu1 %4576  ;;  %6660 = vmatprep.mubr.bf16.mxu0 %v4656_v26  ;;  %v4637_v3 = vmul.f32 %v7067_v11, %v8869_v22 }
 0x93a   :  { %v7069_v25 = vpop.eup %7068  ;;  %7078 = vrcp.f32 %v4577_v53 }
 0x93b   :  { %v4579_v1 = vpop.xlane.xlu0 %4578  ;;  %v4657_v27 = vpack.c.bf16 %v4637_v3, %v4636_v16  ;;  %v4638_v36 = vmul.f32 %v7069_v25, %v8874_v55 }
 0x93c   :  { %v7071_v12 = vpop.eup %7070  ;;  %7080 = vrcp.f32 %v4579_v1 }
 0x93d   :  { %v4581_v34 = vpop.xlane.xlu1 %4580  ;;  %6661 = vmatmul.mubr.bf16.gmra.mrb[244].mxu0 %v4657_v27  ;;  %v4639_v5 = vmul.f32 %v7071_v12, %v8883_v46 }
 0x93e   :  { %v7073_v60 = vpop.eup %7072  ;;  %7082 = vrcp.f32 %v4581_v34 }
 0x93f   :  { %v4658_v49 = vpack.c.bf16 %v4639_v5, %v4638_v36  ;;  %v4640_v41 = vmul.f32 %v7073_v60, %v8893_v54  ;;  %v6825_v54 = vld [vmem:[%s9185_s12 + $0x8] sm:$0xff]  }
 0x940   :  { %v7075_v61 = vpop.eup %7074  ;;  %6674 = vmatprep.subr.bf16.mxu1 %v6825_v54 }
 0x941   :  { %6664 = vmatprep.mubr.bf16.mxu0 %v4658_v49  ;;  %v4641_v22 = vmul.f32 %v7075_v61, %v8899_v23  ;;  %6675 = vmatpush3.bf16.msra.mxu1 %v6825_v54  ;;  %v6826_v23 = vld [vmem:[%s9189_s14] sm:$0xff]   ;;  %v6827_v61 = vld [vmem:[%s9189_s14 + $0x8] sm:$0xff]  }
 0x942   :  { %v7077_v17 = vpop.eup %7076  ;;  %6708 = vmatprep.subr.bf16.mxu0 %v6826_v23 }
 0x943   :  { %v4659_v56 = vpack.c.bf16 %v4641_v22, %v4640_v41  ;;  %v4642_v0 = vmul.f32 %v7077_v17, %v8903_v45  ;;  %6709 = vmatpush3.bf16.msra.mxu0 %v6826_v23  ;;  %v8993_v41 = vld [vmem:[%s9190_s13] ss:$0 sm:$0xff] }
 0x944   :  { %v7079_v35 = vpop.eup %7078  ;;  %6710 = vmatprep.subr.bf16.mxu0 %v6827_v61 }
 0x945   :  { %6665 = vmatmul.mubr.bf16.gmra.mrb[248].mxu0 %v4659_v56  ;;  %v4643_v10 = vmul.f32 %v7079_v35, %v8911_v24 }
 0x946   :  { %v7081_v55 = vpop.eup %7080 }
 0x947   :  { %v4660_v58 = vpack.c.bf16 %v4643_v10, %v4642_v0  ;;  %v4644_v8 = vmul.f32 %v7081_v55, %v8921_v9  ;;  %6711 = vmatpush3.bf16.msra.mxu0 %v6827_v61 }
 0x948   :  { %v7083_v46 = vpop.eup %7082 }
 0x949   :  { %6668 = vmatprep.mubr.bf16.mxu0 %v4660_v58  ;;  %v4645_v31 = vmul.f32 %v7083_v46, %v8927_v6 }
 0x94b   :  { %v4661_v37 = vpack.c.bf16 %v4645_v31, %v4644_v8 }
 0x94d   :  { %6669 = vmatmul.mubr.bf16.gmra.mrb[252].mxu0 %v4661_v37 }
 0x9e8   :  { %v6642_v45 = vpop.f32.mrb[224].mxu0 }
 0x9e9   :  { %v4696_v24 = vpop.f32.mrb[225].mxu0 }
 0x9ea   :  { %v6643_v14 = vpop.f32.mrb[226].mxu0 }
 0x9eb   :  { %v4824_v9 = vpack.c.bf16 %v6643_v14, %v6642_v45  ;;  %v4699_v13 = vpop.f32.mrb[227].mxu0 }
 0x9ec   :  { %v4823_v6 = vpack.c.bf16 %v4699_v13, %v4696_v24 }
 0x9ee   :  { %6676 = vmatprep.mubr.msk.bf16.mxu1 %vm1921_vm3, %v4823_v6 }
 0x9ef   :  { %6677 = vmatmul.mubr.msk.bf16.vlgmr.msra.gmra.mrb[0].mxu1 %vm1921_vm3, %v4824_v9 }
 0x9f0   :  { %v6646_v19 = vpop.f32.mrb[228].mxu0 }
 0x9f1   :  { %v4712_v44 = vpop.f32.mrb[229].mxu0 }
 0x9f2   :  { %v6647_v51 = vpop.f32.mrb[230].mxu0 }
 0x9f3   :  { %v4826_v32 = vpack.c.bf16 %v6647_v51, %v6646_v19  ;;  %v4715_v42 = vpop.f32.mrb[231].mxu0 }
 0x9f4   :  { %v4825_v62 = vpack.c.bf16 %v4715_v42, %v4712_v44 }
 0x9f6   :  { %6680 = vmatprep.mubr.msk.bf16.mxu1 %vm1921_vm3, %v4825_v62 }
 0x9f7   :  { %6681 = vmatmul.mubr.msk.bf16.gmra.mrb[4].mxu1 %vm1921_vm3, %v4826_v32 }
 0x9f8   :  { %v6650_v39 = vpop.f32.mrb[232].mxu0 }
 0x9f9   :  { %v4728_v63 = vpop.f32.mrb[233].mxu0 }
 0x9fa   :  { %v6651_v30 = vpop.f32.mrb[234].mxu0 }
 0x9fb   :  { %v4828_v7 = vpack.c.bf16 %v6651_v30, %v6650_v39  ;;  %v4731_v50 = vpop.f32.mrb[235].mxu0 }
 0x9fc   :  { %v4827_v48 = vpack.c.bf16 %v4731_v50, %v4728_v63 }
 0x9fe   :  { %6684 = vmatprep.mubr.msk.bf16.mxu1 %vm1921_vm3, %v4827_v48 }
 0x9ff   :  { %6685 = vmatmul.mubr.msk.bf16.gmra.mrb[8].mxu1 %vm1921_vm3, %v4828_v7 }
 0xa00   :  { %v6654_v28 = vpop.f32.mrb[236].mxu0 }
 0xa01   :  { %v4744_v40 = vpop.f32.mrb[237].mxu0 }
 0xa02   :  { %v6655_v33 = vpop.f32.mrb[238].mxu0 }
 0xa03   :  { %v4830_v43 = vpack.c.bf16 %v6655_v33, %v6654_v28  ;;  %v4747_v18 = vpop.f32.mrb[239].mxu0 }
 0xa04   :  { %v4829_v38 = vpack.c.bf16 %v4747_v18, %v4744_v40 }
 0xa06   :  { %6688 = vmatprep.mubr.msk.bf16.mxu1 %vm1921_vm3, %v4829_v38 }
 0xa07   :  { %6689 = vmatmul.mubr.msk.bf16.gmra.mrb[12].mxu1 %vm1921_vm3, %v4830_v43 }
 0xa08   :  { %v6658_v52 = vpop.f32.mrb[240].mxu0 }
 0xa09   :  { %v4760_v20 = vpop.f32.mrb[241].mxu0 }
 0xa0a   :  { %v6659_v57 = vpop.f32.mrb[242].mxu0 }
 0xa0b   :  { %v4832_v21 = vpack.c.bf16 %v6659_v57, %v6658_v52  ;;  %v4763_v15 = vpop.f32.mrb[243].mxu0 }
 0xa0c   :  { %v4831_v59 = vpack.c.bf16 %v4763_v15, %v4760_v20 }
 0xa0e   :  { %6692 = vmatprep.mubr.msk.bf16.mxu1 %vm1921_vm3, %v4831_v59 }
 0xa0f   :  { %6693 = vmatmul.mubr.msk.bf16.gmra.mrb[16].mxu1 %vm1921_vm3, %v4832_v21 }
 0xa10   :  { %v6662_v4 = vpop.f32.mrb[244].mxu0 }
 0xa11   :  { %v4776_v47 = vpop.f32.mrb[245].mxu0 }
 0xa12   :  { %v6663_v29 = vpop.f32.mrb[246].mxu0 }
 0xa13   :  { %v4834_v2 = vpack.c.bf16 %v6663_v29, %v6662_v4  ;;  %v4779_v26 = vpop.f32.mrb[247].mxu0 }
 0xa14   :  { %v4833_v11 = vpack.c.bf16 %v4779_v26, %v4776_v47 }
 0xa16   :  { %6696 = vmatprep.mubr.msk.bf16.mxu1 %vm1921_vm3, %v4833_v11 }
 0xa17   :  { %6697 = vmatmul.mubr.msk.bf16.gmra.mrb[20].mxu1 %vm1921_vm3, %v4834_v2 }
 0xa18   :  { %v6666_v53 = vpop.f32.mrb[248].mxu0 }
 0xa19   :  { %v4792_v16 = vpop.f32.mrb[249].mxu0 }
 0xa1a   :  { %v6667_v3 = vpop.f32.mrb[250].mxu0 }
 0xa1b   :  { %v4836_v25 = vpack.c.bf16 %v6667_v3, %v6666_v53  ;;  %v4795_v1 = vpop.f32.mrb[251].mxu0 }
 0xa1c   :  { %v4835_v27 = vpack.c.bf16 %v4795_v1, %v4792_v16 }
 0xa1e   :  { %6700 = vmatprep.mubr.msk.bf16.mxu1 %vm1921_vm3, %v4835_v27 }
 0xa1f   :  { %6701 = vmatmul.mubr.msk.bf16.gmra.mrb[24].mxu1 %vm1921_vm3, %v4836_v25 }
 0xa20   :  { %v6670_v12 = vpop.f32.mrb[252].mxu0 }
 0xa21   :  { %v4808_v34 = vpop.f32.mrb[253].mxu0 }
 0xa22   :  { %v6671_v36 = vpop.f32.mrb[254].mxu0 }
 0xa23   :  { %v4838_v5 = vpack.c.bf16 %v6671_v36, %v6670_v12  ;;  %v4811_v60 = vpop.f32.mrb[255].mxu0 }
 0xa24   :  { %v4837_v49 = vpack.c.bf16 %v4811_v60, %v4808_v34 }
 0xa26   :  { %6704 = vmatprep.mubr.msk.bf16.mxu1 %vm1921_vm3, %v4837_v49 }
 0xa27   :  { %6705 = vmatmul.mubr.msk.bf16.gmra.mrb[28].mxu1 %vm1921_vm3, %v4838_v5 }
 0xac2   :  { %v6678_v22 = vpop.f32.mrb[0].mxu1 }
 0xac3   :  { %v4953_v17 = vadd.f32 %v6678_v22, %v8993_v41  ;;  %v4944_v56 = vpop.f32.mrb[1].mxu1 }
 0xac4   :  { %v4945_v35 = vadd.f32 %v8993_v41, %v4944_v56  ;;  %v6679_v0 = vpop.f32.mrb[2].mxu1 }
 0xac5   :  { %v4956_v10 = vadd.f32 %v6679_v0, %v8993_v41  ;;  %v4947_v55 = vpop.f32.mrb[3].mxu1  ;;  %v5073_v46 = vmax.f32 %v4953_v17, 0.0 }
 0xac6   :  { %v4948_v58 = vadd.f32 %v8993_v41, %v4947_v55  ;;  %v5071_v31 = vmax.f32 %v4945_v35, 0.0 }
 0xac7   :  { %v5074_v8 = vmax.f32 %v4956_v10, 0.0 }
 0xac8   :  { %v5072_v37 = vmax.f32 %v4948_v58, 0.0 }
 0xac9   :  { %v5104_v54 = vpack.c.bf16 %v5074_v8, %v5073_v46 }
 0xaca   :  { %v5103_v23 = vpack.c.bf16 %v5072_v37, %v5071_v31  ;;  %v6682_v45 = vpop.f32.mrb[4].mxu1 }
 0xacb   :  { %v4969_v24 = vadd.f32 %v6682_v45, %v8993_v41  ;;  %v4960_v14 = vpop.f32.mrb[5].mxu1 }
 0xacc   :  { %v4961_v9 = vadd.f32 %v8993_v41, %v4960_v14  ;;  %v6683_v13 = vpop.f32.mrb[6].mxu1  ;;  %6712 = vmatprep.mubr.msk.bf16.mxu0 %vm1921_vm3, %v5103_v23 }
 0xacd   :  { %v4972_v6 = vadd.f32 %v6683_v13, %v8993_v41  ;;  %v4963_v19 = vpop.f32.mrb[7].mxu1  ;;  %6713 = vmatmul.mubr.msk.bf16.vlgmr.msra.gmra.mrb[0].mxu0 %vm1921_vm3, %v5104_v54  ;;  %v5077_v51 = vmax.f32 %v4969_v24, 0.0 }
 0xace   :  { %v4964_v44 = vadd.f32 %v8993_v41, %v4963_v19  ;;  %v5075_v42 = vmax.f32 %v4961_v9, 0.0 }
 0xacf   :  { %v5078_v32 = vmax.f32 %v4972_v6, 0.0 }
 0xad0   :  { %v5076_v62 = vmax.f32 %v4964_v44, 0.0 }
 0xad1   :  { %v5106_v39 = vpack.c.bf16 %v5078_v32, %v5077_v51 }
 0xad2   :  { %v5105_v63 = vpack.c.bf16 %v5076_v62, %v5075_v42  ;;  %v6686_v30 = vpop.f32.mrb[8].mxu1 }
 0xad3   :  { %v4985_v7 = vadd.f32 %v6686_v30, %v8993_v41  ;;  %v4976_v50 = vpop.f32.mrb[9].mxu1 }
 0xad4   :  { %v4977_v48 = vadd.f32 %v8993_v41, %v4976_v50  ;;  %v6687_v28 = vpop.f32.mrb[10].mxu1  ;;  %6716 = vmatprep.mubr.msk.bf16.mxu0 %vm1921_vm3, %v5105_v63 }
 0xad5   :  { %v4988_v40 = vadd.f32 %v6687_v28, %v8993_v41  ;;  %v4979_v33 = vpop.f32.mrb[11].mxu1  ;;  %6717 = vmatmul.mubr.msk.bf16.gmra.mrb[4].mxu0 %vm1921_vm3, %v5106_v39  ;;  %v5081_v18 = vmax.f32 %v4985_v7, 0.0 }
 0xad6   :  { %v4980_v43 = vadd.f32 %v8993_v41, %v4979_v33  ;;  %v5079_v52 = vmax.f32 %v4977_v48, 0.0 }
 0xad7   :  { %v5082_v38 = vmax.f32 %v4988_v40, 0.0 }
 0xad8   :  { %v5080_v20 = vmax.f32 %v4980_v43, 0.0 }
 0xad9   :  { %v5108_v57 = vpack.c.bf16 %v5082_v38, %v5081_v18 }
 0xada   :  { %v5107_v21 = vpack.c.bf16 %v5080_v20, %v5079_v52  ;;  %v6690_v15 = vpop.f32.mrb[12].mxu1 }
 0xadb   :  { %v5001_v59 = vadd.f32 %v6690_v15, %v8993_v41  ;;  %v4992_v4 = vpop.f32.mrb[13].mxu1 }
 0xadc   :  { %v4993_v47 = vadd.f32 %v8993_v41, %v4992_v4  ;;  %v6691_v29 = vpop.f32.mrb[14].mxu1  ;;  %6720 = vmatprep.mubr.msk.bf16.mxu0 %vm1921_vm3, %v5107_v21 }
 0xadd   :  { %v5004_v2 = vadd.f32 %v6691_v29, %v8993_v41  ;;  %v4995_v26 = vpop.f32.mrb[15].mxu1  ;;  %6721 = vmatmul.mubr.msk.bf16.gmra.mrb[8].mxu0 %vm1921_vm3, %v5108_v57  ;;  %v5085_v53 = vmax.f32 %v5001_v59, 0.0 }
 0xade   :  { %v4996_v11 = vadd.f32 %v8993_v41, %v4995_v26  ;;  %v5083_v3 = vmax.f32 %v4993_v47, 0.0 }
 0xadf   :  { %v5086_v16 = vmax.f32 %v5004_v2, 0.0 }
 0xae0   :  { %v5084_v25 = vmax.f32 %v4996_v11, 0.0  ;;  %v9046_v11 = vld [vmem:[%s9191_s15] ss:$0 sm:$0xff] }
 0xae1   :  { %v5110_v1 = vpack.c.bf16 %v5086_v16, %v5085_v53 }
 0xae2   :  { %v5109_v27 = vpack.c.bf16 %v5084_v25, %v5083_v3  ;;  %v6694_v12 = vpop.f32.mrb[16].mxu1 }
 0xae3   :  { %v5017_v34 = vadd.f32 %v6694_v12, %v8993_v41  ;;  %v5008_v36 = vpop.f32.mrb[17].mxu1 }
 0xae4   :  { %v5009_v5 = vadd.f32 %v8993_v41, %v5008_v36  ;;  %v6695_v60 = vpop.f32.mrb[18].mxu1  ;;  %6724 = vmatprep.mubr.msk.bf16.mxu0 %vm1921_vm3, %v5109_v27 }
 0xae5   :  { %v5020_v49 = vadd.f32 %v6695_v60, %v8993_v41  ;;  %v5011_v61 = vpop.f32.mrb[19].mxu1  ;;  %6725 = vmatmul.mubr.msk.bf16.gmra.mrb[12].mxu0 %vm1921_vm3, %v5110_v1  ;;  %v5089_v17 = vmax.f32 %v5017_v34, 0.0 }
 0xae6   :  { %v5012_v22 = vadd.f32 %v8993_v41, %v5011_v61  ;;  %v5087_v35 = vmax.f32 %v5009_v5, 0.0 }
 0xae7   :  { %v5090_v56 = vmax.f32 %v5020_v49, 0.0 }
 0xae8   :  { %v5088_v0 = vmax.f32 %v5012_v22, 0.0 }
 0xae9   :  { %v5112_v10 = vpack.c.bf16 %v5090_v56, %v5089_v17 }
 0xaea   :  { %v5111_v55 = vpack.c.bf16 %v5088_v0, %v5087_v35  ;;  %v6698_v58 = vpop.f32.mrb[20].mxu1 }
 0xaeb   :  { %v5033_v46 = vadd.f32 %v6698_v58, %v8993_v41  ;;  %v5024_v8 = vpop.f32.mrb[21].mxu1 }
 0xaec   :  { %v5025_v31 = vadd.f32 %v8993_v41, %v5024_v8  ;;  %v6699_v37 = vpop.f32.mrb[22].mxu1  ;;  %6728 = vmatprep.mubr.msk.bf16.mxu0 %vm1921_vm3, %v5111_v55 }
 0xaed   :  { %v5036_v54 = vadd.f32 %v6699_v37, %v8993_v41  ;;  %v5027_v23 = vpop.f32.mrb[23].mxu1  ;;  %6729 = vmatmul.mubr.msk.bf16.gmra.mrb[16].mxu0 %vm1921_vm3, %v5112_v10  ;;  %v5093_v24 = vmax.f32 %v5033_v46, 0.0 }
 0xaee   :  { %v5028_v45 = vadd.f32 %v8993_v41, %v5027_v23  ;;  %v5091_v9 = vmax.f32 %v5025_v31, 0.0 }
 0xaef   :  { %v5094_v14 = vmax.f32 %v5036_v54, 0.0 }
 0xaf0   :  { %v5092_v13 = vmax.f32 %v5028_v45, 0.0 }
 0xaf1   :  { %v5114_v6 = vpack.c.bf16 %v5094_v14, %v5093_v24 }
 0xaf2   :  { %v5113_v19 = vpack.c.bf16 %v5092_v13, %v5091_v9  ;;  %v6702_v44 = vpop.f32.mrb[24].mxu1 }
 0xaf3   :  { %v5049_v51 = vadd.f32 %v6702_v44, %v8993_v41  ;;  %v5040_v32 = vpop.f32.mrb[25].mxu1 }
 0xaf4   :  { %v5041_v42 = vadd.f32 %v8993_v41, %v5040_v32  ;;  %v6703_v62 = vpop.f32.mrb[26].mxu1  ;;  %6732 = vmatprep.mubr.msk.bf16.mxu0 %vm1921_vm3, %v5113_v19 }
 0xaf5   :  { %v5052_v39 = vadd.f32 %v6703_v62, %v8993_v41  ;;  %v5043_v63 = vpop.f32.mrb[27].mxu1  ;;  %6733 = vmatmul.mubr.msk.bf16.gmra.mrb[20].mxu0 %vm1921_vm3, %v5114_v6  ;;  %v5097_v7 = vmax.f32 %v5049_v51, 0.0 }
 0xaf6   :  { %v5044_v30 = vadd.f32 %v8993_v41, %v5043_v63  ;;  %v5095_v48 = vmax.f32 %v5041_v42, 0.0 }
 0xaf7   :  { %v5098_v50 = vmax.f32 %v5052_v39, 0.0 }
 0xaf8   :  { %v5096_v28 = vmax.f32 %v5044_v30, 0.0 }
 0xaf9   :  { %v5116_v40 = vpack.c.bf16 %v5098_v50, %v5097_v7 }
 0xafa   :  { %v5115_v33 = vpack.c.bf16 %v5096_v28, %v5095_v48  ;;  %v6706_v43 = vpop.f32.mrb[28].mxu1 }
 0xafb   :  { %v5065_v18 = vadd.f32 %v6706_v43, %v8993_v41  ;;  %v5056_v38 = vpop.f32.mrb[29].mxu1 }
 0xafc   :  { %v5057_v52 = vadd.f32 %v8993_v41, %v5056_v38  ;;  %v6707_v20 = vpop.f32.mrb[30].mxu1  ;;  %6736 = vmatprep.mubr.msk.bf16.mxu0 %vm1921_vm3, %v5115_v33 }
 0xafd   :  { %v5068_v57 = vadd.f32 %v6707_v20, %v8993_v41  ;;  %v5059_v21 = vpop.f32.mrb[31].mxu1  ;;  %6737 = vmatmul.mubr.msk.bf16.gmra.mrb[24].mxu0 %vm1921_vm3, %v5116_v40  ;;  %v5101_v59 = vmax.f32 %v5065_v18, 0.0 }
 0xafe   :  { %v5060_v15 = vadd.f32 %v8993_v41, %v5059_v21  ;;  %v5099_v47 = vmax.f32 %v5057_v52, 0.0 }
 0xaff   :  { %v5102_v4 = vmax.f32 %v5068_v57, 0.0 }
 0xb00   :  { %v5100_v29 = vmax.f32 %v5060_v15, 0.0 }
 0xb01   :  { %v5118_v2 = vpack.c.bf16 %v5102_v4, %v5101_v59 }
 0xb02   :  { %v5117_v26 = vpack.c.bf16 %v5100_v29, %v5099_v47 }
 0xb04   :  { %6740 = vmatprep.mubr.msk.bf16.mxu0 %vm1921_vm3, %v5117_v26 }
 0xb05   :  { %6741 = vmatmul.mubr.msk.bf16.gmra.mrb[28].mxu0 %vm1921_vm3, %v5118_v2 }
 0xba0   :  { %v6714_v53 = vpop.f32.mrb[0].mxu0 }
 0xba1   :  { %v5233_v16 = vadd.f32 %v6714_v53, %v9046_v11  ;;  %v5224_v3 = vpop.f32.mrb[1].mxu0 }
 0xba2   :  { %v5225_v41 = vadd.f32 %v9046_v11, %v5224_v3  ;;  %v6715_v25 = vpop.f32.mrb[2].mxu0 }
 0xba3   :  { %5353 = vst [vmem:[%s9192_s16 + $0x110] sm:$0xff] %v5233_v16  ;;  %v5236_v1 = vadd.f32 %v6715_v25, %v9046_v11  ;;  %v5227_v27 = vpop.f32.mrb[3].mxu0 }
 0xba4   :  { %5351 = vst [vmem:[%s9192_s16 + $0x100] sm:$0xff] %v5225_v41  ;;  %v5228_v12 = vadd.f32 %v9046_v11, %v5227_v27 }
 0xba5   :  { %5354 = vst [vmem:[%s9192_s16 + $0x118] sm:$0xff] %v5236_v1 }
 0xba6   :  { %5352 = vst [vmem:[%s9192_s16 + $0x108] sm:$0xff] %v5228_v12 }
 0xba8   :  { %v6718_v34 = vpop.f32.mrb[4].mxu0 }
 0xba9   :  { %v5249_v36 = vadd.f32 %v6718_v34, %v9046_v11  ;;  %v5240_v5 = vpop.f32.mrb[5].mxu0 }
 0xbaa   :  { %v5241_v60 = vadd.f32 %v9046_v11, %v5240_v5  ;;  %v6719_v49 = vpop.f32.mrb[6].mxu0 }
 0xbab   :  { %5357 = vst [vmem:[%s9192_s16 + $0x130] sm:$0xff] %v5249_v36  ;;  %v5252_v61 = vadd.f32 %v6719_v49, %v9046_v11  ;;  %v5243_v22 = vpop.f32.mrb[7].mxu0 }
 0xbac   :  { %5355 = vst [vmem:[%s9192_s16 + $0x120] sm:$0xff] %v5241_v60  ;;  %v5244_v17 = vadd.f32 %v9046_v11, %v5243_v22 }
 0xbad   :  { %5358 = vst [vmem:[%s9192_s16 + $0x138] sm:$0xff] %v5252_v61 }
 0xbae   :  { %5356 = vst [vmem:[%s9192_s16 + $0x128] sm:$0xff] %v5244_v17 }
 0xbb0   :  { %v6722_v56 = vpop.f32.mrb[8].mxu0 }
 0xbb1   :  { %v5265_v35 = vadd.f32 %v6722_v56, %v9046_v11  ;;  %v5256_v0 = vpop.f32.mrb[9].mxu0 }
 0xbb2   :  { %v5257_v10 = vadd.f32 %v9046_v11, %v5256_v0  ;;  %v6723_v55 = vpop.f32.mrb[10].mxu0 }
 0xbb3   :  { %5361 = vst [vmem:[%s9192_s16 + $0x150] sm:$0xff] %v5265_v35  ;;  %v5268_v58 = vadd.f32 %v6723_v55, %v9046_v11  ;;  %v5259_v46 = vpop.f32.mrb[11].mxu0 }
 0xbb4   :  { %5359 = vst [vmem:[%s9192_s16 + $0x140] sm:$0xff] %v5257_v10  ;;  %v5260_v8 = vadd.f32 %v9046_v11, %v5259_v46 }
 0xbb5   :  { %5362 = vst [vmem:[%s9192_s16 + $0x158] sm:$0xff] %v5268_v58 }
 0xbb6   :  { %5360 = vst [vmem:[%s9192_s16 + $0x148] sm:$0xff] %v5260_v8 }
 0xbb8   :  { %v6726_v31 = vpop.f32.mrb[12].mxu0 }
 0xbb9   :  { %v5281_v37 = vadd.f32 %v6726_v31, %v9046_v11  ;;  %v5272_v54 = vpop.f32.mrb[13].mxu0 }
 0xbba   :  { %v5273_v23 = vadd.f32 %v9046_v11, %v5272_v54  ;;  %v6727_v45 = vpop.f32.mrb[14].mxu0 }
 0xbbb   :  { %5365 = vst [vmem:[%s9192_s16 + $0x170] sm:$0xff] %v5281_v37  ;;  %v5284_v24 = vadd.f32 %v6727_v45, %v9046_v11  ;;  %v5275_v14 = vpop.f32.mrb[15].mxu0 }
 0xbbc   :  { %5363 = vst [vmem:[%s9192_s16 + $0x160] sm:$0xff] %v5273_v23  ;;  %v5276_v9 = vadd.f32 %v9046_v11, %v5275_v14 }
 0xbbd   :  { %5366 = vst [vmem:[%s9192_s16 + $0x178] sm:$0xff] %v5284_v24 }
 0xbbe   :  { %5364 = vst [vmem:[%s9192_s16 + $0x168] sm:$0xff] %v5276_v9 }
 0xbc0   :  { %v6730_v13 = vpop.f32.mrb[16].mxu0 }
 0xbc1   :  { %v5297_v6 = vadd.f32 %v6730_v13, %v9046_v11  ;;  %v5288_v19 = vpop.f32.mrb[17].mxu0 }
 0xbc2   :  { %v5289_v44 = vadd.f32 %v9046_v11, %v5288_v19  ;;  %v6731_v51 = vpop.f32.mrb[18].mxu0 }
 0xbc3   :  { %5369 = vst [vmem:[%s9192_s16 + $0x190] sm:$0xff] %v5297_v6  ;;  %v5300_v32 = vadd.f32 %v6731_v51, %v9046_v11  ;;  %v5291_v42 = vpop.f32.mrb[19].mxu0 }
 0xbc4   :  { %5367 = vst [vmem:[%s9192_s16 + $0x180] sm:$0xff] %v5289_v44  ;;  %v5292_v62 = vadd.f32 %v9046_v11, %v5291_v42 }
 0xbc5   :  { %5370 = vst [vmem:[%s9192_s16 + $0x198] sm:$0xff] %v5300_v32 }
 0xbc6   :  { %5368 = vst [vmem:[%s9192_s16 + $0x188] sm:$0xff] %v5292_v62 }
 0xbc8   :  { %v6734_v39 = vpop.f32.mrb[20].mxu0 }
 0xbc9   :  { %v5313_v63 = vadd.f32 %v6734_v39, %v9046_v11  ;;  %v5304_v30 = vpop.f32.mrb[21].mxu0 }
 0xbca   :  { %v5305_v7 = vadd.f32 %v9046_v11, %v5304_v30  ;;  %v6735_v50 = vpop.f32.mrb[22].mxu0 }
 0xbcb   :  { %5373 = vst [vmem:[%s9192_s16 + $0x1b0] sm:$0xff] %v5313_v63  ;;  %v5316_v48 = vadd.f32 %v6735_v50, %v9046_v11  ;;  %v5307_v28 = vpop.f32.mrb[23].mxu0 }
 0xbcc   :  { %5371 = vst [vmem:[%s9192_s16 + $0x1a0] sm:$0xff] %v5305_v7  ;;  %v5308_v40 = vadd.f32 %v9046_v11, %v5307_v28 }
 0xbcd   :  { %5374 = vst [vmem:[%s9192_s16 + $0x1b8] sm:$0xff] %v5316_v48 }
 0xbce   :  { %5372 = vst [vmem:[%s9192_s16 + $0x1a8] sm:$0xff] %v5308_v40 }
 0xbd0   :  { %v6738_v33 = vpop.f32.mrb[24].mxu0 }
 0xbd1   :  { %v5329_v43 = vadd.f32 %v6738_v33, %v9046_v11  ;;  %v5320_v18 = vpop.f32.mrb[25].mxu0 }
 0xbd2   :  { %v5321_v38 = vadd.f32 %v9046_v11, %v5320_v18  ;;  %v6739_v52 = vpop.f32.mrb[26].mxu0 }
 0xbd3   :  { %5377 = vst [vmem:[%s9192_s16 + $0x1d0] sm:$0xff] %v5329_v43  ;;  %v5332_v20 = vadd.f32 %v6739_v52, %v9046_v11  ;;  %v5323_v57 = vpop.f32.mrb[27].mxu0 }
 0xbd4   :  { %5375 = vst [vmem:[%s9192_s16 + $0x1c0] sm:$0xff] %v5321_v38  ;;  %v5324_v21 = vadd.f32 %v9046_v11, %v5323_v57 }
 0xbd5   :  { %5378 = vst [vmem:[%s9192_s16 + $0x1d8] sm:$0xff] %v5332_v20 }
 0xbd6   :  { %5376 = vst [vmem:[%s9192_s16 + $0x1c8] sm:$0xff] %v5324_v21 }
 0xbd8   :  { %v6742_v15 = vpop.f32.mrb[28].mxu0 }
 0xbd9   :  { %v5345_v59 = vadd.f32 %v6742_v15, %v9046_v11  ;;  %v5336_v4 = vpop.f32.mrb[29].mxu0 }
 0xbda   :  { %v5337_v47 = vadd.f32 %v9046_v11, %v5336_v4  ;;  %v6743_v29 = vpop.f32.mrb[30].mxu0 }
 0xbdb   :  { %5381 = vst [vmem:[%s9192_s16 + $0x1f0] sm:$0xff] %v5345_v59  ;;  %v5348_v2 = vadd.f32 %v6743_v29, %v9046_v11  ;;  %v5339_v26 = vpop.f32.mrb[31].mxu0 }
 0xbdc   :  { %5379 = vst [vmem:[%s9192_s16 + $0x1e0] sm:$0xff] %v5337_v47  ;;  %v5340_v53 = vadd.f32 %v9046_v11, %v5339_v26 }
 0xbdd   :  { %5382 = vst [vmem:[%s9192_s16 + $0x1f8] sm:$0xff] %v5348_v2 }
 0xbde   :  { %5380 = vst [vmem:[%s9192_s16 + $0x1e8] sm:$0xff] %v5340_v53 }

</bundles_post_ra>
